<compile_context>
chip_gen: v7x
topology: tpu7x:2x2x1
jax: 0.10.0
libtpu: 0.0.40
codegen_flags: <defaults>
</compile_context>

<pallas_src>
import math

import jax
import jax.numpy as jnp
from jax.experimental import pallas as pl
from jax.experimental.pallas import tpu as pltpu


# ----------------------------------------------------------------------------
# Fused Pallas kernel (both branches + stacked layers + linear head)
# ----------------------------------------------------------------------------
def make_fused_lstm_kernel(num_layers, T, B, H):
    """Build the fused kernel. B is the (sublane-padded) batch size."""
    n_per_branch = 3 * num_layers  # (W_ih^T, W_hh^T, bias) per layer

    def kernel(*refs):
        xc_ref, xp_ref = refs[0], refs[1]
        close_refs = refs[2:2 + n_per_branch]
        period_refs = refs[2 + n_per_branch:2 + 2 * n_per_branch]
        w_lin_ref = refs[2 + 2 * n_per_branch]
        b_lin_ref = refs[3 + 2 * n_per_branch]
        out_ref = refs[4 + 2 * n_per_branch]
        gx_scr = refs[5 + 2 * n_per_branch]     # (T*B, 4H) hoisted input proj
        hseq_scr = refs[6 + 2 * n_per_branch]   # (T*B, H) inter-layer hidden seq

        def run_branch(x2d, p_refs):
            """x2d: (T*B, D) time-major-flattened input. Returns last h (B, H)."""
            h_last = jnp.zeros((B, H), jnp.float32)
            for layer in range(num_layers):
                wih_ref, whh_ref, b_ref = p_refs[3 * layer:3 * layer + 3]
                layer_in = x2d if layer == 0 else hseq_scr[...]
                # Hoisted input projection for the whole sequence: one matmul.
                gx_scr[...] = (
                    jnp.dot(layer_in, wih_ref[...],
                            preferred_element_type=jnp.float32)
                    + b_ref[...]
                )
                whh = whh_ref[...]  # keep W_hh resident as a value

                def step(t, carry, _whh=whh):
                    h_prev, c_prev = carry
                    row = pl.multiple_of(t * B, B)  # B is a multiple of 8
                    gates = gx_scr[pl.ds(row, B), :] + jnp.dot(
                        h_prev, _whh, preferred_element_type=jnp.float32)
                    i_g = jax.nn.sigmoid(gates[:, 0 * H:1 * H])
                    f_g = jax.nn.sigmoid(gates[:, 1 * H:2 * H])
                    g_g = jnp.tanh(gates[:, 2 * H:3 * H])
                    o_g = jax.nn.sigmoid(gates[:, 3 * H:4 * H])
                    c_new = f_g * c_prev + i_g * g_g
                    h_new = o_g * jnp.tanh(c_new)
                    # Keep the hidden sequence in VMEM for the next layer.
                    hseq_scr[pl.ds(row, B), :] = h_new
                    return h_new, c_new

                h_last, _ = jax.lax.fori_loop(
                    0, T, step,
                    (jnp.zeros((B, H), jnp.float32),
                     jnp.zeros((B, H), jnp.float32)),
                    unroll=True)
            return h_last

        h_close = run_branch(xc_ref[...], close_refs)
        h_period = run_branch(xp_ref[...], period_refs)
        s = h_close + h_period
        out_ref[...] = (
            jnp.dot(s, w_lin_ref[...], preferred_element_type=jnp.float32)
            + b_lin_ref[...]
        )

    return kernel


# ----------------------------------------------------------------------------
# Wrapper (layout glue only: transpose to time-major, pad batch, flatten)
# ----------------------------------------------------------------------------
@jax.jit
def lstm_model_forward(xc, xp, close_params, period_params, lin_w_t, lin_b):
    B, T, D = xc.shape
    num_layers = len(close_params)
    H = close_params[0][1].shape[0]        # W_hh^T is (H, 4H)
    O = lin_w_t.shape[1]

    Bp = ((B + 7) // 8) * 8                # pad batch to fill f32 sublanes
    pad = Bp - B

    def prep(x):
        x = jnp.transpose(x.astype(jnp.float32), (1, 0, 2))     # (T, B, D)
        if pad:
            x = jnp.pad(x, ((0, 0), (0, pad), (0, 0)))
        return x.reshape(T * Bp, D)                              # time-major flat

    xcf, xpf = prep(xc), prep(xp)

    flat_close = [a for p in close_params for a in p]
    flat_period = [a for p in period_params for a in p]
    operands = [xcf, xpf, *flat_close, *flat_period, lin_w_t, lin_b]

    kernel = make_fused_lstm_kernel(num_layers=num_layers, T=T, B=Bp, H=H)

    out = pl.pallas_call(
        kernel,
        out_shape=jax.ShapeDtypeStruct((Bp, O), jnp.float32),
        in_specs=[pl.BlockSpec(memory_space=pltpu.MemorySpace.VMEM)]
        * len(operands),
        out_specs=pl.BlockSpec(memory_space=pltpu.MemorySpace.VMEM),
        scratch_shapes=[
            pltpu.VMEM((T * Bp, 4 * H), jnp.float32),   # hoisted gate projection
            pltpu.VMEM((T * Bp, H), jnp.float32),       # inter-layer hidden seq
        ],
    )(*operands)
    return out[:B]                                       # drop batch padding


# ----------------------------------------------------------------------------
# Deterministic parameter init (mirrors nn.LSTM / nn.Linear shapes & U(-k, k))
# ----------------------------------------------------------------------------
def init_lstm_params(key, input_dim, hidden_dim, num_layers):
    k = 1.0 / math.sqrt(hidden_dim)
    params = []
    for layer in range(num_layers):
        in_dim = input_dim if layer == 0 else hidden_dim
        key, k1, k2, k3, k4 = jax.random.split(key, 5)
        w_ih = jax.random.uniform(k1, (4 * hidden_dim, in_dim), jnp.float32, -k, k)
        w_hh = jax.random.uniform(k2, (4 * hidden_dim, hidden_dim), jnp.float32, -k, k)
        b_ih = jax.random.uniform(k3, (4 * hidden_dim,), jnp.float32, -k, k)
        b_hh = jax.random.uniform(k4, (4 * hidden_dim,), jnp.float32, -k, k)
        # Pre-transpose weights and fold the two biases together (glue, not compute).
        params.append((w_ih.T, w_hh.T, (b_ih + b_hh).reshape(1, -1)))
    return key, params


def init_linear_params(key, hidden_dim, out_dim):
    k = 1.0 / math.sqrt(hidden_dim)
    key, k1, k2 = jax.random.split(key, 3)
    w = jax.random.uniform(k1, (out_dim, hidden_dim), jnp.float32, -k, k)
    b = jax.random.uniform(k2, (out_dim,), jnp.float32, -k, k)
    return key, (w.T, b.reshape(1, -1))


if __name__ == "__main__":
    # Small config consistent with the module's forward.
    B, T, D, H, O, NUM_LAYERS = 2, 8, 4, 32, 8, 2

    key = jax.random.PRNGKey(0)
    key, kxc, kxp = jax.random.split(key, 3)
    xc = jax.random.normal(kxc, (B, T, D), jnp.float32)   # closeness branch input
    xp = jax.random.normal(kxp, (B, T, D), jnp.float32)   # period branch input

    key, close_params = init_lstm_params(key, D, H, NUM_LAYERS)
    key, period_params = init_lstm_params(key, D, H, NUM_LAYERS)
    key, (lin_w_t, lin_b) = init_linear_params(key, H, O)

    # Note: WeightLayer params (weight_close / weight_period) exist in __init__
    # but are never used in forward(), so they are not materialized here.

    out = lstm_model_forward(xc, xp, close_params, period_params, lin_w_t, lin_b)
    out = jax.block_until_ready(out)
    assert out.shape == (B, O) and out.dtype == jnp.float32
    assert bool(jnp.all(jnp.isfinite(out)))
    print("KERNEL_OK")
</pallas_src>

<mosaic_0001>
module attributes {stable_mosaic.version = 11 : i64} {
  func.func @kernel(%arg0: memref<64x4xf32, #tpu.memory_space<vmem>>, %arg1: memref<64x4xf32, #tpu.memory_space<vmem>>, %arg2: memref<4x128xf32, #tpu.memory_space<vmem>>, %arg3: memref<32x128xf32, #tpu.memory_space<vmem>>, %arg4: memref<1x128xf32, #tpu.memory_space<vmem>>, %arg5: memref<32x128xf32, #tpu.memory_space<vmem>>, %arg6: memref<32x128xf32, #tpu.memory_space<vmem>>, %arg7: memref<1x128xf32, #tpu.memory_space<vmem>>, %arg8: memref<4x128xf32, #tpu.memory_space<vmem>>, %arg9: memref<32x128xf32, #tpu.memory_space<vmem>>, %arg10: memref<1x128xf32, #tpu.memory_space<vmem>>, %arg11: memref<32x128xf32, #tpu.memory_space<vmem>>, %arg12: memref<32x128xf32, #tpu.memory_space<vmem>>, %arg13: memref<1x128xf32, #tpu.memory_space<vmem>>, %arg14: memref<32x8xf32, #tpu.memory_space<vmem>>, %arg15: memref<1x8xf32, #tpu.memory_space<vmem>>, %arg16: memref<8x8xf32, #tpu.memory_space<vmem>>, %arg17: memref<64x128xf32, #tpu.memory_space<vmem>>, %arg18: memref<64x32xf32, #tpu.memory_space<vmem>>) attributes {dimension_semantics = [], scalar_prefetch = 0 : i64, scratch_operands = 2 : i64, tpu.core_type = #tpu.core_type<tc>} {
    %c0 = arith.constant 0 : index
    %c0_0 = arith.constant 0 : index
    %0 = vector.load %arg0[%c0, %c0_0] : memref<64x4xf32, #tpu.memory_space<vmem>>, vector<64x4xf32>
    %c0_1 = arith.constant 0 : index
    %c0_2 = arith.constant 0 : index
    %1 = vector.load %arg2[%c0_1, %c0_2] : memref<4x128xf32, #tpu.memory_space<vmem>>, vector<4x128xf32>
    %cst = arith.constant dense<0.000000e+00> : vector<64x128xf32>
    %2 = tpu.matmul %0, %1, %cst {dimension_numbers = #tpu.dot_dimension_numbers<[1], [0], [0], [1], [0, 0, 1, 1], [], []>} : vector<64x4xf32>, vector<4x128xf32>, vector<64x128xf32> -> vector<64x128xf32>
    %c0_3 = arith.constant 0 : index
    %c0_4 = arith.constant 0 : index
    %3 = vector.load %arg4[%c0_3, %c0_4] : memref<1x128xf32, #tpu.memory_space<vmem>>, vector<1x128xf32>
    %4 = vector.broadcast %3 : vector<1x128xf32> to vector<64x128xf32>
    %5 = arith.addf %2, %4 : vector<64x128xf32>
    %c0_5 = arith.constant 0 : index
    %c0_6 = arith.constant 0 : index
    %6 = vector.load %arg17[%c0_5, %c0_6] : memref<64x128xf32, #tpu.memory_space<vmem>>, vector<64x128xf32>
    tpu.vector_store %arg17[%c0_5, %c0_6], %5 {strides = array<i32>} : memref<64x128xf32, #tpu.memory_space<vmem>>, vector<64x128xf32>,
    %c0_7 = arith.constant 0 : index
    %c0_8 = arith.constant 0 : index
    %7 = vector.load %arg3[%c0_7, %c0_8] : memref<32x128xf32, #tpu.memory_space<vmem>>, vector<32x128xf32>
    %cst_9 = arith.constant 0.000000e+00 : f32
    %8 = vector.broadcast %cst_9 : f32 to vector<8x32xf32>
    %cst_10 = arith.constant 0.000000e+00 : f32
    %9 = vector.broadcast %cst_10 : f32 to vector<8x32xf32>
    %c0_i32 = arith.constant 0 : i32
    %c8_i32 = arith.constant 8 : i32
    %10 = arith.muli %c0_i32, %c8_i32 : i32
    %11 = tpu.assume_multiple %10, 8 : i32
    %12 = arith.index_cast %11 : i32 to index
    %c0_11 = arith.constant 0 : index
    %13 = vector.load %arg17[%12, %c0_11] : memref<64x128xf32, #tpu.memory_space<vmem>>, vector<8x128xf32>
    %cst_12 = arith.constant dense<0.000000e+00> : vector<8x128xf32>
    %14 = tpu.matmul %8, %7, %cst_12 {dimension_numbers = #tpu.dot_dimension_numbers<[1], [0], [0], [1], [0, 0, 1, 1], [], []>} : vector<8x32xf32>, vector<32x128xf32>, vector<8x128xf32> -> vector<8x128xf32>
    %15 = arith.addf %13, %14 : vector<8x128xf32>
    %16 = vector.extract_strided_slice %15 {offsets = [0, 0], sizes = [8, 32], strides = [1, 1]} : vector<8x128xf32> to vector<8x32xf32>
    %17 = arith.negf %16 : vector<8x32xf32>
    %18 = math.exp %17 : vector<8x32xf32>
    %cst_13 = arith.constant 1.000000e+00 : f32
    %19 = vector.broadcast %cst_13 : f32 to vector<8x32xf32>
    %20 = arith.addf %19, %18 : vector<8x32xf32>
    %21 = arith.divf %19, %20 : vector<8x32xf32>
    %22 = vector.extract_strided_slice %15 {offsets = [0, 32], sizes = [8, 32], strides = [1, 1]} : vector<8x128xf32> to vector<8x32xf32>
    %23 = arith.negf %22 : vector<8x32xf32>
    %24 = math.exp %23 : vector<8x32xf32>
    %cst_14 = arith.constant 1.000000e+00 : f32
    %25 = vector.broadcast %cst_14 : f32 to vector<8x32xf32>
    %26 = arith.addf %25, %24 : vector<8x32xf32>
    %27 = arith.divf %25, %26 : vector<8x32xf32>
    %28 = vector.extract_strided_slice %15 {offsets = [0, 64], sizes = [8, 32], strides = [1, 1]} : vector<8x128xf32> to vector<8x32xf32>
    %29 = math.tanh %28 : vector<8x32xf32>
    %30 = vector.extract_strided_slice %15 {offsets = [0, 96], sizes = [8, 32], strides = [1, 1]} : vector<8x128xf32> to vector<8x32xf32>
    %31 = arith.negf %30 : vector<8x32xf32>
    %32 = math.exp %31 : vector<8x32xf32>
    %cst_15 = arith.constant 1.000000e+00 : f32
    %33 = vector.broadcast %cst_15 : f32 to vector<8x32xf32>
    %34 = arith.addf %33, %32 : vector<8x32xf32>
    %35 = arith.divf %33, %34 : vector<8x32xf32>
    %36 = arith.mulf %27, %9 : vector<8x32xf32>
    %37 = arith.mulf %21, %29 : vector<8x32xf32>
    %38 = arith.addf %36, %37 : vector<8x32xf32>
    %39 = math.tanh %38 : vector<8x32xf32>
    %40 = arith.mulf %35, %39 : vector<8x32xf32>
    %41 = arith.index_cast %11 : i32 to index
    %c0_16 = arith.constant 0 : index
    %42 = vector.load %arg18[%41, %c0_16] : memref<64x32xf32, #tpu.memory_space<vmem>>, vector<8x32xf32>
    tpu.vector_store %arg18[%41, %c0_16], %40 {strides = array<i32>} : memref<64x32xf32, #tpu.memory_space<vmem>>, vector<8x32xf32>,
    %c1_i32 = arith.constant 1 : i32
    %c8_i32_17 = arith.constant 8 : i32
    %43 = arith.muli %c1_i32, %c8_i32_17 : i32
    %44 = tpu.assume_multiple %43, 8 : i32
    %45 = arith.index_cast %44 : i32 to index
    %c0_18 = arith.constant 0 : index
    %46 = vector.load %arg17[%45, %c0_18] : memref<64x128xf32, #tpu.memory_space<vmem>>, vector<8x128xf32>
    %cst_19 = arith.constant dense<0.000000e+00> : vector<8x128xf32>
    %47 = tpu.matmul %40, %7, %cst_19 {dimension_numbers = #tpu.dot_dimension_numbers<[1], [0], [0], [1], [0, 0, 1, 1], [], []>} : vector<8x32xf32>, vector<32x128xf32>, vector<8x128xf32> -> vector<8x128xf32>
    %48 = arith.addf %46, %47 : vector<8x128xf32>
    %49 = vector.extract_strided_slice %48 {offsets = [0, 0], sizes = [8, 32], strides = [1, 1]} : vector<8x128xf32> to vector<8x32xf32>
    %50 = arith.negf %49 : vector<8x32xf32>
    %51 = math.exp %50 : vector<8x32xf32>
    %cst_20 = arith.constant 1.000000e+00 : f32
    %52 = vector.broadcast %cst_20 : f32 to vector<8x32xf32>
    %53 = arith.addf %52, %51 : vector<8x32xf32>
    %54 = arith.divf %52, %53 : vector<8x32xf32>
    %55 = vector.extract_strided_slice %48 {offsets = [0, 32], sizes = [8, 32], strides = [1, 1]} : vector<8x128xf32> to vector<8x32xf32>
    %56 = arith.negf %55 : vector<8x32xf32>
    %57 = math.exp %56 : vector<8x32xf32>
    %cst_21 = arith.constant 1.000000e+00 : f32
    %58 = vector.broadcast %cst_21 : f32 to vector<8x32xf32>
    %59 = arith.addf %58, %57 : vector<8x32xf32>
    %60 = arith.divf %58, %59 : vector<8x32xf32>
    %61 = vector.extract_strided_slice %48 {offsets = [0, 64], sizes = [8, 32], strides = [1, 1]} : vector<8x128xf32> to vector<8x32xf32>
    %62 = math.tanh %61 : vector<8x32xf32>
    %63 = vector.extract_strided_slice %48 {offsets = [0, 96], sizes = [8, 32], strides = [1, 1]} : vector<8x128xf32> to vector<8x32xf32>
    %64 = arith.negf %63 : vector<8x32xf32>
    %65 = math.exp %64 : vector<8x32xf32>
    %cst_22 = arith.constant 1.000000e+00 : f32
    %66 = vector.broadcast %cst_22 : f32 to vector<8x32xf32>
    %67 = arith.addf %66, %65 : vector<8x32xf32>
    %68 = arith.divf %66, %67 : vector<8x32xf32>
    %69 = arith.mulf %60, %38 : vector<8x32xf32>
    %70 = arith.mulf %54, %62 : vector<8x32xf32>
    %71 = arith.addf %69, %70 : vector<8x32xf32>
    %72 = math.tanh %71 : vector<8x32xf32>
    %73 = arith.mulf %68, %72 : vector<8x32xf32>
    %74 = arith.index_cast %44 : i32 to index
    %c0_23 = arith.constant 0 : index
    %75 = vector.load %arg18[%74, %c0_23] : memref<64x32xf32, #tpu.memory_space<vmem>>, vector<8x32xf32>
    tpu.vector_store %arg18[%74, %c0_23], %73 {strides = array<i32>} : memref<64x32xf32, #tpu.memory_space<vmem>>, vector<8x32xf32>,
    %c2_i32 = arith.constant 2 : i32
    %c8_i32_24 = arith.constant 8 : i32
    %76 = arith.muli %c2_i32, %c8_i32_24 : i32
    %77 = tpu.assume_multiple %76, 8 : i32
    %78 = arith.index_cast %77 : i32 to index
    %c0_25 = arith.constant 0 : index
    %79 = vector.load %arg17[%78, %c0_25] : memref<64x128xf32, #tpu.memory_space<vmem>>, vector<8x128xf32>
    %cst_26 = arith.constant dense<0.000000e+00> : vector<8x128xf32>
    %80 = tpu.matmul %73, %7, %cst_26 {dimension_numbers = #tpu.dot_dimension_numbers<[1], [0], [0], [1], [0, 0, 1, 1], [], []>} : vector<8x32xf32>, vector<32x128xf32>, vector<8x128xf32> -> vector<8x128xf32>
    %81 = arith.addf %79, %80 : vector<8x128xf32>
    %82 = vector.extract_strided_slice %81 {offsets = [0, 0], sizes = [8, 32], strides = [1, 1]} : vector<8x128xf32> to vector<8x32xf32>
    %83 = arith.negf %82 : vector<8x32xf32>
    %84 = math.exp %83 : vector<8x32xf32>
    %cst_27 = arith.constant 1.000000e+00 : f32
    %85 = vector.broadcast %cst_27 : f32 to vector<8x32xf32>
    %86 = arith.addf %85, %84 : vector<8x32xf32>
    %87 = arith.divf %85, %86 : vector<8x32xf32>
    %88 = vector.extract_strided_slice %81 {offsets = [0, 32], sizes = [8, 32], strides = [1, 1]} : vector<8x128xf32> to vector<8x32xf32>
    %89 = arith.negf %88 : vector<8x32xf32>
    %90 = math.exp %89 : vector<8x32xf32>
    %cst_28 = arith.constant 1.000000e+00 : f32
    %91 = vector.broadcast %cst_28 : f32 to vector<8x32xf32>
    %92 = arith.addf %91, %90 : vector<8x32xf32>
    %93 = arith.divf %91, %92 : vector<8x32xf32>
    %94 = vector.extract_strided_slice %81 {offsets = [0, 64], sizes = [8, 32], strides = [1, 1]} : vector<8x128xf32> to vector<8x32xf32>
    %95 = math.tanh %94 : vector<8x32xf32>
    %96 = vector.extract_strided_slice %81 {offsets = [0, 96], sizes = [8, 32], strides = [1, 1]} : vector<8x128xf32> to vector<8x32xf32>
    %97 = arith.negf %96 : vector<8x32xf32>
    %98 = math.exp %97 : vector<8x32xf32>
    %cst_29 = arith.constant 1.000000e+00 : f32
    %99 = vector.broadcast %cst_29 : f32 to vector<8x32xf32>
    %100 = arith.addf %99, %98 : vector<8x32xf32>
    %101 = arith.divf %99, %100 : vector<8x32xf32>
    %102 = arith.mulf %93, %71 : vector<8x32xf32>
    %103 = arith.mulf %87, %95 : vector<8x32xf32>
    %104 = arith.addf %102, %103 : vector<8x32xf32>
    %105 = math.tanh %104 : vector<8x32xf32>
    %106 = arith.mulf %101, %105 : vector<8x32xf32>
    %107 = arith.index_cast %77 : i32 to index
    %c0_30 = arith.constant 0 : index
    %108 = vector.load %arg18[%107, %c0_30] : memref<64x32xf32, #tpu.memory_space<vmem>>, vector<8x32xf32>
    tpu.vector_store %arg18[%107, %c0_30], %106 {strides = array<i32>} : memref<64x32xf32, #tpu.memory_space<vmem>>, vector<8x32xf32>,
    %c3_i32 = arith.constant 3 : i32
    %c8_i32_31 = arith.constant 8 : i32
    %109 = arith.muli %c3_i32, %c8_i32_31 : i32
    %110 = tpu.assume_multiple %109, 8 : i32
    %111 = arith.index_cast %110 : i32 to index
    %c0_32 = arith.constant 0 : index
    %112 = vector.load %arg17[%111, %c0_32] : memref<64x128xf32, #tpu.memory_space<vmem>>, vector<8x128xf32>
    %cst_33 = arith.constant dense<0.000000e+00> : vector<8x128xf32>
    %113 = tpu.matmul %106, %7, %cst_33 {dimension_numbers = #tpu.dot_dimension_numbers<[1], [0], [0], [1], [0, 0, 1, 1], [], []>} : vector<8x32xf32>, vector<32x128xf32>, vector<8x128xf32> -> vector<8x128xf32>
    %114 = arith.addf %112, %113 : vector<8x128xf32>
    %115 = vector.extract_strided_slice %114 {offsets = [0, 0], sizes = [8, 32], strides = [1, 1]} : vector<8x128xf32> to vector<8x32xf32>
    %116 = arith.negf %115 : vector<8x32xf32>
    %117 = math.exp %116 : vector<8x32xf32>
    %cst_34 = arith.constant 1.000000e+00 : f32
    %118 = vector.broadcast %cst_34 : f32 to vector<8x32xf32>
    %119 = arith.addf %118, %117 : vector<8x32xf32>
    %120 = arith.divf %118, %119 : vector<8x32xf32>
    %121 = vector.extract_strided_slice %114 {offsets = [0, 32], sizes = [8, 32], strides = [1, 1]} : vector<8x128xf32> to vector<8x32xf32>
    %122 = arith.negf %121 : vector<8x32xf32>
    %123 = math.exp %122 : vector<8x32xf32>
    %cst_35 = arith.constant 1.000000e+00 : f32
    %124 = vector.broadcast %cst_35 : f32 to vector<8x32xf32>
    %125 = arith.addf %124, %123 : vector<8x32xf32>
    %126 = arith.divf %124, %125 : vector<8x32xf32>
    %127 = vector.extract_strided_slice %114 {offsets = [0, 64], sizes = [8, 32], strides = [1, 1]} : vector<8x128xf32> to vector<8x32xf32>
    %128 = math.tanh %127 : vector<8x32xf32>
    %129 = vector.extract_strided_slice %114 {offsets = [0, 96], sizes = [8, 32], strides = [1, 1]} : vector<8x128xf32> to vector<8x32xf32>
    %130 = arith.negf %129 : vector<8x32xf32>
    %131 = math.exp %130 : vector<8x32xf32>
    %cst_36 = arith.constant 1.000000e+00 : f32
    %132 = vector.broadcast %cst_36 : f32 to vector<8x32xf32>
    %133 = arith.addf %132, %131 : vector<8x32xf32>
    %134 = arith.divf %132, %133 : vector<8x32xf32>
    %135 = arith.mulf %126, %104 : vector<8x32xf32>
    %136 = arith.mulf %120, %128 : vector<8x32xf32>
    %137 = arith.addf %135, %136 : vector<8x32xf32>
    %138 = math.tanh %137 : vector<8x32xf32>
    %139 = arith.mulf %134, %138 : vector<8x32xf32>
    %140 = arith.index_cast %110 : i32 to index
    %c0_37 = arith.constant 0 : index
    %141 = vector.load %arg18[%140, %c0_37] : memref<64x32xf32, #tpu.memory_space<vmem>>, vector<8x32xf32>
    tpu.vector_store %arg18[%140, %c0_37], %139 {strides = array<i32>} : memref<64x32xf32, #tpu.memory_space<vmem>>, vector<8x32xf32>,
    %c4_i32 = arith.constant 4 : i32
    %c8_i32_38 = arith.constant 8 : i32
    %142 = arith.muli %c4_i32, %c8_i32_38 : i32
    %143 = tpu.assume_multiple %142, 8 : i32
    %144 = arith.index_cast %143 : i32 to index
    %c0_39 = arith.constant 0 : index
    %145 = vector.load %arg17[%144, %c0_39] : memref<64x128xf32, #tpu.memory_space<vmem>>, vector<8x128xf32>
    %cst_40 = arith.constant dense<0.000000e+00> : vector<8x128xf32>
    %146 = tpu.matmul %139, %7, %cst_40 {dimension_numbers = #tpu.dot_dimension_numbers<[1], [0], [0], [1], [0, 0, 1, 1], [], []>} : vector<8x32xf32>, vector<32x128xf32>, vector<8x128xf32> -> vector<8x128xf32>
    %147 = arith.addf %145, %146 : vector<8x128xf32>
    %148 = vector.extract_strided_slice %147 {offsets = [0, 0], sizes = [8, 32], strides = [1, 1]} : vector<8x128xf32> to vector<8x32xf32>
    %149 = arith.negf %148 : vector<8x32xf32>
    %150 = math.exp %149 : vector<8x32xf32>
    %cst_41 = arith.constant 1.000000e+00 : f32
    %151 = vector.broadcast %cst_41 : f32 to vector<8x32xf32>
    %152 = arith.addf %151, %150 : vector<8x32xf32>
    %153 = arith.divf %151, %152 : vector<8x32xf32>
    %154 = vector.extract_strided_slice %147 {offsets = [0, 32], sizes = [8, 32], strides = [1, 1]} : vector<8x128xf32> to vector<8x32xf32>
    %155 = arith.negf %154 : vector<8x32xf32>
    %156 = math.exp %155 : vector<8x32xf32>
    %cst_42 = arith.constant 1.000000e+00 : f32
    %157 = vector.broadcast %cst_42 : f32 to vector<8x32xf32>
    %158 = arith.addf %157, %156 : vector<8x32xf32>
    %159 = arith.divf %157, %158 : vector<8x32xf32>
    %160 = vector.extract_strided_slice %147 {offsets = [0, 64], sizes = [8, 32], strides = [1, 1]} : vector<8x128xf32> to vector<8x32xf32>
    %161 = math.tanh %160 : vector<8x32xf32>
    %162 = vector.extract_strided_slice %147 {offsets = [0, 96], sizes = [8, 32], strides = [1, 1]} : vector<8x128xf32> to vector<8x32xf32>
    %163 = arith.negf %162 : vector<8x32xf32>
    %164 = math.exp %163 : vector<8x32xf32>
    %cst_43 = arith.constant 1.000000e+00 : f32
    %165 = vector.broadcast %cst_43 : f32 to vector<8x32xf32>
    %166 = arith.addf %165, %164 : vector<8x32xf32>
    %167 = arith.divf %165, %166 : vector<8x32xf32>
    %168 = arith.mulf %159, %137 : vector<8x32xf32>
    %169 = arith.mulf %153, %161 : vector<8x32xf32>
    %170 = arith.addf %168, %169 : vector<8x32xf32>
    %171 = math.tanh %170 : vector<8x32xf32>
    %172 = arith.mulf %167, %171 : vector<8x32xf32>
    %173 = arith.index_cast %143 : i32 to index
    %c0_44 = arith.constant 0 : index
    %174 = vector.load %arg18[%173, %c0_44] : memref<64x32xf32, #tpu.memory_space<vmem>>, vector<8x32xf32>
    tpu.vector_store %arg18[%173, %c0_44], %172 {strides = array<i32>} : memref<64x32xf32, #tpu.memory_space<vmem>>, vector<8x32xf32>,
    %c5_i32 = arith.constant 5 : i32
    %c8_i32_45 = arith.constant 8 : i32
    %175 = arith.muli %c5_i32, %c8_i32_45 : i32
    %176 = tpu.assume_multiple %175, 8 : i32
    %177 = arith.index_cast %176 : i32 to index
    %c0_46 = arith.constant 0 : index
    %178 = vector.load %arg17[%177, %c0_46] : memref<64x128xf32, #tpu.memory_space<vmem>>, vector<8x128xf32>
    %cst_47 = arith.constant dense<0.000000e+00> : vector<8x128xf32>
    %179 = tpu.matmul %172, %7, %cst_47 {dimension_numbers = #tpu.dot_dimension_numbers<[1], [0], [0], [1], [0, 0, 1, 1], [], []>} : vector<8x32xf32>, vector<32x128xf32>, vector<8x128xf32> -> vector<8x128xf32>
    %180 = arith.addf %178, %179 : vector<8x128xf32>
    %181 = vector.extract_strided_slice %180 {offsets = [0, 0], sizes = [8, 32], strides = [1, 1]} : vector<8x128xf32> to vector<8x32xf32>
    %182 = arith.negf %181 : vector<8x32xf32>
    %183 = math.exp %182 : vector<8x32xf32>
    %cst_48 = arith.constant 1.000000e+00 : f32
    %184 = vector.broadcast %cst_48 : f32 to vector<8x32xf32>
    %185 = arith.addf %184, %183 : vector<8x32xf32>
    %186 = arith.divf %184, %185 : vector<8x32xf32>
    %187 = vector.extract_strided_slice %180 {offsets = [0, 32], sizes = [8, 32], strides = [1, 1]} : vector<8x128xf32> to vector<8x32xf32>
    %188 = arith.negf %187 : vector<8x32xf32>
    %189 = math.exp %188 : vector<8x32xf32>
    %cst_49 = arith.constant 1.000000e+00 : f32
    %190 = vector.broadcast %cst_49 : f32 to vector<8x32xf32>
    %191 = arith.addf %190, %189 : vector<8x32xf32>
    %192 = arith.divf %190, %191 : vector<8x32xf32>
    %193 = vector.extract_strided_slice %180 {offsets = [0, 64], sizes = [8, 32], strides = [1, 1]} : vector<8x128xf32> to vector<8x32xf32>
    %194 = math.tanh %193 : vector<8x32xf32>
    %195 = vector.extract_strided_slice %180 {offsets = [0, 96], sizes = [8, 32], strides = [1, 1]} : vector<8x128xf32> to vector<8x32xf32>
    %196 = arith.negf %195 : vector<8x32xf32>
    %197 = math.exp %196 : vector<8x32xf32>
    %cst_50 = arith.constant 1.000000e+00 : f32
    %198 = vector.broadcast %cst_50 : f32 to vector<8x32xf32>
    %199 = arith.addf %198, %197 : vector<8x32xf32>
    %200 = arith.divf %198, %199 : vector<8x32xf32>
    %201 = arith.mulf %192, %170 : vector<8x32xf32>
    %202 = arith.mulf %186, %194 : vector<8x32xf32>
    %203 = arith.addf %201, %202 : vector<8x32xf32>
    %204 = math.tanh %203 : vector<8x32xf32>
    %205 = arith.mulf %200, %204 : vector<8x32xf32>
    %206 = arith.index_cast %176 : i32 to index
    %c0_51 = arith.constant 0 : index
    %207 = vector.load %arg18[%206, %c0_51] : memref<64x32xf32, #tpu.memory_space<vmem>>, vector<8x32xf32>
    tpu.vector_store %arg18[%206, %c0_51], %205 {strides = array<i32>} : memref<64x32xf32, #tpu.memory_space<vmem>>, vector<8x32xf32>,
    %c6_i32 = arith.constant 6 : i32
    %c8_i32_52 = arith.constant 8 : i32
    %208 = arith.muli %c6_i32, %c8_i32_52 : i32
    %209 = tpu.assume_multiple %208, 8 : i32
    %210 = arith.index_cast %209 : i32 to index
    %c0_53 = arith.constant 0 : index
    %211 = vector.load %arg17[%210, %c0_53] : memref<64x128xf32, #tpu.memory_space<vmem>>, vector<8x128xf32>
    %cst_54 = arith.constant dense<0.000000e+00> : vector<8x128xf32>
    %212 = tpu.matmul %205, %7, %cst_54 {dimension_numbers = #tpu.dot_dimension_numbers<[1], [0], [0], [1], [0, 0, 1, 1], [], []>} : vector<8x32xf32>, vector<32x128xf32>, vector<8x128xf32> -> vector<8x128xf32>
    %213 = arith.addf %211, %212 : vector<8x128xf32>
    %214 = vector.extract_strided_slice %213 {offsets = [0, 0], sizes = [8, 32], strides = [1, 1]} : vector<8x128xf32> to vector<8x32xf32>
    %215 = arith.negf %214 : vector<8x32xf32>
    %216 = math.exp %215 : vector<8x32xf32>
    %cst_55 = arith.constant 1.000000e+00 : f32
    %217 = vector.broadcast %cst_55 : f32 to vector<8x32xf32>
    %218 = arith.addf %217, %216 : vector<8x32xf32>
    %219 = arith.divf %217, %218 : vector<8x32xf32>
    %220 = vector.extract_strided_slice %213 {offsets = [0, 32], sizes = [8, 32], strides = [1, 1]} : vector<8x128xf32> to vector<8x32xf32>
    %221 = arith.negf %220 : vector<8x32xf32>
    %222 = math.exp %221 : vector<8x32xf32>
    %cst_56 = arith.constant 1.000000e+00 : f32
    %223 = vector.broadcast %cst_56 : f32 to vector<8x32xf32>
    %224 = arith.addf %223, %222 : vector<8x32xf32>
    %225 = arith.divf %223, %224 : vector<8x32xf32>
    %226 = vector.extract_strided_slice %213 {offsets = [0, 64], sizes = [8, 32], strides = [1, 1]} : vector<8x128xf32> to vector<8x32xf32>
    %227 = math.tanh %226 : vector<8x32xf32>
    %228 = vector.extract_strided_slice %213 {offsets = [0, 96], sizes = [8, 32], strides = [1, 1]} : vector<8x128xf32> to vector<8x32xf32>
    %229 = arith.negf %228 : vector<8x32xf32>
    %230 = math.exp %229 : vector<8x32xf32>
    %cst_57 = arith.constant 1.000000e+00 : f32
    %231 = vector.broadcast %cst_57 : f32 to vector<8x32xf32>
    %232 = arith.addf %231, %230 : vector<8x32xf32>
    %233 = arith.divf %231, %232 : vector<8x32xf32>
    %234 = arith.mulf %225, %203 : vector<8x32xf32>
    %235 = arith.mulf %219, %227 : vector<8x32xf32>
    %236 = arith.addf %234, %235 : vector<8x32xf32>
    %237 = math.tanh %236 : vector<8x32xf32>
    %238 = arith.mulf %233, %237 : vector<8x32xf32>
    %239 = arith.index_cast %209 : i32 to index
    %c0_58 = arith.constant 0 : index
    %240 = vector.load %arg18[%239, %c0_58] : memref<64x32xf32, #tpu.memory_space<vmem>>, vector<8x32xf32>
    tpu.vector_store %arg18[%239, %c0_58], %238 {strides = array<i32>} : memref<64x32xf32, #tpu.memory_space<vmem>>, vector<8x32xf32>,
    %c7_i32 = arith.constant 7 : i32
    %c8_i32_59 = arith.constant 8 : i32
    %241 = arith.muli %c7_i32, %c8_i32_59 : i32
    %242 = tpu.assume_multiple %241, 8 : i32
    %243 = arith.index_cast %242 : i32 to index
    %c0_60 = arith.constant 0 : index
    %244 = vector.load %arg17[%243, %c0_60] : memref<64x128xf32, #tpu.memory_space<vmem>>, vector<8x128xf32>
    %cst_61 = arith.constant dense<0.000000e+00> : vector<8x128xf32>
    %245 = tpu.matmul %238, %7, %cst_61 {dimension_numbers = #tpu.dot_dimension_numbers<[1], [0], [0], [1], [0, 0, 1, 1], [], []>} : vector<8x32xf32>, vector<32x128xf32>, vector<8x128xf32> -> vector<8x128xf32>
    %246 = arith.addf %244, %245 : vector<8x128xf32>
    %247 = vector.extract_strided_slice %246 {offsets = [0, 0], sizes = [8, 32], strides = [1, 1]} : vector<8x128xf32> to vector<8x32xf32>
    %248 = arith.negf %247 : vector<8x32xf32>
    %249 = math.exp %248 : vector<8x32xf32>
    %cst_62 = arith.constant 1.000000e+00 : f32
    %250 = vector.broadcast %cst_62 : f32 to vector<8x32xf32>
    %251 = arith.addf %250, %249 : vector<8x32xf32>
    %252 = arith.divf %250, %251 : vector<8x32xf32>
    %253 = vector.extract_strided_slice %246 {offsets = [0, 32], sizes = [8, 32], strides = [1, 1]} : vector<8x128xf32> to vector<8x32xf32>
    %254 = arith.negf %253 : vector<8x32xf32>
    %255 = math.exp %254 : vector<8x32xf32>
    %cst_63 = arith.constant 1.000000e+00 : f32
    %256 = vector.broadcast %cst_63 : f32 to vector<8x32xf32>
    %257 = arith.addf %256, %255 : vector<8x32xf32>
    %258 = arith.divf %256, %257 : vector<8x32xf32>
    %259 = vector.extract_strided_slice %246 {offsets = [0, 64], sizes = [8, 32], strides = [1, 1]} : vector<8x128xf32> to vector<8x32xf32>
    %260 = math.tanh %259 : vector<8x32xf32>
    %261 = vector.extract_strided_slice %246 {offsets = [0, 96], sizes = [8, 32], strides = [1, 1]} : vector<8x128xf32> to vector<8x32xf32>
    %262 = arith.negf %261 : vector<8x32xf32>
    %263 = math.exp %262 : vector<8x32xf32>
    %cst_64 = arith.constant 1.000000e+00 : f32
    %264 = vector.broadcast %cst_64 : f32 to vector<8x32xf32>
    %265 = arith.addf %264, %263 : vector<8x32xf32>
    %266 = arith.divf %264, %265 : vector<8x32xf32>
    %267 = arith.mulf %258, %236 : vector<8x32xf32>
    %268 = arith.mulf %252, %260 : vector<8x32xf32>
    %269 = arith.addf %267, %268 : vector<8x32xf32>
    %270 = math.tanh %269 : vector<8x32xf32>
    %271 = arith.mulf %266, %270 : vector<8x32xf32>
    %272 = arith.index_cast %242 : i32 to index
    %c0_65 = arith.constant 0 : index
    %273 = vector.load %arg18[%272, %c0_65] : memref<64x32xf32, #tpu.memory_space<vmem>>, vector<8x32xf32>
    tpu.vector_store %arg18[%272, %c0_65], %271 {strides = array<i32>} : memref<64x32xf32, #tpu.memory_space<vmem>>, vector<8x32xf32>,
    %c8_i32_66 = arith.constant 8 : i32
    %c0_67 = arith.constant 0 : index
    %c0_68 = arith.constant 0 : index
    %274 = vector.load %arg18[%c0_67, %c0_68] : memref<64x32xf32, #tpu.memory_space<vmem>>, vector<64x32xf32>
    %c0_69 = arith.constant 0 : index
    %c0_70 = arith.constant 0 : index
    %275 = vector.load %arg5[%c0_69, %c0_70] : memref<32x128xf32, #tpu.memory_space<vmem>>, vector<32x128xf32>
    %cst_71 = arith.constant dense<0.000000e+00> : vector<64x128xf32>
    %276 = tpu.matmul %274, %275, %cst_71 {dimension_numbers = #tpu.dot_dimension_numbers<[1], [0], [0], [1], [0, 0, 1, 1], [], []>} : vector<64x32xf32>, vector<32x128xf32>, vector<64x128xf32> -> vector<64x128xf32>
    %c0_72 = arith.constant 0 : index
    %c0_73 = arith.constant 0 : index
    %277 = vector.load %arg7[%c0_72, %c0_73] : memref<1x128xf32, #tpu.memory_space<vmem>>, vector<1x128xf32>
    %278 = vector.broadcast %277 : vector<1x128xf32> to vector<64x128xf32>
    %279 = arith.addf %276, %278 : vector<64x128xf32>
    %c0_74 = arith.constant 0 : index
    %c0_75 = arith.constant 0 : index
    %280 = vector.load %arg17[%c0_74, %c0_75] : memref<64x128xf32, #tpu.memory_space<vmem>>, vector<64x128xf32>
    tpu.vector_store %arg17[%c0_74, %c0_75], %279 {strides = array<i32>} : memref<64x128xf32, #tpu.memory_space<vmem>>, vector<64x128xf32>,
    %c0_76 = arith.constant 0 : index
    %c0_77 = arith.constant 0 : index
    %281 = vector.load %arg6[%c0_76, %c0_77] : memref<32x128xf32, #tpu.memory_space<vmem>>, vector<32x128xf32>
    %cst_78 = arith.constant 0.000000e+00 : f32
    %282 = vector.broadcast %cst_78 : f32 to vector<8x32xf32>
    %cst_79 = arith.constant 0.000000e+00 : f32
    %283 = vector.broadcast %cst_79 : f32 to vector<8x32xf32>
    %c0_i32_80 = arith.constant 0 : i32
    %c8_i32_81 = arith.constant 8 : i32
    %284 = arith.muli %c0_i32_80, %c8_i32_81 : i32
    %285 = tpu.assume_multiple %284, 8 : i32
    %286 = arith.index_cast %285 : i32 to index
    %c0_82 = arith.constant 0 : index
    %287 = vector.load %arg17[%286, %c0_82] : memref<64x128xf32, #tpu.memory_space<vmem>>, vector<8x128xf32>
    %cst_83 = arith.constant dense<0.000000e+00> : vector<8x128xf32>
    %288 = tpu.matmul %282, %281, %cst_83 {dimension_numbers = #tpu.dot_dimension_numbers<[1], [0], [0], [1], [0, 0, 1, 1], [], []>} : vector<8x32xf32>, vector<32x128xf32>, vector<8x128xf32> -> vector<8x128xf32>
    %289 = arith.addf %287, %288 : vector<8x128xf32>
    %290 = vector.extract_strided_slice %289 {offsets = [0, 0], sizes = [8, 32], strides = [1, 1]} : vector<8x128xf32> to vector<8x32xf32>
    %291 = arith.negf %290 : vector<8x32xf32>
    %292 = math.exp %291 : vector<8x32xf32>
    %cst_84 = arith.constant 1.000000e+00 : f32
    %293 = vector.broadcast %cst_84 : f32 to vector<8x32xf32>
    %294 = arith.addf %293, %292 : vector<8x32xf32>
    %295 = arith.divf %293, %294 : vector<8x32xf32>
    %296 = vector.extract_strided_slice %289 {offsets = [0, 32], sizes = [8, 32], strides = [1, 1]} : vector<8x128xf32> to vector<8x32xf32>
    %297 = arith.negf %296 : vector<8x32xf32>
    %298 = math.exp %297 : vector<8x32xf32>
    %cst_85 = arith.constant 1.000000e+00 : f32
    %299 = vector.broadcast %cst_85 : f32 to vector<8x32xf32>
    %300 = arith.addf %299, %298 : vector<8x32xf32>
    %301 = arith.divf %299, %300 : vector<8x32xf32>
    %302 = vector.extract_strided_slice %289 {offsets = [0, 64], sizes = [8, 32], strides = [1, 1]} : vector<8x128xf32> to vector<8x32xf32>
    %303 = math.tanh %302 : vector<8x32xf32>
    %304 = vector.extract_strided_slice %289 {offsets = [0, 96], sizes = [8, 32], strides = [1, 1]} : vector<8x128xf32> to vector<8x32xf32>
    %305 = arith.negf %304 : vector<8x32xf32>
    %306 = math.exp %305 : vector<8x32xf32>
    %cst_86 = arith.constant 1.000000e+00 : f32
    %307 = vector.broadcast %cst_86 : f32 to vector<8x32xf32>
    %308 = arith.addf %307, %306 : vector<8x32xf32>
    %309 = arith.divf %307, %308 : vector<8x32xf32>
    %310 = arith.mulf %301, %283 : vector<8x32xf32>
    %311 = arith.mulf %295, %303 : vector<8x32xf32>
    %312 = arith.addf %310, %311 : vector<8x32xf32>
    %313 = math.tanh %312 : vector<8x32xf32>
    %314 = arith.mulf %309, %313 : vector<8x32xf32>
    %315 = arith.index_cast %285 : i32 to index
    %c0_87 = arith.constant 0 : index
    %316 = vector.load %arg18[%315, %c0_87] : memref<64x32xf32, #tpu.memory_space<vmem>>, vector<8x32xf32>
    tpu.vector_store %arg18[%315, %c0_87], %314 {strides = array<i32>} : memref<64x32xf32, #tpu.memory_space<vmem>>, vector<8x32xf32>,
    %c1_i32_88 = arith.constant 1 : i32
    %c8_i32_89 = arith.constant 8 : i32
    %317 = arith.muli %c1_i32_88, %c8_i32_89 : i32
    %318 = tpu.assume_multiple %317, 8 : i32
    %319 = arith.index_cast %318 : i32 to index
    %c0_90 = arith.constant 0 : index
    %320 = vector.load %arg17[%319, %c0_90] : memref<64x128xf32, #tpu.memory_space<vmem>>, vector<8x128xf32>
    %cst_91 = arith.constant dense<0.000000e+00> : vector<8x128xf32>
    %321 = tpu.matmul %314, %281, %cst_91 {dimension_numbers = #tpu.dot_dimension_numbers<[1], [0], [0], [1], [0, 0, 1, 1], [], []>} : vector<8x32xf32>, vector<32x128xf32>, vector<8x128xf32> -> vector<8x128xf32>
    %322 = arith.addf %320, %321 : vector<8x128xf32>
    %323 = vector.extract_strided_slice %322 {offsets = [0, 0], sizes = [8, 32], strides = [1, 1]} : vector<8x128xf32> to vector<8x32xf32>
    %324 = arith.negf %323 : vector<8x32xf32>
    %325 = math.exp %324 : vector<8x32xf32>
    %cst_92 = arith.constant 1.000000e+00 : f32
    %326 = vector.broadcast %cst_92 : f32 to vector<8x32xf32>
    %327 = arith.addf %326, %325 : vector<8x32xf32>
    %328 = arith.divf %326, %327 : vector<8x32xf32>
    %329 = vector.extract_strided_slice %322 {offsets = [0, 32], sizes = [8, 32], strides = [1, 1]} : vector<8x128xf32> to vector<8x32xf32>
    %330 = arith.negf %329 : vector<8x32xf32>
    %331 = math.exp %330 : vector<8x32xf32>
    %cst_93 = arith.constant 1.000000e+00 : f32
    %332 = vector.broadcast %cst_93 : f32 to vector<8x32xf32>
    %333 = arith.addf %332, %331 : vector<8x32xf32>
    %334 = arith.divf %332, %333 : vector<8x32xf32>
    %335 = vector.extract_strided_slice %322 {offsets = [0, 64], sizes = [8, 32], strides = [1, 1]} : vector<8x128xf32> to vector<8x32xf32>
    %336 = math.tanh %335 : vector<8x32xf32>
    %337 = vector.extract_strided_slice %322 {offsets = [0, 96], sizes = [8, 32], strides = [1, 1]} : vector<8x128xf32> to vector<8x32xf32>
    %338 = arith.negf %337 : vector<8x32xf32>
    %339 = math.exp %338 : vector<8x32xf32>
    %cst_94 = arith.constant 1.000000e+00 : f32
    %340 = vector.broadcast %cst_94 : f32 to vector<8x32xf32>
    %341 = arith.addf %340, %339 : vector<8x32xf32>
    %342 = arith.divf %340, %341 : vector<8x32xf32>
    %343 = arith.mulf %334, %312 : vector<8x32xf32>
    %344 = arith.mulf %328, %336 : vector<8x32xf32>
    %345 = arith.addf %343, %344 : vector<8x32xf32>
    %346 = math.tanh %345 : vector<8x32xf32>
    %347 = arith.mulf %342, %346 : vector<8x32xf32>
    %348 = arith.index_cast %318 : i32 to index
    %c0_95 = arith.constant 0 : index
    %349 = vector.load %arg18[%348, %c0_95] : memref<64x32xf32, #tpu.memory_space<vmem>>, vector<8x32xf32>
    tpu.vector_store %arg18[%348, %c0_95], %347 {strides = array<i32>} : memref<64x32xf32, #tpu.memory_space<vmem>>, vector<8x32xf32>,
    %c2_i32_96 = arith.constant 2 : i32
    %c8_i32_97 = arith.constant 8 : i32
    %350 = arith.muli %c2_i32_96, %c8_i32_97 : i32
    %351 = tpu.assume_multiple %350, 8 : i32
    %352 = arith.index_cast %351 : i32 to index
    %c0_98 = arith.constant 0 : index
    %353 = vector.load %arg17[%352, %c0_98] : memref<64x128xf32, #tpu.memory_space<vmem>>, vector<8x128xf32>
    %cst_99 = arith.constant dense<0.000000e+00> : vector<8x128xf32>
    %354 = tpu.matmul %347, %281, %cst_99 {dimension_numbers = #tpu.dot_dimension_numbers<[1], [0], [0], [1], [0, 0, 1, 1], [], []>} : vector<8x32xf32>, vector<32x128xf32>, vector<8x128xf32> -> vector<8x128xf32>
    %355 = arith.addf %353, %354 : vector<8x128xf32>
    %356 = vector.extract_strided_slice %355 {offsets = [0, 0], sizes = [8, 32], strides = [1, 1]} : vector<8x128xf32> to vector<8x32xf32>
    %357 = arith.negf %356 : vector<8x32xf32>
    %358 = math.exp %357 : vector<8x32xf32>
    %cst_100 = arith.constant 1.000000e+00 : f32
    %359 = vector.broadcast %cst_100 : f32 to vector<8x32xf32>
    %360 = arith.addf %359, %358 : vector<8x32xf32>
    %361 = arith.divf %359, %360 : vector<8x32xf32>
    %362 = vector.extract_strided_slice %355 {offsets = [0, 32], sizes = [8, 32], strides = [1, 1]} : vector<8x128xf32> to vector<8x32xf32>
    %363 = arith.negf %362 : vector<8x32xf32>
    %364 = math.exp %363 : vector<8x32xf32>
    %cst_101 = arith.constant 1.000000e+00 : f32
    %365 = vector.broadcast %cst_101 : f32 to vector<8x32xf32>
    %366 = arith.addf %365, %364 : vector<8x32xf32>
    %367 = arith.divf %365, %366 : vector<8x32xf32>
    %368 = vector.extract_strided_slice %355 {offsets = [0, 64], sizes = [8, 32], strides = [1, 1]} : vector<8x128xf32> to vector<8x32xf32>
    %369 = math.tanh %368 : vector<8x32xf32>
    %370 = vector.extract_strided_slice %355 {offsets = [0, 96], sizes = [8, 32], strides = [1, 1]} : vector<8x128xf32> to vector<8x32xf32>
    %371 = arith.negf %370 : vector<8x32xf32>
    %372 = math.exp %371 : vector<8x32xf32>
    %cst_102 = arith.constant 1.000000e+00 : f32
    %373 = vector.broadcast %cst_102 : f32 to vector<8x32xf32>
    %374 = arith.addf %373, %372 : vector<8x32xf32>
    %375 = arith.divf %373, %374 : vector<8x32xf32>
    %376 = arith.mulf %367, %345 : vector<8x32xf32>
    %377 = arith.mulf %361, %369 : vector<8x32xf32>
    %378 = arith.addf %376, %377 : vector<8x32xf32>
    %379 = math.tanh %378 : vector<8x32xf32>
    %380 = arith.mulf %375, %379 : vector<8x32xf32>
    %381 = arith.index_cast %351 : i32 to index
    %c0_103 = arith.constant 0 : index
    %382 = vector.load %arg18[%381, %c0_103] : memref<64x32xf32, #tpu.memory_space<vmem>>, vector<8x32xf32>
    tpu.vector_store %arg18[%381, %c0_103], %380 {strides = array<i32>} : memref<64x32xf32, #tpu.memory_space<vmem>>, vector<8x32xf32>,
    %c3_i32_104 = arith.constant 3 : i32
    %c8_i32_105 = arith.constant 8 : i32
    %383 = arith.muli %c3_i32_104, %c8_i32_105 : i32
    %384 = tpu.assume_multiple %383, 8 : i32
    %385 = arith.index_cast %384 : i32 to index
    %c0_106 = arith.constant 0 : index
    %386 = vector.load %arg17[%385, %c0_106] : memref<64x128xf32, #tpu.memory_space<vmem>>, vector<8x128xf32>
    %cst_107 = arith.constant dense<0.000000e+00> : vector<8x128xf32>
    %387 = tpu.matmul %380, %281, %cst_107 {dimension_numbers = #tpu.dot_dimension_numbers<[1], [0], [0], [1], [0, 0, 1, 1], [], []>} : vector<8x32xf32>, vector<32x128xf32>, vector<8x128xf32> -> vector<8x128xf32>
    %388 = arith.addf %386, %387 : vector<8x128xf32>
    %389 = vector.extract_strided_slice %388 {offsets = [0, 0], sizes = [8, 32], strides = [1, 1]} : vector<8x128xf32> to vector<8x32xf32>
    %390 = arith.negf %389 : vector<8x32xf32>
    %391 = math.exp %390 : vector<8x32xf32>
    %cst_108 = arith.constant 1.000000e+00 : f32
    %392 = vector.broadcast %cst_108 : f32 to vector<8x32xf32>
    %393 = arith.addf %392, %391 : vector<8x32xf32>
    %394 = arith.divf %392, %393 : vector<8x32xf32>
    %395 = vector.extract_strided_slice %388 {offsets = [0, 32], sizes = [8, 32], strides = [1, 1]} : vector<8x128xf32> to vector<8x32xf32>
    %396 = arith.negf %395 : vector<8x32xf32>
    %397 = math.exp %396 : vector<8x32xf32>
    %cst_109 = arith.constant 1.000000e+00 : f32
    %398 = vector.broadcast %cst_109 : f32 to vector<8x32xf32>
    %399 = arith.addf %398, %397 : vector<8x32xf32>
    %400 = arith.divf %398, %399 : vector<8x32xf32>
    %401 = vector.extract_strided_slice %388 {offsets = [0, 64], sizes = [8, 32], strides = [1, 1]} : vector<8x128xf32> to vector<8x32xf32>
    %402 = math.tanh %401 : vector<8x32xf32>
    %403 = vector.extract_strided_slice %388 {offsets = [0, 96], sizes = [8, 32], strides = [1, 1]} : vector<8x128xf32> to vector<8x32xf32>
    %404 = arith.negf %403 : vector<8x32xf32>
    %405 = math.exp %404 : vector<8x32xf32>
    %cst_110 = arith.constant 1.000000e+00 : f32
    %406 = vector.broadcast %cst_110 : f32 to vector<8x32xf32>
    %407 = arith.addf %406, %405 : vector<8x32xf32>
    %408 = arith.divf %406, %407 : vector<8x32xf32>
    %409 = arith.mulf %400, %378 : vector<8x32xf32>
    %410 = arith.mulf %394, %402 : vector<8x32xf32>
    %411 = arith.addf %409, %410 : vector<8x32xf32>
    %412 = math.tanh %411 : vector<8x32xf32>
    %413 = arith.mulf %408, %412 : vector<8x32xf32>
    %414 = arith.index_cast %384 : i32 to index
    %c0_111 = arith.constant 0 : index
    %415 = vector.load %arg18[%414, %c0_111] : memref<64x32xf32, #tpu.memory_space<vmem>>, vector<8x32xf32>
    tpu.vector_store %arg18[%414, %c0_111], %413 {strides = array<i32>} : memref<64x32xf32, #tpu.memory_space<vmem>>, vector<8x32xf32>,
    %c4_i32_112 = arith.constant 4 : i32
    %c8_i32_113 = arith.constant 8 : i32
    %416 = arith.muli %c4_i32_112, %c8_i32_113 : i32
    %417 = tpu.assume_multiple %416, 8 : i32
    %418 = arith.index_cast %417 : i32 to index
    %c0_114 = arith.constant 0 : index
    %419 = vector.load %arg17[%418, %c0_114] : memref<64x128xf32, #tpu.memory_space<vmem>>, vector<8x128xf32>
    %cst_115 = arith.constant dense<0.000000e+00> : vector<8x128xf32>
    %420 = tpu.matmul %413, %281, %cst_115 {dimension_numbers = #tpu.dot_dimension_numbers<[1], [0], [0], [1], [0, 0, 1, 1], [], []>} : vector<8x32xf32>, vector<32x128xf32>, vector<8x128xf32> -> vector<8x128xf32>
    %421 = arith.addf %419, %420 : vector<8x128xf32>
    %422 = vector.extract_strided_slice %421 {offsets = [0, 0], sizes = [8, 32], strides = [1, 1]} : vector<8x128xf32> to vector<8x32xf32>
    %423 = arith.negf %422 : vector<8x32xf32>
    %424 = math.exp %423 : vector<8x32xf32>
    %cst_116 = arith.constant 1.000000e+00 : f32
    %425 = vector.broadcast %cst_116 : f32 to vector<8x32xf32>
    %426 = arith.addf %425, %424 : vector<8x32xf32>
    %427 = arith.divf %425, %426 : vector<8x32xf32>
    %428 = vector.extract_strided_slice %421 {offsets = [0, 32], sizes = [8, 32], strides = [1, 1]} : vector<8x128xf32> to vector<8x32xf32>
    %429 = arith.negf %428 : vector<8x32xf32>
    %430 = math.exp %429 : vector<8x32xf32>
    %cst_117 = arith.constant 1.000000e+00 : f32
    %431 = vector.broadcast %cst_117 : f32 to vector<8x32xf32>
    %432 = arith.addf %431, %430 : vector<8x32xf32>
    %433 = arith.divf %431, %432 : vector<8x32xf32>
    %434 = vector.extract_strided_slice %421 {offsets = [0, 64], sizes = [8, 32], strides = [1, 1]} : vector<8x128xf32> to vector<8x32xf32>
    %435 = math.tanh %434 : vector<8x32xf32>
    %436 = vector.extract_strided_slice %421 {offsets = [0, 96], sizes = [8, 32], strides = [1, 1]} : vector<8x128xf32> to vector<8x32xf32>
    %437 = arith.negf %436 : vector<8x32xf32>
    %438 = math.exp %437 : vector<8x32xf32>
    %cst_118 = arith.constant 1.000000e+00 : f32
    %439 = vector.broadcast %cst_118 : f32 to vector<8x32xf32>
    %440 = arith.addf %439, %438 : vector<8x32xf32>
    %441 = arith.divf %439, %440 : vector<8x32xf32>
    %442 = arith.mulf %433, %411 : vector<8x32xf32>
    %443 = arith.mulf %427, %435 : vector<8x32xf32>
    %444 = arith.addf %442, %443 : vector<8x32xf32>
    %445 = math.tanh %444 : vector<8x32xf32>
    %446 = arith.mulf %441, %445 : vector<8x32xf32>
    %447 = arith.index_cast %417 : i32 to index
    %c0_119 = arith.constant 0 : index
    %448 = vector.load %arg18[%447, %c0_119] : memref<64x32xf32, #tpu.memory_space<vmem>>, vector<8x32xf32>
    tpu.vector_store %arg18[%447, %c0_119], %446 {strides = array<i32>} : memref<64x32xf32, #tpu.memory_space<vmem>>, vector<8x32xf32>,
    %c5_i32_120 = arith.constant 5 : i32
    %c8_i32_121 = arith.constant 8 : i32
    %449 = arith.muli %c5_i32_120, %c8_i32_121 : i32
    %450 = tpu.assume_multiple %449, 8 : i32
    %451 = arith.index_cast %450 : i32 to index
    %c0_122 = arith.constant 0 : index
    %452 = vector.load %arg17[%451, %c0_122] : memref<64x128xf32, #tpu.memory_space<vmem>>, vector<8x128xf32>
    %cst_123 = arith.constant dense<0.000000e+00> : vector<8x128xf32>
    %453 = tpu.matmul %446, %281, %cst_123 {dimension_numbers = #tpu.dot_dimension_numbers<[1], [0], [0], [1], [0, 0, 1, 1], [], []>} : vector<8x32xf32>, vector<32x128xf32>, vector<8x128xf32> -> vector<8x128xf32>
    %454 = arith.addf %452, %453 : vector<8x128xf32>
    %455 = vector.extract_strided_slice %454 {offsets = [0, 0], sizes = [8, 32], strides = [1, 1]} : vector<8x128xf32> to vector<8x32xf32>
    %456 = arith.negf %455 : vector<8x32xf32>
    %457 = math.exp %456 : vector<8x32xf32>
    %cst_124 = arith.constant 1.000000e+00 : f32
    %458 = vector.broadcast %cst_124 : f32 to vector<8x32xf32>
    %459 = arith.addf %458, %457 : vector<8x32xf32>
    %460 = arith.divf %458, %459 : vector<8x32xf32>
    %461 = vector.extract_strided_slice %454 {offsets = [0, 32], sizes = [8, 32], strides = [1, 1]} : vector<8x128xf32> to vector<8x32xf32>
    %462 = arith.negf %461 : vector<8x32xf32>
    %463 = math.exp %462 : vector<8x32xf32>
    %cst_125 = arith.constant 1.000000e+00 : f32
    %464 = vector.broadcast %cst_125 : f32 to vector<8x32xf32>
    %465 = arith.addf %464, %463 : vector<8x32xf32>
    %466 = arith.divf %464, %465 : vector<8x32xf32>
    %467 = vector.extract_strided_slice %454 {offsets = [0, 64], sizes = [8, 32], strides = [1, 1]} : vector<8x128xf32> to vector<8x32xf32>
    %468 = math.tanh %467 : vector<8x32xf32>
    %469 = vector.extract_strided_slice %454 {offsets = [0, 96], sizes = [8, 32], strides = [1, 1]} : vector<8x128xf32> to vector<8x32xf32>
    %470 = arith.negf %469 : vector<8x32xf32>
    %471 = math.exp %470 : vector<8x32xf32>
    %cst_126 = arith.constant 1.000000e+00 : f32
    %472 = vector.broadcast %cst_126 : f32 to vector<8x32xf32>
    %473 = arith.addf %472, %471 : vector<8x32xf32>
    %474 = arith.divf %472, %473 : vector<8x32xf32>
    %475 = arith.mulf %466, %444 : vector<8x32xf32>
    %476 = arith.mulf %460, %468 : vector<8x32xf32>
    %477 = arith.addf %475, %476 : vector<8x32xf32>
    %478 = math.tanh %477 : vector<8x32xf32>
    %479 = arith.mulf %474, %478 : vector<8x32xf32>
    %480 = arith.index_cast %450 : i32 to index
    %c0_127 = arith.constant 0 : index
    %481 = vector.load %arg18[%480, %c0_127] : memref<64x32xf32, #tpu.memory_space<vmem>>, vector<8x32xf32>
    tpu.vector_store %arg18[%480, %c0_127], %479 {strides = array<i32>} : memref<64x32xf32, #tpu.memory_space<vmem>>, vector<8x32xf32>,
    %c6_i32_128 = arith.constant 6 : i32
    %c8_i32_129 = arith.constant 8 : i32
    %482 = arith.muli %c6_i32_128, %c8_i32_129 : i32
    %483 = tpu.assume_multiple %482, 8 : i32
    %484 = arith.index_cast %483 : i32 to index
    %c0_130 = arith.constant 0 : index
    %485 = vector.load %arg17[%484, %c0_130] : memref<64x128xf32, #tpu.memory_space<vmem>>, vector<8x128xf32>
    %cst_131 = arith.constant dense<0.000000e+00> : vector<8x128xf32>
    %486 = tpu.matmul %479, %281, %cst_131 {dimension_numbers = #tpu.dot_dimension_numbers<[1], [0], [0], [1], [0, 0, 1, 1], [], []>} : vector<8x32xf32>, vector<32x128xf32>, vector<8x128xf32> -> vector<8x128xf32>
    %487 = arith.addf %485, %486 : vector<8x128xf32>
    %488 = vector.extract_strided_slice %487 {offsets = [0, 0], sizes = [8, 32], strides = [1, 1]} : vector<8x128xf32> to vector<8x32xf32>
    %489 = arith.negf %488 : vector<8x32xf32>
    %490 = math.exp %489 : vector<8x32xf32>
    %cst_132 = arith.constant 1.000000e+00 : f32
    %491 = vector.broadcast %cst_132 : f32 to vector<8x32xf32>
    %492 = arith.addf %491, %490 : vector<8x32xf32>
    %493 = arith.divf %491, %492 : vector<8x32xf32>
    %494 = vector.extract_strided_slice %487 {offsets = [0, 32], sizes = [8, 32], strides = [1, 1]} : vector<8x128xf32> to vector<8x32xf32>
    %495 = arith.negf %494 : vector<8x32xf32>
    %496 = math.exp %495 : vector<8x32xf32>
    %cst_133 = arith.constant 1.000000e+00 : f32
    %497 = vector.broadcast %cst_133 : f32 to vector<8x32xf32>
    %498 = arith.addf %497, %496 : vector<8x32xf32>
    %499 = arith.divf %497, %498 : vector<8x32xf32>
    %500 = vector.extract_strided_slice %487 {offsets = [0, 64], sizes = [8, 32], strides = [1, 1]} : vector<8x128xf32> to vector<8x32xf32>
    %501 = math.tanh %500 : vector<8x32xf32>
    %502 = vector.extract_strided_slice %487 {offsets = [0, 96], sizes = [8, 32], strides = [1, 1]} : vector<8x128xf32> to vector<8x32xf32>
    %503 = arith.negf %502 : vector<8x32xf32>
    %504 = math.exp %503 : vector<8x32xf32>
    %cst_134 = arith.constant 1.000000e+00 : f32
    %505 = vector.broadcast %cst_134 : f32 to vector<8x32xf32>
    %506 = arith.addf %505, %504 : vector<8x32xf32>
    %507 = arith.divf %505, %506 : vector<8x32xf32>
    %508 = arith.mulf %499, %477 : vector<8x32xf32>
    %509 = arith.mulf %493, %501 : vector<8x32xf32>
    %510 = arith.addf %508, %509 : vector<8x32xf32>
    %511 = math.tanh %510 : vector<8x32xf32>
    %512 = arith.mulf %507, %511 : vector<8x32xf32>
    %513 = arith.index_cast %483 : i32 to index
    %c0_135 = arith.constant 0 : index
    %514 = vector.load %arg18[%513, %c0_135] : memref<64x32xf32, #tpu.memory_space<vmem>>, vector<8x32xf32>
    tpu.vector_store %arg18[%513, %c0_135], %512 {strides = array<i32>} : memref<64x32xf32, #tpu.memory_space<vmem>>, vector<8x32xf32>,
    %c7_i32_136 = arith.constant 7 : i32
    %c8_i32_137 = arith.constant 8 : i32
    %515 = arith.muli %c7_i32_136, %c8_i32_137 : i32
    %516 = tpu.assume_multiple %515, 8 : i32
    %517 = arith.index_cast %516 : i32 to index
    %c0_138 = arith.constant 0 : index
    %518 = vector.load %arg17[%517, %c0_138] : memref<64x128xf32, #tpu.memory_space<vmem>>, vector<8x128xf32>
    %cst_139 = arith.constant dense<0.000000e+00> : vector<8x128xf32>
    %519 = tpu.matmul %512, %281, %cst_139 {dimension_numbers = #tpu.dot_dimension_numbers<[1], [0], [0], [1], [0, 0, 1, 1], [], []>} : vector<8x32xf32>, vector<32x128xf32>, vector<8x128xf32> -> vector<8x128xf32>
    %520 = arith.addf %518, %519 : vector<8x128xf32>
    %521 = vector.extract_strided_slice %520 {offsets = [0, 0], sizes = [8, 32], strides = [1, 1]} : vector<8x128xf32> to vector<8x32xf32>
    %522 = arith.negf %521 : vector<8x32xf32>
    %523 = math.exp %522 : vector<8x32xf32>
    %cst_140 = arith.constant 1.000000e+00 : f32
    %524 = vector.broadcast %cst_140 : f32 to vector<8x32xf32>
    %525 = arith.addf %524, %523 : vector<8x32xf32>
    %526 = arith.divf %524, %525 : vector<8x32xf32>
    %527 = vector.extract_strided_slice %520 {offsets = [0, 32], sizes = [8, 32], strides = [1, 1]} : vector<8x128xf32> to vector<8x32xf32>
    %528 = arith.negf %527 : vector<8x32xf32>
    %529 = math.exp %528 : vector<8x32xf32>
    %cst_141 = arith.constant 1.000000e+00 : f32
    %530 = vector.broadcast %cst_141 : f32 to vector<8x32xf32>
    %531 = arith.addf %530, %529 : vector<8x32xf32>
    %532 = arith.divf %530, %531 : vector<8x32xf32>
    %533 = vector.extract_strided_slice %520 {offsets = [0, 64], sizes = [8, 32], strides = [1, 1]} : vector<8x128xf32> to vector<8x32xf32>
    %534 = math.tanh %533 : vector<8x32xf32>
    %535 = vector.extract_strided_slice %520 {offsets = [0, 96], sizes = [8, 32], strides = [1, 1]} : vector<8x128xf32> to vector<8x32xf32>
    %536 = arith.negf %535 : vector<8x32xf32>
    %537 = math.exp %536 : vector<8x32xf32>
    %cst_142 = arith.constant 1.000000e+00 : f32
    %538 = vector.broadcast %cst_142 : f32 to vector<8x32xf32>
    %539 = arith.addf %538, %537 : vector<8x32xf32>
    %540 = arith.divf %538, %539 : vector<8x32xf32>
    %541 = arith.mulf %532, %510 : vector<8x32xf32>
    %542 = arith.mulf %526, %534 : vector<8x32xf32>
    %543 = arith.addf %541, %542 : vector<8x32xf32>
    %544 = math.tanh %543 : vector<8x32xf32>
    %545 = arith.mulf %540, %544 : vector<8x32xf32>
    %546 = arith.index_cast %516 : i32 to index
    %c0_143 = arith.constant 0 : index
    %547 = vector.load %arg18[%546, %c0_143] : memref<64x32xf32, #tpu.memory_space<vmem>>, vector<8x32xf32>
    tpu.vector_store %arg18[%546, %c0_143], %545 {strides = array<i32>} : memref<64x32xf32, #tpu.memory_space<vmem>>, vector<8x32xf32>,
    %c8_i32_144 = arith.constant 8 : i32
    %c0_145 = arith.constant 0 : index
    %c0_146 = arith.constant 0 : index
    %548 = vector.load %arg1[%c0_145, %c0_146] : memref<64x4xf32, #tpu.memory_space<vmem>>, vector<64x4xf32>
    %c0_147 = arith.constant 0 : index
    %c0_148 = arith.constant 0 : index
    %549 = vector.load %arg8[%c0_147, %c0_148] : memref<4x128xf32, #tpu.memory_space<vmem>>, vector<4x128xf32>
    %cst_149 = arith.constant dense<0.000000e+00> : vector<64x128xf32>
    %550 = tpu.matmul %548, %549, %cst_149 {dimension_numbers = #tpu.dot_dimension_numbers<[1], [0], [0], [1], [0, 0, 1, 1], [], []>} : vector<64x4xf32>, vector<4x128xf32>, vector<64x128xf32> -> vector<64x128xf32>
    %c0_150 = arith.constant 0 : index
    %c0_151 = arith.constant 0 : index
    %551 = vector.load %arg10[%c0_150, %c0_151] : memref<1x128xf32, #tpu.memory_space<vmem>>, vector<1x128xf32>
    %552 = vector.broadcast %551 : vector<1x128xf32> to vector<64x128xf32>
    %553 = arith.addf %550, %552 : vector<64x128xf32>
    %c0_152 = arith.constant 0 : index
    %c0_153 = arith.constant 0 : index
    %554 = vector.load %arg17[%c0_152, %c0_153] : memref<64x128xf32, #tpu.memory_space<vmem>>, vector<64x128xf32>
    tpu.vector_store %arg17[%c0_152, %c0_153], %553 {strides = array<i32>} : memref<64x128xf32, #tpu.memory_space<vmem>>, vector<64x128xf32>,
    %c0_154 = arith.constant 0 : index
    %c0_155 = arith.constant 0 : index
    %555 = vector.load %arg9[%c0_154, %c0_155] : memref<32x128xf32, #tpu.memory_space<vmem>>, vector<32x128xf32>
    %cst_156 = arith.constant 0.000000e+00 : f32
    %556 = vector.broadcast %cst_156 : f32 to vector<8x32xf32>
    %cst_157 = arith.constant 0.000000e+00 : f32
    %557 = vector.broadcast %cst_157 : f32 to vector<8x32xf32>
    %c0_i32_158 = arith.constant 0 : i32
    %c8_i32_159 = arith.constant 8 : i32
    %558 = arith.muli %c0_i32_158, %c8_i32_159 : i32
    %559 = tpu.assume_multiple %558, 8 : i32
    %560 = arith.index_cast %559 : i32 to index
    %c0_160 = arith.constant 0 : index
    %561 = vector.load %arg17[%560, %c0_160] : memref<64x128xf32, #tpu.memory_space<vmem>>, vector<8x128xf32>
    %cst_161 = arith.constant dense<0.000000e+00> : vector<8x128xf32>
    %562 = tpu.matmul %556, %555, %cst_161 {dimension_numbers = #tpu.dot_dimension_numbers<[1], [0], [0], [1], [0, 0, 1, 1], [], []>} : vector<8x32xf32>, vector<32x128xf32>, vector<8x128xf32> -> vector<8x128xf32>
    %563 = arith.addf %561, %562 : vector<8x128xf32>
    %564 = vector.extract_strided_slice %563 {offsets = [0, 0], sizes = [8, 32], strides = [1, 1]} : vector<8x128xf32> to vector<8x32xf32>
    %565 = arith.negf %564 : vector<8x32xf32>
    %566 = math.exp %565 : vector<8x32xf32>
    %cst_162 = arith.constant 1.000000e+00 : f32
    %567 = vector.broadcast %cst_162 : f32 to vector<8x32xf32>
    %568 = arith.addf %567, %566 : vector<8x32xf32>
    %569 = arith.divf %567, %568 : vector<8x32xf32>
    %570 = vector.extract_strided_slice %563 {offsets = [0, 32], sizes = [8, 32], strides = [1, 1]} : vector<8x128xf32> to vector<8x32xf32>
    %571 = arith.negf %570 : vector<8x32xf32>
    %572 = math.exp %571 : vector<8x32xf32>
    %cst_163 = arith.constant 1.000000e+00 : f32
    %573 = vector.broadcast %cst_163 : f32 to vector<8x32xf32>
    %574 = arith.addf %573, %572 : vector<8x32xf32>
    %575 = arith.divf %573, %574 : vector<8x32xf32>
    %576 = vector.extract_strided_slice %563 {offsets = [0, 64], sizes = [8, 32], strides = [1, 1]} : vector<8x128xf32> to vector<8x32xf32>
    %577 = math.tanh %576 : vector<8x32xf32>
    %578 = vector.extract_strided_slice %563 {offsets = [0, 96], sizes = [8, 32], strides = [1, 1]} : vector<8x128xf32> to vector<8x32xf32>
    %579 = arith.negf %578 : vector<8x32xf32>
    %580 = math.exp %579 : vector<8x32xf32>
    %cst_164 = arith.constant 1.000000e+00 : f32
    %581 = vector.broadcast %cst_164 : f32 to vector<8x32xf32>
    %582 = arith.addf %581, %580 : vector<8x32xf32>
    %583 = arith.divf %581, %582 : vector<8x32xf32>
    %584 = arith.mulf %575, %557 : vector<8x32xf32>
    %585 = arith.mulf %569, %577 : vector<8x32xf32>
    %586 = arith.addf %584, %585 : vector<8x32xf32>
    %587 = math.tanh %586 : vector<8x32xf32>
    %588 = arith.mulf %583, %587 : vector<8x32xf32>
    %589 = arith.index_cast %559 : i32 to index
    %c0_165 = arith.constant 0 : index
    %590 = vector.load %arg18[%589, %c0_165] : memref<64x32xf32, #tpu.memory_space<vmem>>, vector<8x32xf32>
    tpu.vector_store %arg18[%589, %c0_165], %588 {strides = array<i32>} : memref<64x32xf32, #tpu.memory_space<vmem>>, vector<8x32xf32>,
    %c1_i32_166 = arith.constant 1 : i32
    %c8_i32_167 = arith.constant 8 : i32
    %591 = arith.muli %c1_i32_166, %c8_i32_167 : i32
    %592 = tpu.assume_multiple %591, 8 : i32
    %593 = arith.index_cast %592 : i32 to index
    %c0_168 = arith.constant 0 : index
    %594 = vector.load %arg17[%593, %c0_168] : memref<64x128xf32, #tpu.memory_space<vmem>>, vector<8x128xf32>
    %cst_169 = arith.constant dense<0.000000e+00> : vector<8x128xf32>
    %595 = tpu.matmul %588, %555, %cst_169 {dimension_numbers = #tpu.dot_dimension_numbers<[1], [0], [0], [1], [0, 0, 1, 1], [], []>} : vector<8x32xf32>, vector<32x128xf32>, vector<8x128xf32> -> vector<8x128xf32>
    %596 = arith.addf %594, %595 : vector<8x128xf32>
    %597 = vector.extract_strided_slice %596 {offsets = [0, 0], sizes = [8, 32], strides = [1, 1]} : vector<8x128xf32> to vector<8x32xf32>
    %598 = arith.negf %597 : vector<8x32xf32>
    %599 = math.exp %598 : vector<8x32xf32>
    %cst_170 = arith.constant 1.000000e+00 : f32
    %600 = vector.broadcast %cst_170 : f32 to vector<8x32xf32>
    %601 = arith.addf %600, %599 : vector<8x32xf32>
    %602 = arith.divf %600, %601 : vector<8x32xf32>
    %603 = vector.extract_strided_slice %596 {offsets = [0, 32], sizes = [8, 32], strides = [1, 1]} : vector<8x128xf32> to vector<8x32xf32>
    %604 = arith.negf %603 : vector<8x32xf32>
    %605 = math.exp %604 : vector<8x32xf32>
    %cst_171 = arith.constant 1.000000e+00 : f32
    %606 = vector.broadcast %cst_171 : f32 to vector<8x32xf32>
    %607 = arith.addf %606, %605 : vector<8x32xf32>
    %608 = arith.divf %606, %607 : vector<8x32xf32>
    %609 = vector.extract_strided_slice %596 {offsets = [0, 64], sizes = [8, 32], strides = [1, 1]} : vector<8x128xf32> to vector<8x32xf32>
    %610 = math.tanh %609 : vector<8x32xf32>
    %611 = vector.extract_strided_slice %596 {offsets = [0, 96], sizes = [8, 32], strides = [1, 1]} : vector<8x128xf32> to vector<8x32xf32>
    %612 = arith.negf %611 : vector<8x32xf32>
    %613 = math.exp %612 : vector<8x32xf32>
    %cst_172 = arith.constant 1.000000e+00 : f32
    %614 = vector.broadcast %cst_172 : f32 to vector<8x32xf32>
    %615 = arith.addf %614, %613 : vector<8x32xf32>
    %616 = arith.divf %614, %615 : vector<8x32xf32>
    %617 = arith.mulf %608, %586 : vector<8x32xf32>
    %618 = arith.mulf %602, %610 : vector<8x32xf32>
    %619 = arith.addf %617, %618 : vector<8x32xf32>
    %620 = math.tanh %619 : vector<8x32xf32>
    %621 = arith.mulf %616, %620 : vector<8x32xf32>
    %622 = arith.index_cast %592 : i32 to index
    %c0_173 = arith.constant 0 : index
    %623 = vector.load %arg18[%622, %c0_173] : memref<64x32xf32, #tpu.memory_space<vmem>>, vector<8x32xf32>
    tpu.vector_store %arg18[%622, %c0_173], %621 {strides = array<i32>} : memref<64x32xf32, #tpu.memory_space<vmem>>, vector<8x32xf32>,
    %c2_i32_174 = arith.constant 2 : i32
    %c8_i32_175 = arith.constant 8 : i32
    %624 = arith.muli %c2_i32_174, %c8_i32_175 : i32
    %625 = tpu.assume_multiple %624, 8 : i32
    %626 = arith.index_cast %625 : i32 to index
    %c0_176 = arith.constant 0 : index
    %627 = vector.load %arg17[%626, %c0_176] : memref<64x128xf32, #tpu.memory_space<vmem>>, vector<8x128xf32>
    %cst_177 = arith.constant dense<0.000000e+00> : vector<8x128xf32>
    %628 = tpu.matmul %621, %555, %cst_177 {dimension_numbers = #tpu.dot_dimension_numbers<[1], [0], [0], [1], [0, 0, 1, 1], [], []>} : vector<8x32xf32>, vector<32x128xf32>, vector<8x128xf32> -> vector<8x128xf32>
    %629 = arith.addf %627, %628 : vector<8x128xf32>
    %630 = vector.extract_strided_slice %629 {offsets = [0, 0], sizes = [8, 32], strides = [1, 1]} : vector<8x128xf32> to vector<8x32xf32>
    %631 = arith.negf %630 : vector<8x32xf32>
    %632 = math.exp %631 : vector<8x32xf32>
    %cst_178 = arith.constant 1.000000e+00 : f32
    %633 = vector.broadcast %cst_178 : f32 to vector<8x32xf32>
    %634 = arith.addf %633, %632 : vector<8x32xf32>
    %635 = arith.divf %633, %634 : vector<8x32xf32>
    %636 = vector.extract_strided_slice %629 {offsets = [0, 32], sizes = [8, 32], strides = [1, 1]} : vector<8x128xf32> to vector<8x32xf32>
    %637 = arith.negf %636 : vector<8x32xf32>
    %638 = math.exp %637 : vector<8x32xf32>
    %cst_179 = arith.constant 1.000000e+00 : f32
    %639 = vector.broadcast %cst_179 : f32 to vector<8x32xf32>
    %640 = arith.addf %639, %638 : vector<8x32xf32>
    %641 = arith.divf %639, %640 : vector<8x32xf32>
    %642 = vector.extract_strided_slice %629 {offsets = [0, 64], sizes = [8, 32], strides = [1, 1]} : vector<8x128xf32> to vector<8x32xf32>
    %643 = math.tanh %642 : vector<8x32xf32>
    %644 = vector.extract_strided_slice %629 {offsets = [0, 96], sizes = [8, 32], strides = [1, 1]} : vector<8x128xf32> to vector<8x32xf32>
    %645 = arith.negf %644 : vector<8x32xf32>
    %646 = math.exp %645 : vector<8x32xf32>
    %cst_180 = arith.constant 1.000000e+00 : f32
    %647 = vector.broadcast %cst_180 : f32 to vector<8x32xf32>
    %648 = arith.addf %647, %646 : vector<8x32xf32>
    %649 = arith.divf %647, %648 : vector<8x32xf32>
    %650 = arith.mulf %641, %619 : vector<8x32xf32>
    %651 = arith.mulf %635, %643 : vector<8x32xf32>
    %652 = arith.addf %650, %651 : vector<8x32xf32>
    %653 = math.tanh %652 : vector<8x32xf32>
    %654 = arith.mulf %649, %653 : vector<8x32xf32>
    %655 = arith.index_cast %625 : i32 to index
    %c0_181 = arith.constant 0 : index
    %656 = vector.load %arg18[%655, %c0_181] : memref<64x32xf32, #tpu.memory_space<vmem>>, vector<8x32xf32>
    tpu.vector_store %arg18[%655, %c0_181], %654 {strides = array<i32>} : memref<64x32xf32, #tpu.memory_space<vmem>>, vector<8x32xf32>,
    %c3_i32_182 = arith.constant 3 : i32
    %c8_i32_183 = arith.constant 8 : i32
    %657 = arith.muli %c3_i32_182, %c8_i32_183 : i32
    %658 = tpu.assume_multiple %657, 8 : i32
    %659 = arith.index_cast %658 : i32 to index
    %c0_184 = arith.constant 0 : index
    %660 = vector.load %arg17[%659, %c0_184] : memref<64x128xf32, #tpu.memory_space<vmem>>, vector<8x128xf32>
    %cst_185 = arith.constant dense<0.000000e+00> : vector<8x128xf32>
    %661 = tpu.matmul %654, %555, %cst_185 {dimension_numbers = #tpu.dot_dimension_numbers<[1], [0], [0], [1], [0, 0, 1, 1], [], []>} : vector<8x32xf32>, vector<32x128xf32>, vector<8x128xf32> -> vector<8x128xf32>
    %662 = arith.addf %660, %661 : vector<8x128xf32>
    %663 = vector.extract_strided_slice %662 {offsets = [0, 0], sizes = [8, 32], strides = [1, 1]} : vector<8x128xf32> to vector<8x32xf32>
    %664 = arith.negf %663 : vector<8x32xf32>
    %665 = math.exp %664 : vector<8x32xf32>
    %cst_186 = arith.constant 1.000000e+00 : f32
    %666 = vector.broadcast %cst_186 : f32 to vector<8x32xf32>
    %667 = arith.addf %666, %665 : vector<8x32xf32>
    %668 = arith.divf %666, %667 : vector<8x32xf32>
    %669 = vector.extract_strided_slice %662 {offsets = [0, 32], sizes = [8, 32], strides = [1, 1]} : vector<8x128xf32> to vector<8x32xf32>
    %670 = arith.negf %669 : vector<8x32xf32>
    %671 = math.exp %670 : vector<8x32xf32>
    %cst_187 = arith.constant 1.000000e+00 : f32
    %672 = vector.broadcast %cst_187 : f32 to vector<8x32xf32>
    %673 = arith.addf %672, %671 : vector<8x32xf32>
    %674 = arith.divf %672, %673 : vector<8x32xf32>
    %675 = vector.extract_strided_slice %662 {offsets = [0, 64], sizes = [8, 32], strides = [1, 1]} : vector<8x128xf32> to vector<8x32xf32>
    %676 = math.tanh %675 : vector<8x32xf32>
    %677 = vector.extract_strided_slice %662 {offsets = [0, 96], sizes = [8, 32], strides = [1, 1]} : vector<8x128xf32> to vector<8x32xf32>
    %678 = arith.negf %677 : vector<8x32xf32>
    %679 = math.exp %678 : vector<8x32xf32>
    %cst_188 = arith.constant 1.000000e+00 : f32
    %680 = vector.broadcast %cst_188 : f32 to vector<8x32xf32>
    %681 = arith.addf %680, %679 : vector<8x32xf32>
    %682 = arith.divf %680, %681 : vector<8x32xf32>
    %683 = arith.mulf %674, %652 : vector<8x32xf32>
    %684 = arith.mulf %668, %676 : vector<8x32xf32>
    %685 = arith.addf %683, %684 : vector<8x32xf32>
    %686 = math.tanh %685 : vector<8x32xf32>
    %687 = arith.mulf %682, %686 : vector<8x32xf32>
    %688 = arith.index_cast %658 : i32 to index
    %c0_189 = arith.constant 0 : index
    %689 = vector.load %arg18[%688, %c0_189] : memref<64x32xf32, #tpu.memory_space<vmem>>, vector<8x32xf32>
    tpu.vector_store %arg18[%688, %c0_189], %687 {strides = array<i32>} : memref<64x32xf32, #tpu.memory_space<vmem>>, vector<8x32xf32>,
    %c4_i32_190 = arith.constant 4 : i32
    %c8_i32_191 = arith.constant 8 : i32
    %690 = arith.muli %c4_i32_190, %c8_i32_191 : i32
    %691 = tpu.assume_multiple %690, 8 : i32
    %692 = arith.index_cast %691 : i32 to index
    %c0_192 = arith.constant 0 : index
    %693 = vector.load %arg17[%692, %c0_192] : memref<64x128xf32, #tpu.memory_space<vmem>>, vector<8x128xf32>
    %cst_193 = arith.constant dense<0.000000e+00> : vector<8x128xf32>
    %694 = tpu.matmul %687, %555, %cst_193 {dimension_numbers = #tpu.dot_dimension_numbers<[1], [0], [0], [1], [0, 0, 1, 1], [], []>} : vector<8x32xf32>, vector<32x128xf32>, vector<8x128xf32> -> vector<8x128xf32>
    %695 = arith.addf %693, %694 : vector<8x128xf32>
    %696 = vector.extract_strided_slice %695 {offsets = [0, 0], sizes = [8, 32], strides = [1, 1]} : vector<8x128xf32> to vector<8x32xf32>
    %697 = arith.negf %696 : vector<8x32xf32>
    %698 = math.exp %697 : vector<8x32xf32>
    %cst_194 = arith.constant 1.000000e+00 : f32
    %699 = vector.broadcast %cst_194 : f32 to vector<8x32xf32>
    %700 = arith.addf %699, %698 : vector<8x32xf32>
    %701 = arith.divf %699, %700 : vector<8x32xf32>
    %702 = vector.extract_strided_slice %695 {offsets = [0, 32], sizes = [8, 32], strides = [1, 1]} : vector<8x128xf32> to vector<8x32xf32>
    %703 = arith.negf %702 : vector<8x32xf32>
    %704 = math.exp %703 : vector<8x32xf32>
    %cst_195 = arith.constant 1.000000e+00 : f32
    %705 = vector.broadcast %cst_195 : f32 to vector<8x32xf32>
    %706 = arith.addf %705, %704 : vector<8x32xf32>
    %707 = arith.divf %705, %706 : vector<8x32xf32>
    %708 = vector.extract_strided_slice %695 {offsets = [0, 64], sizes = [8, 32], strides = [1, 1]} : vector<8x128xf32> to vector<8x32xf32>
    %709 = math.tanh %708 : vector<8x32xf32>
    %710 = vector.extract_strided_slice %695 {offsets = [0, 96], sizes = [8, 32], strides = [1, 1]} : vector<8x128xf32> to vector<8x32xf32>
    %711 = arith.negf %710 : vector<8x32xf32>
    %712 = math.exp %711 : vector<8x32xf32>
    %cst_196 = arith.constant 1.000000e+00 : f32
    %713 = vector.broadcast %cst_196 : f32 to vector<8x32xf32>
    %714 = arith.addf %713, %712 : vector<8x32xf32>
    %715 = arith.divf %713, %714 : vector<8x32xf32>
    %716 = arith.mulf %707, %685 : vector<8x32xf32>
    %717 = arith.mulf %701, %709 : vector<8x32xf32>
    %718 = arith.addf %716, %717 : vector<8x32xf32>
    %719 = math.tanh %718 : vector<8x32xf32>
    %720 = arith.mulf %715, %719 : vector<8x32xf32>
    %721 = arith.index_cast %691 : i32 to index
    %c0_197 = arith.constant 0 : index
    %722 = vector.load %arg18[%721, %c0_197] : memref<64x32xf32, #tpu.memory_space<vmem>>, vector<8x32xf32>
    tpu.vector_store %arg18[%721, %c0_197], %720 {strides = array<i32>} : memref<64x32xf32, #tpu.memory_space<vmem>>, vector<8x32xf32>,
    %c5_i32_198 = arith.constant 5 : i32
    %c8_i32_199 = arith.constant 8 : i32
    %723 = arith.muli %c5_i32_198, %c8_i32_199 : i32
    %724 = tpu.assume_multiple %723, 8 : i32
    %725 = arith.index_cast %724 : i32 to index
    %c0_200 = arith.constant 0 : index
    %726 = vector.load %arg17[%725, %c0_200] : memref<64x128xf32, #tpu.memory_space<vmem>>, vector<8x128xf32>
    %cst_201 = arith.constant dense<0.000000e+00> : vector<8x128xf32>
    %727 = tpu.matmul %720, %555, %cst_201 {dimension_numbers = #tpu.dot_dimension_numbers<[1], [0], [0], [1], [0, 0, 1, 1], [], []>} : vector<8x32xf32>, vector<32x128xf32>, vector<8x128xf32> -> vector<8x128xf32>
    %728 = arith.addf %726, %727 : vector<8x128xf32>
    %729 = vector.extract_strided_slice %728 {offsets = [0, 0], sizes = [8, 32], strides = [1, 1]} : vector<8x128xf32> to vector<8x32xf32>
    %730 = arith.negf %729 : vector<8x32xf32>
    %731 = math.exp %730 : vector<8x32xf32>
    %cst_202 = arith.constant 1.000000e+00 : f32
    %732 = vector.broadcast %cst_202 : f32 to vector<8x32xf32>
    %733 = arith.addf %732, %731 : vector<8x32xf32>
    %734 = arith.divf %732, %733 : vector<8x32xf32>
    %735 = vector.extract_strided_slice %728 {offsets = [0, 32], sizes = [8, 32], strides = [1, 1]} : vector<8x128xf32> to vector<8x32xf32>
    %736 = arith.negf %735 : vector<8x32xf32>
    %737 = math.exp %736 : vector<8x32xf32>
    %cst_203 = arith.constant 1.000000e+00 : f32
    %738 = vector.broadcast %cst_203 : f32 to vector<8x32xf32>
    %739 = arith.addf %738, %737 : vector<8x32xf32>
    %740 = arith.divf %738, %739 : vector<8x32xf32>
    %741 = vector.extract_strided_slice %728 {offsets = [0, 64], sizes = [8, 32], strides = [1, 1]} : vector<8x128xf32> to vector<8x32xf32>
    %742 = math.tanh %741 : vector<8x32xf32>
    %743 = vector.extract_strided_slice %728 {offsets = [0, 96], sizes = [8, 32], strides = [1, 1]} : vector<8x128xf32> to vector<8x32xf32>
    %744 = arith.negf %743 : vector<8x32xf32>
    %745 = math.exp %744 : vector<8x32xf32>
    %cst_204 = arith.constant 1.000000e+00 : f32
    %746 = vector.broadcast %cst_204 : f32 to vector<8x32xf32>
    %747 = arith.addf %746, %745 : vector<8x32xf32>
    %748 = arith.divf %746, %747 : vector<8x32xf32>
    %749 = arith.mulf %740, %718 : vector<8x32xf32>
    %750 = arith.mulf %734, %742 : vector<8x32xf32>
    %751 = arith.addf %749, %750 : vector<8x32xf32>
    %752 = math.tanh %751 : vector<8x32xf32>
    %753 = arith.mulf %748, %752 : vector<8x32xf32>
    %754 = arith.index_cast %724 : i32 to index
    %c0_205 = arith.constant 0 : index
    %755 = vector.load %arg18[%754, %c0_205] : memref<64x32xf32, #tpu.memory_space<vmem>>, vector<8x32xf32>
    tpu.vector_store %arg18[%754, %c0_205], %753 {strides = array<i32>} : memref<64x32xf32, #tpu.memory_space<vmem>>, vector<8x32xf32>,
    %c6_i32_206 = arith.constant 6 : i32
    %c8_i32_207 = arith.constant 8 : i32
    %756 = arith.muli %c6_i32_206, %c8_i32_207 : i32
    %757 = tpu.assume_multiple %756, 8 : i32
    %758 = arith.index_cast %757 : i32 to index
    %c0_208 = arith.constant 0 : index
    %759 = vector.load %arg17[%758, %c0_208] : memref<64x128xf32, #tpu.memory_space<vmem>>, vector<8x128xf32>
    %cst_209 = arith.constant dense<0.000000e+00> : vector<8x128xf32>
    %760 = tpu.matmul %753, %555, %cst_209 {dimension_numbers = #tpu.dot_dimension_numbers<[1], [0], [0], [1], [0, 0, 1, 1], [], []>} : vector<8x32xf32>, vector<32x128xf32>, vector<8x128xf32> -> vector<8x128xf32>
    %761 = arith.addf %759, %760 : vector<8x128xf32>
    %762 = vector.extract_strided_slice %761 {offsets = [0, 0], sizes = [8, 32], strides = [1, 1]} : vector<8x128xf32> to vector<8x32xf32>
    %763 = arith.negf %762 : vector<8x32xf32>
    %764 = math.exp %763 : vector<8x32xf32>
    %cst_210 = arith.constant 1.000000e+00 : f32
    %765 = vector.broadcast %cst_210 : f32 to vector<8x32xf32>
    %766 = arith.addf %765, %764 : vector<8x32xf32>
    %767 = arith.divf %765, %766 : vector<8x32xf32>
    %768 = vector.extract_strided_slice %761 {offsets = [0, 32], sizes = [8, 32], strides = [1, 1]} : vector<8x128xf32> to vector<8x32xf32>
    %769 = arith.negf %768 : vector<8x32xf32>
    %770 = math.exp %769 : vector<8x32xf32>
    %cst_211 = arith.constant 1.000000e+00 : f32
    %771 = vector.broadcast %cst_211 : f32 to vector<8x32xf32>
    %772 = arith.addf %771, %770 : vector<8x32xf32>
    %773 = arith.divf %771, %772 : vector<8x32xf32>
    %774 = vector.extract_strided_slice %761 {offsets = [0, 64], sizes = [8, 32], strides = [1, 1]} : vector<8x128xf32> to vector<8x32xf32>
    %775 = math.tanh %774 : vector<8x32xf32>
    %776 = vector.extract_strided_slice %761 {offsets = [0, 96], sizes = [8, 32], strides = [1, 1]} : vector<8x128xf32> to vector<8x32xf32>
    %777 = arith.negf %776 : vector<8x32xf32>
    %778 = math.exp %777 : vector<8x32xf32>
    %cst_212 = arith.constant 1.000000e+00 : f32
    %779 = vector.broadcast %cst_212 : f32 to vector<8x32xf32>
    %780 = arith.addf %779, %778 : vector<8x32xf32>
    %781 = arith.divf %779, %780 : vector<8x32xf32>
    %782 = arith.mulf %773, %751 : vector<8x32xf32>
    %783 = arith.mulf %767, %775 : vector<8x32xf32>
    %784 = arith.addf %782, %783 : vector<8x32xf32>
    %785 = math.tanh %784 : vector<8x32xf32>
    %786 = arith.mulf %781, %785 : vector<8x32xf32>
    %787 = arith.index_cast %757 : i32 to index
    %c0_213 = arith.constant 0 : index
    %788 = vector.load %arg18[%787, %c0_213] : memref<64x32xf32, #tpu.memory_space<vmem>>, vector<8x32xf32>
    tpu.vector_store %arg18[%787, %c0_213], %786 {strides = array<i32>} : memref<64x32xf32, #tpu.memory_space<vmem>>, vector<8x32xf32>,
    %c7_i32_214 = arith.constant 7 : i32
    %c8_i32_215 = arith.constant 8 : i32
    %789 = arith.muli %c7_i32_214, %c8_i32_215 : i32
    %790 = tpu.assume_multiple %789, 8 : i32
    %791 = arith.index_cast %790 : i32 to index
    %c0_216 = arith.constant 0 : index
    %792 = vector.load %arg17[%791, %c0_216] : memref<64x128xf32, #tpu.memory_space<vmem>>, vector<8x128xf32>
    %cst_217 = arith.constant dense<0.000000e+00> : vector<8x128xf32>
    %793 = tpu.matmul %786, %555, %cst_217 {dimension_numbers = #tpu.dot_dimension_numbers<[1], [0], [0], [1], [0, 0, 1, 1], [], []>} : vector<8x32xf32>, vector<32x128xf32>, vector<8x128xf32> -> vector<8x128xf32>
    %794 = arith.addf %792, %793 : vector<8x128xf32>
    %795 = vector.extract_strided_slice %794 {offsets = [0, 0], sizes = [8, 32], strides = [1, 1]} : vector<8x128xf32> to vector<8x32xf32>
    %796 = arith.negf %795 : vector<8x32xf32>
    %797 = math.exp %796 : vector<8x32xf32>
    %cst_218 = arith.constant 1.000000e+00 : f32
    %798 = vector.broadcast %cst_218 : f32 to vector<8x32xf32>
    %799 = arith.addf %798, %797 : vector<8x32xf32>
    %800 = arith.divf %798, %799 : vector<8x32xf32>
    %801 = vector.extract_strided_slice %794 {offsets = [0, 32], sizes = [8, 32], strides = [1, 1]} : vector<8x128xf32> to vector<8x32xf32>
    %802 = arith.negf %801 : vector<8x32xf32>
    %803 = math.exp %802 : vector<8x32xf32>
    %cst_219 = arith.constant 1.000000e+00 : f32
    %804 = vector.broadcast %cst_219 : f32 to vector<8x32xf32>
    %805 = arith.addf %804, %803 : vector<8x32xf32>
    %806 = arith.divf %804, %805 : vector<8x32xf32>
    %807 = vector.extract_strided_slice %794 {offsets = [0, 64], sizes = [8, 32], strides = [1, 1]} : vector<8x128xf32> to vector<8x32xf32>
    %808 = math.tanh %807 : vector<8x32xf32>
    %809 = vector.extract_strided_slice %794 {offsets = [0, 96], sizes = [8, 32], strides = [1, 1]} : vector<8x128xf32> to vector<8x32xf32>
    %810 = arith.negf %809 : vector<8x32xf32>
    %811 = math.exp %810 : vector<8x32xf32>
    %cst_220 = arith.constant 1.000000e+00 : f32
    %812 = vector.broadcast %cst_220 : f32 to vector<8x32xf32>
    %813 = arith.addf %812, %811 : vector<8x32xf32>
    %814 = arith.divf %812, %813 : vector<8x32xf32>
    %815 = arith.mulf %806, %784 : vector<8x32xf32>
    %816 = arith.mulf %800, %808 : vector<8x32xf32>
    %817 = arith.addf %815, %816 : vector<8x32xf32>
    %818 = math.tanh %817 : vector<8x32xf32>
    %819 = arith.mulf %814, %818 : vector<8x32xf32>
    %820 = arith.index_cast %790 : i32 to index
    %c0_221 = arith.constant 0 : index
    %821 = vector.load %arg18[%820, %c0_221] : memref<64x32xf32, #tpu.memory_space<vmem>>, vector<8x32xf32>
    tpu.vector_store %arg18[%820, %c0_221], %819 {strides = array<i32>} : memref<64x32xf32, #tpu.memory_space<vmem>>, vector<8x32xf32>,
    %c8_i32_222 = arith.constant 8 : i32
    %c0_223 = arith.constant 0 : index
    %c0_224 = arith.constant 0 : index
    %822 = vector.load %arg18[%c0_223, %c0_224] : memref<64x32xf32, #tpu.memory_space<vmem>>, vector<64x32xf32>
    %c0_225 = arith.constant 0 : index
    %c0_226 = arith.constant 0 : index
    %823 = vector.load %arg11[%c0_225, %c0_226] : memref<32x128xf32, #tpu.memory_space<vmem>>, vector<32x128xf32>
    %cst_227 = arith.constant dense<0.000000e+00> : vector<64x128xf32>
    %824 = tpu.matmul %822, %823, %cst_227 {dimension_numbers = #tpu.dot_dimension_numbers<[1], [0], [0], [1], [0, 0, 1, 1], [], []>} : vector<64x32xf32>, vector<32x128xf32>, vector<64x128xf32> -> vector<64x128xf32>
    %c0_228 = arith.constant 0 : index
    %c0_229 = arith.constant 0 : index
    %825 = vector.load %arg13[%c0_228, %c0_229] : memref<1x128xf32, #tpu.memory_space<vmem>>, vector<1x128xf32>
    %826 = vector.broadcast %825 : vector<1x128xf32> to vector<64x128xf32>
    %827 = arith.addf %824, %826 : vector<64x128xf32>
    %c0_230 = arith.constant 0 : index
    %c0_231 = arith.constant 0 : index
    %828 = vector.load %arg17[%c0_230, %c0_231] : memref<64x128xf32, #tpu.memory_space<vmem>>, vector<64x128xf32>
    tpu.vector_store %arg17[%c0_230, %c0_231], %827 {strides = array<i32>} : memref<64x128xf32, #tpu.memory_space<vmem>>, vector<64x128xf32>,
    %c0_232 = arith.constant 0 : index
    %c0_233 = arith.constant 0 : index
    %829 = vector.load %arg12[%c0_232, %c0_233] : memref<32x128xf32, #tpu.memory_space<vmem>>, vector<32x128xf32>
    %cst_234 = arith.constant 0.000000e+00 : f32
    %830 = vector.broadcast %cst_234 : f32 to vector<8x32xf32>
    %cst_235 = arith.constant 0.000000e+00 : f32
    %831 = vector.broadcast %cst_235 : f32 to vector<8x32xf32>
    %c0_i32_236 = arith.constant 0 : i32
    %c8_i32_237 = arith.constant 8 : i32
    %832 = arith.muli %c0_i32_236, %c8_i32_237 : i32
    %833 = tpu.assume_multiple %832, 8 : i32
    %834 = arith.index_cast %833 : i32 to index
    %c0_238 = arith.constant 0 : index
    %835 = vector.load %arg17[%834, %c0_238] : memref<64x128xf32, #tpu.memory_space<vmem>>, vector<8x128xf32>
    %cst_239 = arith.constant dense<0.000000e+00> : vector<8x128xf32>
    %836 = tpu.matmul %830, %829, %cst_239 {dimension_numbers = #tpu.dot_dimension_numbers<[1], [0], [0], [1], [0, 0, 1, 1], [], []>} : vector<8x32xf32>, vector<32x128xf32>, vector<8x128xf32> -> vector<8x128xf32>
    %837 = arith.addf %835, %836 : vector<8x128xf32>
    %838 = vector.extract_strided_slice %837 {offsets = [0, 0], sizes = [8, 32], strides = [1, 1]} : vector<8x128xf32> to vector<8x32xf32>
    %839 = arith.negf %838 : vector<8x32xf32>
    %840 = math.exp %839 : vector<8x32xf32>
    %cst_240 = arith.constant 1.000000e+00 : f32
    %841 = vector.broadcast %cst_240 : f32 to vector<8x32xf32>
    %842 = arith.addf %841, %840 : vector<8x32xf32>
    %843 = arith.divf %841, %842 : vector<8x32xf32>
    %844 = vector.extract_strided_slice %837 {offsets = [0, 32], sizes = [8, 32], strides = [1, 1]} : vector<8x128xf32> to vector<8x32xf32>
    %845 = arith.negf %844 : vector<8x32xf32>
    %846 = math.exp %845 : vector<8x32xf32>
    %cst_241 = arith.constant 1.000000e+00 : f32
    %847 = vector.broadcast %cst_241 : f32 to vector<8x32xf32>
    %848 = arith.addf %847, %846 : vector<8x32xf32>
    %849 = arith.divf %847, %848 : vector<8x32xf32>
    %850 = vector.extract_strided_slice %837 {offsets = [0, 64], sizes = [8, 32], strides = [1, 1]} : vector<8x128xf32> to vector<8x32xf32>
    %851 = math.tanh %850 : vector<8x32xf32>
    %852 = vector.extract_strided_slice %837 {offsets = [0, 96], sizes = [8, 32], strides = [1, 1]} : vector<8x128xf32> to vector<8x32xf32>
    %853 = arith.negf %852 : vector<8x32xf32>
    %854 = math.exp %853 : vector<8x32xf32>
    %cst_242 = arith.constant 1.000000e+00 : f32
    %855 = vector.broadcast %cst_242 : f32 to vector<8x32xf32>
    %856 = arith.addf %855, %854 : vector<8x32xf32>
    %857 = arith.divf %855, %856 : vector<8x32xf32>
    %858 = arith.mulf %849, %831 : vector<8x32xf32>
    %859 = arith.mulf %843, %851 : vector<8x32xf32>
    %860 = arith.addf %858, %859 : vector<8x32xf32>
    %861 = math.tanh %860 : vector<8x32xf32>
    %862 = arith.mulf %857, %861 : vector<8x32xf32>
    %863 = arith.index_cast %833 : i32 to index
    %c0_243 = arith.constant 0 : index
    %864 = vector.load %arg18[%863, %c0_243] : memref<64x32xf32, #tpu.memory_space<vmem>>, vector<8x32xf32>
    tpu.vector_store %arg18[%863, %c0_243], %862 {strides = array<i32>} : memref<64x32xf32, #tpu.memory_space<vmem>>, vector<8x32xf32>,
    %c1_i32_244 = arith.constant 1 : i32
    %c8_i32_245 = arith.constant 8 : i32
    %865 = arith.muli %c1_i32_244, %c8_i32_245 : i32
    %866 = tpu.assume_multiple %865, 8 : i32
    %867 = arith.index_cast %866 : i32 to index
    %c0_246 = arith.constant 0 : index
    %868 = vector.load %arg17[%867, %c0_246] : memref<64x128xf32, #tpu.memory_space<vmem>>, vector<8x128xf32>
    %cst_247 = arith.constant dense<0.000000e+00> : vector<8x128xf32>
    %869 = tpu.matmul %862, %829, %cst_247 {dimension_numbers = #tpu.dot_dimension_numbers<[1], [0], [0], [1], [0, 0, 1, 1], [], []>} : vector<8x32xf32>, vector<32x128xf32>, vector<8x128xf32> -> vector<8x128xf32>
    %870 = arith.addf %868, %869 : vector<8x128xf32>
    %871 = vector.extract_strided_slice %870 {offsets = [0, 0], sizes = [8, 32], strides = [1, 1]} : vector<8x128xf32> to vector<8x32xf32>
    %872 = arith.negf %871 : vector<8x32xf32>
    %873 = math.exp %872 : vector<8x32xf32>
    %cst_248 = arith.constant 1.000000e+00 : f32
    %874 = vector.broadcast %cst_248 : f32 to vector<8x32xf32>
    %875 = arith.addf %874, %873 : vector<8x32xf32>
    %876 = arith.divf %874, %875 : vector<8x32xf32>
    %877 = vector.extract_strided_slice %870 {offsets = [0, 32], sizes = [8, 32], strides = [1, 1]} : vector<8x128xf32> to vector<8x32xf32>
    %878 = arith.negf %877 : vector<8x32xf32>
    %879 = math.exp %878 : vector<8x32xf32>
    %cst_249 = arith.constant 1.000000e+00 : f32
    %880 = vector.broadcast %cst_249 : f32 to vector<8x32xf32>
    %881 = arith.addf %880, %879 : vector<8x32xf32>
    %882 = arith.divf %880, %881 : vector<8x32xf32>
    %883 = vector.extract_strided_slice %870 {offsets = [0, 64], sizes = [8, 32], strides = [1, 1]} : vector<8x128xf32> to vector<8x32xf32>
    %884 = math.tanh %883 : vector<8x32xf32>
    %885 = vector.extract_strided_slice %870 {offsets = [0, 96], sizes = [8, 32], strides = [1, 1]} : vector<8x128xf32> to vector<8x32xf32>
    %886 = arith.negf %885 : vector<8x32xf32>
    %887 = math.exp %886 : vector<8x32xf32>
    %cst_250 = arith.constant 1.000000e+00 : f32
    %888 = vector.broadcast %cst_250 : f32 to vector<8x32xf32>
    %889 = arith.addf %888, %887 : vector<8x32xf32>
    %890 = arith.divf %888, %889 : vector<8x32xf32>
    %891 = arith.mulf %882, %860 : vector<8x32xf32>
    %892 = arith.mulf %876, %884 : vector<8x32xf32>
    %893 = arith.addf %891, %892 : vector<8x32xf32>
    %894 = math.tanh %893 : vector<8x32xf32>
    %895 = arith.mulf %890, %894 : vector<8x32xf32>
    %896 = arith.index_cast %866 : i32 to index
    %c0_251 = arith.constant 0 : index
    %897 = vector.load %arg18[%896, %c0_251] : memref<64x32xf32, #tpu.memory_space<vmem>>, vector<8x32xf32>
    tpu.vector_store %arg18[%896, %c0_251], %895 {strides = array<i32>} : memref<64x32xf32, #tpu.memory_space<vmem>>, vector<8x32xf32>,
    %c2_i32_252 = arith.constant 2 : i32
    %c8_i32_253 = arith.constant 8 : i32
    %898 = arith.muli %c2_i32_252, %c8_i32_253 : i32
    %899 = tpu.assume_multiple %898, 8 : i32
    %900 = arith.index_cast %899 : i32 to index
    %c0_254 = arith.constant 0 : index
    %901 = vector.load %arg17[%900, %c0_254] : memref<64x128xf32, #tpu.memory_space<vmem>>, vector<8x128xf32>
    %cst_255 = arith.constant dense<0.000000e+00> : vector<8x128xf32>
    %902 = tpu.matmul %895, %829, %cst_255 {dimension_numbers = #tpu.dot_dimension_numbers<[1], [0], [0], [1], [0, 0, 1, 1], [], []>} : vector<8x32xf32>, vector<32x128xf32>, vector<8x128xf32> -> vector<8x128xf32>
    %903 = arith.addf %901, %902 : vector<8x128xf32>
    %904 = vector.extract_strided_slice %903 {offsets = [0, 0], sizes = [8, 32], strides = [1, 1]} : vector<8x128xf32> to vector<8x32xf32>
    %905 = arith.negf %904 : vector<8x32xf32>
    %906 = math.exp %905 : vector<8x32xf32>
    %cst_256 = arith.constant 1.000000e+00 : f32
    %907 = vector.broadcast %cst_256 : f32 to vector<8x32xf32>
    %908 = arith.addf %907, %906 : vector<8x32xf32>
    %909 = arith.divf %907, %908 : vector<8x32xf32>
    %910 = vector.extract_strided_slice %903 {offsets = [0, 32], sizes = [8, 32], strides = [1, 1]} : vector<8x128xf32> to vector<8x32xf32>
    %911 = arith.negf %910 : vector<8x32xf32>
    %912 = math.exp %911 : vector<8x32xf32>
    %cst_257 = arith.constant 1.000000e+00 : f32
    %913 = vector.broadcast %cst_257 : f32 to vector<8x32xf32>
    %914 = arith.addf %913, %912 : vector<8x32xf32>
    %915 = arith.divf %913, %914 : vector<8x32xf32>
    %916 = vector.extract_strided_slice %903 {offsets = [0, 64], sizes = [8, 32], strides = [1, 1]} : vector<8x128xf32> to vector<8x32xf32>
    %917 = math.tanh %916 : vector<8x32xf32>
    %918 = vector.extract_strided_slice %903 {offsets = [0, 96], sizes = [8, 32], strides = [1, 1]} : vector<8x128xf32> to vector<8x32xf32>
    %919 = arith.negf %918 : vector<8x32xf32>
    %920 = math.exp %919 : vector<8x32xf32>
    %cst_258 = arith.constant 1.000000e+00 : f32
    %921 = vector.broadcast %cst_258 : f32 to vector<8x32xf32>
    %922 = arith.addf %921, %920 : vector<8x32xf32>
    %923 = arith.divf %921, %922 : vector<8x32xf32>
    %924 = arith.mulf %915, %893 : vector<8x32xf32>
    %925 = arith.mulf %909, %917 : vector<8x32xf32>
    %926 = arith.addf %924, %925 : vector<8x32xf32>
    %927 = math.tanh %926 : vector<8x32xf32>
    %928 = arith.mulf %923, %927 : vector<8x32xf32>
    %929 = arith.index_cast %899 : i32 to index
    %c0_259 = arith.constant 0 : index
    %930 = vector.load %arg18[%929, %c0_259] : memref<64x32xf32, #tpu.memory_space<vmem>>, vector<8x32xf32>
    tpu.vector_store %arg18[%929, %c0_259], %928 {strides = array<i32>} : memref<64x32xf32, #tpu.memory_space<vmem>>, vector<8x32xf32>,
    %c3_i32_260 = arith.constant 3 : i32
    %c8_i32_261 = arith.constant 8 : i32
    %931 = arith.muli %c3_i32_260, %c8_i32_261 : i32
    %932 = tpu.assume_multiple %931, 8 : i32
    %933 = arith.index_cast %932 : i32 to index
    %c0_262 = arith.constant 0 : index
    %934 = vector.load %arg17[%933, %c0_262] : memref<64x128xf32, #tpu.memory_space<vmem>>, vector<8x128xf32>
    %cst_263 = arith.constant dense<0.000000e+00> : vector<8x128xf32>
    %935 = tpu.matmul %928, %829, %cst_263 {dimension_numbers = #tpu.dot_dimension_numbers<[1], [0], [0], [1], [0, 0, 1, 1], [], []>} : vector<8x32xf32>, vector<32x128xf32>, vector<8x128xf32> -> vector<8x128xf32>
    %936 = arith.addf %934, %935 : vector<8x128xf32>
    %937 = vector.extract_strided_slice %936 {offsets = [0, 0], sizes = [8, 32], strides = [1, 1]} : vector<8x128xf32> to vector<8x32xf32>
    %938 = arith.negf %937 : vector<8x32xf32>
    %939 = math.exp %938 : vector<8x32xf32>
    %cst_264 = arith.constant 1.000000e+00 : f32
    %940 = vector.broadcast %cst_264 : f32 to vector<8x32xf32>
    %941 = arith.addf %940, %939 : vector<8x32xf32>
    %942 = arith.divf %940, %941 : vector<8x32xf32>
    %943 = vector.extract_strided_slice %936 {offsets = [0, 32], sizes = [8, 32], strides = [1, 1]} : vector<8x128xf32> to vector<8x32xf32>
    %944 = arith.negf %943 : vector<8x32xf32>
    %945 = math.exp %944 : vector<8x32xf32>
    %cst_265 = arith.constant 1.000000e+00 : f32
    %946 = vector.broadcast %cst_265 : f32 to vector<8x32xf32>
    %947 = arith.addf %946, %945 : vector<8x32xf32>
    %948 = arith.divf %946, %947 : vector<8x32xf32>
    %949 = vector.extract_strided_slice %936 {offsets = [0, 64], sizes = [8, 32], strides = [1, 1]} : vector<8x128xf32> to vector<8x32xf32>
    %950 = math.tanh %949 : vector<8x32xf32>
    %951 = vector.extract_strided_slice %936 {offsets = [0, 96], sizes = [8, 32], strides = [1, 1]} : vector<8x128xf32> to vector<8x32xf32>
    %952 = arith.negf %951 : vector<8x32xf32>
    %953 = math.exp %952 : vector<8x32xf32>
    %cst_266 = arith.constant 1.000000e+00 : f32
    %954 = vector.broadcast %cst_266 : f32 to vector<8x32xf32>
    %955 = arith.addf %954, %953 : vector<8x32xf32>
    %956 = arith.divf %954, %955 : vector<8x32xf32>
    %957 = arith.mulf %948, %926 : vector<8x32xf32>
    %958 = arith.mulf %942, %950 : vector<8x32xf32>
    %959 = arith.addf %957, %958 : vector<8x32xf32>
    %960 = math.tanh %959 : vector<8x32xf32>
    %961 = arith.mulf %956, %960 : vector<8x32xf32>
    %962 = arith.index_cast %932 : i32 to index
    %c0_267 = arith.constant 0 : index
    %963 = vector.load %arg18[%962, %c0_267] : memref<64x32xf32, #tpu.memory_space<vmem>>, vector<8x32xf32>
    tpu.vector_store %arg18[%962, %c0_267], %961 {strides = array<i32>} : memref<64x32xf32, #tpu.memory_space<vmem>>, vector<8x32xf32>,
    %c4_i32_268 = arith.constant 4 : i32
    %c8_i32_269 = arith.constant 8 : i32
    %964 = arith.muli %c4_i32_268, %c8_i32_269 : i32
    %965 = tpu.assume_multiple %964, 8 : i32
    %966 = arith.index_cast %965 : i32 to index
    %c0_270 = arith.constant 0 : index
    %967 = vector.load %arg17[%966, %c0_270] : memref<64x128xf32, #tpu.memory_space<vmem>>, vector<8x128xf32>
    %cst_271 = arith.constant dense<0.000000e+00> : vector<8x128xf32>
    %968 = tpu.matmul %961, %829, %cst_271 {dimension_numbers = #tpu.dot_dimension_numbers<[1], [0], [0], [1], [0, 0, 1, 1], [], []>} : vector<8x32xf32>, vector<32x128xf32>, vector<8x128xf32> -> vector<8x128xf32>
    %969 = arith.addf %967, %968 : vector<8x128xf32>
    %970 = vector.extract_strided_slice %969 {offsets = [0, 0], sizes = [8, 32], strides = [1, 1]} : vector<8x128xf32> to vector<8x32xf32>
    %971 = arith.negf %970 : vector<8x32xf32>
    %972 = math.exp %971 : vector<8x32xf32>
    %cst_272 = arith.constant 1.000000e+00 : f32
    %973 = vector.broadcast %cst_272 : f32 to vector<8x32xf32>
    %974 = arith.addf %973, %972 : vector<8x32xf32>
    %975 = arith.divf %973, %974 : vector<8x32xf32>
    %976 = vector.extract_strided_slice %969 {offsets = [0, 32], sizes = [8, 32], strides = [1, 1]} : vector<8x128xf32> to vector<8x32xf32>
    %977 = arith.negf %976 : vector<8x32xf32>
    %978 = math.exp %977 : vector<8x32xf32>
    %cst_273 = arith.constant 1.000000e+00 : f32
    %979 = vector.broadcast %cst_273 : f32 to vector<8x32xf32>
    %980 = arith.addf %979, %978 : vector<8x32xf32>
    %981 = arith.divf %979, %980 : vector<8x32xf32>
    %982 = vector.extract_strided_slice %969 {offsets = [0, 64], sizes = [8, 32], strides = [1, 1]} : vector<8x128xf32> to vector<8x32xf32>
    %983 = math.tanh %982 : vector<8x32xf32>
    %984 = vector.extract_strided_slice %969 {offsets = [0, 96], sizes = [8, 32], strides = [1, 1]} : vector<8x128xf32> to vector<8x32xf32>
    %985 = arith.negf %984 : vector<8x32xf32>
    %986 = math.exp %985 : vector<8x32xf32>
    %cst_274 = arith.constant 1.000000e+00 : f32
    %987 = vector.broadcast %cst_274 : f32 to vector<8x32xf32>
    %988 = arith.addf %987, %986 : vector<8x32xf32>
    %989 = arith.divf %987, %988 : vector<8x32xf32>
    %990 = arith.mulf %981, %959 : vector<8x32xf32>
    %991 = arith.mulf %975, %983 : vector<8x32xf32>
    %992 = arith.addf %990, %991 : vector<8x32xf32>
    %993 = math.tanh %992 : vector<8x32xf32>
    %994 = arith.mulf %989, %993 : vector<8x32xf32>
    %995 = arith.index_cast %965 : i32 to index
    %c0_275 = arith.constant 0 : index
    %996 = vector.load %arg18[%995, %c0_275] : memref<64x32xf32, #tpu.memory_space<vmem>>, vector<8x32xf32>
    tpu.vector_store %arg18[%995, %c0_275], %994 {strides = array<i32>} : memref<64x32xf32, #tpu.memory_space<vmem>>, vector<8x32xf32>,
    %c5_i32_276 = arith.constant 5 : i32
    %c8_i32_277 = arith.constant 8 : i32
    %997 = arith.muli %c5_i32_276, %c8_i32_277 : i32
    %998 = tpu.assume_multiple %997, 8 : i32
    %999 = arith.index_cast %998 : i32 to index
    %c0_278 = arith.constant 0 : index
    %1000 = vector.load %arg17[%999, %c0_278] : memref<64x128xf32, #tpu.memory_space<vmem>>, vector<8x128xf32>
    %cst_279 = arith.constant dense<0.000000e+00> : vector<8x128xf32>
    %1001 = tpu.matmul %994, %829, %cst_279 {dimension_numbers = #tpu.dot_dimension_numbers<[1], [0], [0], [1], [0, 0, 1, 1], [], []>} : vector<8x32xf32>, vector<32x128xf32>, vector<8x128xf32> -> vector<8x128xf32>
    %1002 = arith.addf %1000, %1001 : vector<8x128xf32>
    %1003 = vector.extract_strided_slice %1002 {offsets = [0, 0], sizes = [8, 32], strides = [1, 1]} : vector<8x128xf32> to vector<8x32xf32>
    %1004 = arith.negf %1003 : vector<8x32xf32>
    %1005 = math.exp %1004 : vector<8x32xf32>
    %cst_280 = arith.constant 1.000000e+00 : f32
    %1006 = vector.broadcast %cst_280 : f32 to vector<8x32xf32>
    %1007 = arith.addf %1006, %1005 : vector<8x32xf32>
    %1008 = arith.divf %1006, %1007 : vector<8x32xf32>
    %1009 = vector.extract_strided_slice %1002 {offsets = [0, 32], sizes = [8, 32], strides = [1, 1]} : vector<8x128xf32> to vector<8x32xf32>
    %1010 = arith.negf %1009 : vector<8x32xf32>
    %1011 = math.exp %1010 : vector<8x32xf32>
    %cst_281 = arith.constant 1.000000e+00 : f32
    %1012 = vector.broadcast %cst_281 : f32 to vector<8x32xf32>
    %1013 = arith.addf %1012, %1011 : vector<8x32xf32>
    %1014 = arith.divf %1012, %1013 : vector<8x32xf32>
    %1015 = vector.extract_strided_slice %1002 {offsets = [0, 64], sizes = [8, 32], strides = [1, 1]} : vector<8x128xf32> to vector<8x32xf32>
    %1016 = math.tanh %1015 : vector<8x32xf32>
    %1017 = vector.extract_strided_slice %1002 {offsets = [0, 96], sizes = [8, 32], strides = [1, 1]} : vector<8x128xf32> to vector<8x32xf32>
    %1018 = arith.negf %1017 : vector<8x32xf32>
    %1019 = math.exp %1018 : vector<8x32xf32>
    %cst_282 = arith.constant 1.000000e+00 : f32
    %1020 = vector.broadcast %cst_282 : f32 to vector<8x32xf32>
    %1021 = arith.addf %1020, %1019 : vector<8x32xf32>
    %1022 = arith.divf %1020, %1021 : vector<8x32xf32>
    %1023 = arith.mulf %1014, %992 : vector<8x32xf32>
    %1024 = arith.mulf %1008, %1016 : vector<8x32xf32>
    %1025 = arith.addf %1023, %1024 : vector<8x32xf32>
    %1026 = math.tanh %1025 : vector<8x32xf32>
    %1027 = arith.mulf %1022, %1026 : vector<8x32xf32>
    %1028 = arith.index_cast %998 : i32 to index
    %c0_283 = arith.constant 0 : index
    %1029 = vector.load %arg18[%1028, %c0_283] : memref<64x32xf32, #tpu.memory_space<vmem>>, vector<8x32xf32>
    tpu.vector_store %arg18[%1028, %c0_283], %1027 {strides = array<i32>} : memref<64x32xf32, #tpu.memory_space<vmem>>, vector<8x32xf32>,
    %c6_i32_284 = arith.constant 6 : i32
    %c8_i32_285 = arith.constant 8 : i32
    %1030 = arith.muli %c6_i32_284, %c8_i32_285 : i32
    %1031 = tpu.assume_multiple %1030, 8 : i32
    %1032 = arith.index_cast %1031 : i32 to index
    %c0_286 = arith.constant 0 : index
    %1033 = vector.load %arg17[%1032, %c0_286] : memref<64x128xf32, #tpu.memory_space<vmem>>, vector<8x128xf32>
    %cst_287 = arith.constant dense<0.000000e+00> : vector<8x128xf32>
    %1034 = tpu.matmul %1027, %829, %cst_287 {dimension_numbers = #tpu.dot_dimension_numbers<[1], [0], [0], [1], [0, 0, 1, 1], [], []>} : vector<8x32xf32>, vector<32x128xf32>, vector<8x128xf32> -> vector<8x128xf32>
    %1035 = arith.addf %1033, %1034 : vector<8x128xf32>
    %1036 = vector.extract_strided_slice %1035 {offsets = [0, 0], sizes = [8, 32], strides = [1, 1]} : vector<8x128xf32> to vector<8x32xf32>
    %1037 = arith.negf %1036 : vector<8x32xf32>
    %1038 = math.exp %1037 : vector<8x32xf32>
    %cst_288 = arith.constant 1.000000e+00 : f32
    %1039 = vector.broadcast %cst_288 : f32 to vector<8x32xf32>
    %1040 = arith.addf %1039, %1038 : vector<8x32xf32>
    %1041 = arith.divf %1039, %1040 : vector<8x32xf32>
    %1042 = vector.extract_strided_slice %1035 {offsets = [0, 32], sizes = [8, 32], strides = [1, 1]} : vector<8x128xf32> to vector<8x32xf32>
    %1043 = arith.negf %1042 : vector<8x32xf32>
    %1044 = math.exp %1043 : vector<8x32xf32>
    %cst_289 = arith.constant 1.000000e+00 : f32
    %1045 = vector.broadcast %cst_289 : f32 to vector<8x32xf32>
    %1046 = arith.addf %1045, %1044 : vector<8x32xf32>
    %1047 = arith.divf %1045, %1046 : vector<8x32xf32>
    %1048 = vector.extract_strided_slice %1035 {offsets = [0, 64], sizes = [8, 32], strides = [1, 1]} : vector<8x128xf32> to vector<8x32xf32>
    %1049 = math.tanh %1048 : vector<8x32xf32>
    %1050 = vector.extract_strided_slice %1035 {offsets = [0, 96], sizes = [8, 32], strides = [1, 1]} : vector<8x128xf32> to vector<8x32xf32>
    %1051 = arith.negf %1050 : vector<8x32xf32>
    %1052 = math.exp %1051 : vector<8x32xf32>
    %cst_290 = arith.constant 1.000000e+00 : f32
    %1053 = vector.broadcast %cst_290 : f32 to vector<8x32xf32>
    %1054 = arith.addf %1053, %1052 : vector<8x32xf32>
    %1055 = arith.divf %1053, %1054 : vector<8x32xf32>
    %1056 = arith.mulf %1047, %1025 : vector<8x32xf32>
    %1057 = arith.mulf %1041, %1049 : vector<8x32xf32>
    %1058 = arith.addf %1056, %1057 : vector<8x32xf32>
    %1059 = math.tanh %1058 : vector<8x32xf32>
    %1060 = arith.mulf %1055, %1059 : vector<8x32xf32>
    %1061 = arith.index_cast %1031 : i32 to index
    %c0_291 = arith.constant 0 : index
    %1062 = vector.load %arg18[%1061, %c0_291] : memref<64x32xf32, #tpu.memory_space<vmem>>, vector<8x32xf32>
    tpu.vector_store %arg18[%1061, %c0_291], %1060 {strides = array<i32>} : memref<64x32xf32, #tpu.memory_space<vmem>>, vector<8x32xf32>,
    %c7_i32_292 = arith.constant 7 : i32
    %c8_i32_293 = arith.constant 8 : i32
    %1063 = arith.muli %c7_i32_292, %c8_i32_293 : i32
    %1064 = tpu.assume_multiple %1063, 8 : i32
    %1065 = arith.index_cast %1064 : i32 to index
    %c0_294 = arith.constant 0 : index
    %1066 = vector.load %arg17[%1065, %c0_294] : memref<64x128xf32, #tpu.memory_space<vmem>>, vector<8x128xf32>
    %cst_295 = arith.constant dense<0.000000e+00> : vector<8x128xf32>
    %1067 = tpu.matmul %1060, %829, %cst_295 {dimension_numbers = #tpu.dot_dimension_numbers<[1], [0], [0], [1], [0, 0, 1, 1], [], []>} : vector<8x32xf32>, vector<32x128xf32>, vector<8x128xf32> -> vector<8x128xf32>
    %1068 = arith.addf %1066, %1067 : vector<8x128xf32>
    %1069 = vector.extract_strided_slice %1068 {offsets = [0, 0], sizes = [8, 32], strides = [1, 1]} : vector<8x128xf32> to vector<8x32xf32>
    %1070 = arith.negf %1069 : vector<8x32xf32>
    %1071 = math.exp %1070 : vector<8x32xf32>
    %cst_296 = arith.constant 1.000000e+00 : f32
    %1072 = vector.broadcast %cst_296 : f32 to vector<8x32xf32>
    %1073 = arith.addf %1072, %1071 : vector<8x32xf32>
    %1074 = arith.divf %1072, %1073 : vector<8x32xf32>
    %1075 = vector.extract_strided_slice %1068 {offsets = [0, 32], sizes = [8, 32], strides = [1, 1]} : vector<8x128xf32> to vector<8x32xf32>
    %1076 = arith.negf %1075 : vector<8x32xf32>
    %1077 = math.exp %1076 : vector<8x32xf32>
    %cst_297 = arith.constant 1.000000e+00 : f32
    %1078 = vector.broadcast %cst_297 : f32 to vector<8x32xf32>
    %1079 = arith.addf %1078, %1077 : vector<8x32xf32>
    %1080 = arith.divf %1078, %1079 : vector<8x32xf32>
    %1081 = vector.extract_strided_slice %1068 {offsets = [0, 64], sizes = [8, 32], strides = [1, 1]} : vector<8x128xf32> to vector<8x32xf32>
    %1082 = math.tanh %1081 : vector<8x32xf32>
    %1083 = vector.extract_strided_slice %1068 {offsets = [0, 96], sizes = [8, 32], strides = [1, 1]} : vector<8x128xf32> to vector<8x32xf32>
    %1084 = arith.negf %1083 : vector<8x32xf32>
    %1085 = math.exp %1084 : vector<8x32xf32>
    %cst_298 = arith.constant 1.000000e+00 : f32
    %1086 = vector.broadcast %cst_298 : f32 to vector<8x32xf32>
    %1087 = arith.addf %1086, %1085 : vector<8x32xf32>
    %1088 = arith.divf %1086, %1087 : vector<8x32xf32>
    %1089 = arith.mulf %1080, %1058 : vector<8x32xf32>
    %1090 = arith.mulf %1074, %1082 : vector<8x32xf32>
    %1091 = arith.addf %1089, %1090 : vector<8x32xf32>
    %1092 = math.tanh %1091 : vector<8x32xf32>
    %1093 = arith.mulf %1088, %1092 : vector<8x32xf32>
    %1094 = arith.index_cast %1064 : i32 to index
    %c0_299 = arith.constant 0 : index
    %1095 = vector.load %arg18[%1094, %c0_299] : memref<64x32xf32, #tpu.memory_space<vmem>>, vector<8x32xf32>
    tpu.vector_store %arg18[%1094, %c0_299], %1093 {strides = array<i32>} : memref<64x32xf32, #tpu.memory_space<vmem>>, vector<8x32xf32>,
    %c8_i32_300 = arith.constant 8 : i32
    %1096 = arith.addf %545, %1093 : vector<8x32xf32>
    %c0_301 = arith.constant 0 : index
    %c0_302 = arith.constant 0 : index
    %1097 = vector.load %arg14[%c0_301, %c0_302] : memref<32x8xf32, #tpu.memory_space<vmem>>, vector<32x8xf32>
    %cst_303 = arith.constant dense<0.000000e+00> : vector<8x8xf32>
    %1098 = tpu.matmul %1096, %1097, %cst_303 {dimension_numbers = #tpu.dot_dimension_numbers<[1], [0], [0], [1], [0, 0, 1, 1], [], []>} : vector<8x32xf32>, vector<32x8xf32>, vector<8x8xf32> -> vector<8x8xf32>
    %c0_304 = arith.constant 0 : index
    %c0_305 = arith.constant 0 : index
    %1099 = vector.load %arg15[%c0_304, %c0_305] : memref<1x8xf32, #tpu.memory_space<vmem>>, vector<1x8xf32>
    %1100 = vector.broadcast %1099 : vector<1x8xf32> to vector<8x8xf32>
    %1101 = arith.addf %1098, %1100 : vector<8x8xf32>
    %c0_306 = arith.constant 0 : index
    %c0_307 = arith.constant 0 : index
    %1102 = vector.load %arg16[%c0_306, %c0_307] : memref<8x8xf32, #tpu.memory_space<vmem>>, vector<8x8xf32>
    tpu.vector_store %arg16[%c0_306, %c0_307], %1101 {strides = array<i32>} : memref<8x8xf32, #tpu.memory_space<vmem>>, vector<8x8xf32>,
    return
  }
}

</mosaic_0001>

<bundles_post_ra>
// kernel: lstm_model_forward.1
= control target key start
LH: loop header
LB: loop body
LE: loop exit
PB: predicated region body
PF: predicated region fallthrough
CT: control target
= control target key end

     0   :  { %vm94_vm0 = vcmask 1043456   ;;  %vm69_vm1 = vcmask 31744   ;;  %v5307_v0 = vmov 0.0|0.0   ;;  %vm5308_vm2 = vmmov 0   ;;  %s5310_s22 = smov 64   ;;  %s6128_s3 = inlined_call_operand.vmem [shape: f32[32,128], index: 3, kind: input, shape index: {}]   ;;  %s6129_s2 = inlined_call_operand.vmem [shape: f32[4,128], index: 2, kind: input, shape index: {}]   ;;  %s6130_s0 = inlined_call_operand.vmem [shape: f32[64,4], index: 0, kind: input, shape index: {}]   ;;  %s6131_s4 = inlined_call_operand.vmem [shape: f32[1,128], index: 4, kind: input, shape index: {}]   ;;  %s6132_s5 = inlined_call_operand.vmem [shape: f32[32,128], index: 5, kind: input, shape index: {}]   ;;  %s6133_s6 = inlined_call_operand.vmem [shape: f32[32,128], index: 6, kind: input, shape index: {}]   ;;  %s6134_s7 = inlined_call_operand.vmem [shape: f32[1,128], index: 7, kind: input, shape index: {}]   ;;  %s6135_s8 = inlined_call_operand.vmem [shape: f32[4,128], index: 8, kind: input, shape index: {}]   ;;  %s6136_s9 = inlined_call_operand.vmem [shape: f32[32,128], index: 9, kind: input, shape index: {}]   ;;  %s6137_s1 = inlined_call_operand.vmem [shape: f32[64,4], index: 1, kind: input, shape index: {}]   ;;  %s6138_s10 = inlined_call_operand.vmem [shape: f32[1,128], index: 10, kind: input, shape index: {}]   ;;  %s6139_s11 = inlined_call_operand.vmem [shape: f32[32,128], index: 11, kind: input, shape index: {}]   ;;  %s6140_s12 = inlined_call_operand.vmem [shape: f32[32,128], index: 12, kind: input, shape index: {}]   ;;  %s6141_s13 = inlined_call_operand.vmem [shape: f32[1,128], index: 13, kind: input, shape index: {}]   ;;  %s6142_s14 = inlined_call_operand.vmem [shape: f32[32,8], index: 14, kind: input, shape index: {}]   ;;  %s6143_s15 = inlined_call_operand.vmem [shape: f32[1,8], index: 15, kind: input, shape index: {}]   ;;  %s6144_s16 = inlined_call_operand.vmem [shape: f32[8,8], index: 16, kind: output, shape index: {}]  }
   0x1   :  { %6146 = sst [smem:[#allocation4_spill]] %s6128_s3  ;;  %4832 = vmatprep.subr.bf16.mxu1 %v5307_v0  ;;  %v61_v3 = vld [vmem:[%s6129_s2] sm:$0xf]  ;;  %v54_v6 = vld [vmem:[%s6130_s0 + $0x8] sm:$0xff]  ;;  %v5309_v8 = vmov 0.0   ;;  %vm216_vm3 = vcmask 261120  }
   0x2   :  { %s6147_s23 = sld [smem:[#allocation4_spill]]  ;;  %4401 = vmatprep.subr.msk.mxu0 %vm94_vm0, %v61_v3  ;;  %v53_v5 = vld [vmem:[%s6130_s0] sm:$0xff]  ;;  %4423 = vmatprep.mubr.msk.f32.mxu1 %vm5308_vm2, %v5309_v8  ;;  %v55_v46 = vld [vmem:[%s6130_s0 + $0x10] sm:$0xff]  ;;  %v56_v47 = vld [vmem:[%s6130_s0 + $0x18] sm:$0xff]  ;;  %vm4088_vm4 = vcmask 64512  }
   0x3   :  { %4402 = vmatpush3.msk.msra.mxu0 %vm94_vm0, %v61_v3  ;;  %4403 = vmatprep.mubr.msk.f32.mxu0 %vm69_vm1, %v53_v5  ;;  %v5448_v12 = vld [vmem:[%s6131_s4] ss:$0 sm:$0xff]  ;;  %s5311_s4 = smov 32   ;;  %v58_v49 = vld [vmem:[%s6130_s0 + $0x28] sm:$0xff]  ;;  %v59_v50 = vld [vmem:[%s6130_s0 + $0x30] sm:$0xff] }
   0x4   :  { %4404 = vmatmul.mubr.msk.f32.vlgmr.msra.gmra.mrb[0].mxu0 %vm69_vm1, %v54_v6  ;;  %4844 = vmatprep.subr.bf16.mxu0 %v5307_v0  ;;  %v57_v48 = vld [vmem:[%s6130_s0 + $0x20] sm:$0xff]  ;;  %v60_v51 = vld [vmem:[%s6130_s0 + $0x38] sm:$0xff] }
   0x5   :  { %4406 = vmatprep.mubr.msk.f32.mxu0 %vm69_vm1, %v55_v46 }
   0x8   :  { %v211_v1 = vld [vmem:[%s6147_s23] sm:$0xff]  ;;  %v212_v2 = vld [vmem:[%s6147_s23 + $0x8] sm:$0xff]  ;;  %v213_v7 = vld [vmem:[%s6147_s23 + $0x10] sm:$0xff]  ;;  %4407 = vmatmul.mubr.msk.f32.gmra.mrb[2].mxu0 %vm69_vm1, %v56_v47 }
   0x9   :  { %v5407_v4 = vpack.c.bf16 %v212_v2, %v211_v1  ;;  %v214_v9 = vld [vmem:[%s6147_s23 + $0x18] sm:$0xff]  ;;  %4409 = vmatprep.mubr.msk.f32.mxu0 %vm69_vm1, %v57_v48 }
   0xa   :  { %v5428_v10 = vpack.c.bf16 %v214_v9, %v213_v7 }
   0xb   :  { %4834 = vmatpush3.bf16.msra.mxu1 %v5407_v4  ;;  %4846 = vmatpush3.bf16.msra.mxu0 %v5407_v4 }
   0xc   :  { %4835 = vmatprep.subr.bf16.mxu1 %v5307_v0  ;;  %4847 = vmatprep.subr.bf16.mxu0 %v5307_v0 }
   0xd   :  { %4410 = vmatmul.mubr.msk.f32.gmra.mrb[4].mxu0 %vm69_vm1, %v58_v49 }
   0xe   :  { %4412 = vmatprep.mubr.msk.f32.mxu0 %vm69_vm1, %v59_v50 }
   0xf   :  { %4837 = vmatpush3.bf16.msra.mxu1 %v5428_v10  ;;  %4849 = vmatpush3.bf16.msra.mxu0 %v5428_v10 }
  0x10   :  { %4838 = vmatprep.subr.bf16.mxu1 %v5307_v0  ;;  %4856 = vmatprep.subr.bf16.mxu0 %v5307_v0 }
  0x11   :  { %4413 = vmatmul.mubr.msk.f32.gmra.mrb[6].mxu0 %vm69_vm1, %v60_v51 }
  0x12   :  { %4424 = vmatmul.mubr.f32.vlgmr.msra.gmra.mrb[0].mxu1 %v5309_v8  ;;  %4445 = vmatprep.mubr.msk.f32.mxu0 %vm5308_vm2, %v5309_v8 }
  0x13   :  { %4840 = vmatpush3.bf16.msra.mxu1 %v5407_v4  ;;  %4434 = vmatprep.mubr.msk.f32.mxu1 %vm5308_vm2, %v5309_v8 }
  0x14   :  { %4841 = vmatprep.subr.bf16.mxu1 %v5307_v0 }
  0x17   :  { %4843 = vmatpush3.bf16.msra.mxu1 %v5428_v10 }
  0x18   :  { %4850 = vmatprep.subr.bf16.mxu1 %v5307_v0 }
  0xd7   :  { %v4405_v11 = vpop.f32.mrb[0].mxu0 }
  0xd8   :  { %v164_v13 = vpop.f32.mrb[1].mxu0  ;;  %v170_v32 = vadd.f32 %v4405_v11, %v5448_v12 }
  0xd9   :  { %v165_v14 = vadd.f32 %v5448_v12, %v164_v13 }
  0xdb   :  { %v4408_v55 = vpop.f32.mrb[2].mxu0 }
  0xdc   :  { %v174_v56 = vpop.f32.mrb[3].mxu0 }
  0xdd   :  { %v175_v62 = vadd.f32 %v5448_v12, %v174_v56 }
  0xe0   :  { %v5494_v57 = vpop.f32.mrb[4].mxu0 }
  0xe1   :  { %v5496_v58 = vpop.f32.mrb[5].mxu0 }
  0xe4   :  { %v5498_v59 = vpop.f32.mrb[6].mxu0 }
  0xe5   :  { %v286_v15 = vpop.f32.mrb[0].mxu1  ;;  %v5500_v60 = vpop.f32.mrb[7].mxu0 }
  0xe6   :  { %v290_v16 = vadd.f32 %v286_v15, %v165_v14  ;;  %v4425_v17 = vpop.f32.mrb[1].mxu1 }
  0xe8   :  { %5051 = vtanh.f32 %v290_v16  ;;  %v4104_v19 = vmul.f32 -1.442695, %v290_v16 }
  0xea   :  { %5053 = vpow2.f32 %v4104_v19 }
  0xf2   :  { %v5052_v18 = vpop.eup %5051 }
  0xf3   :  { %300 = vrot.lane.b32.xlu0 %v5052_v18, %s5310_s22 }
  0xf4   :  { %v5054_v20 = vpop.eup %5053 }
  0xf5   :  { %v294_v21 = vadd.f32 1.0, %v5054_v20 }
  0xf7   :  { %5055 = vrcp.f32 %v294_v21  ;;  %v180_v21 = vadd.f32 %v4408_v55, %v5448_v12 }
 0x101   :  { %v5056_v22 = vpop.eup %5055 }
 0x102   :  { %v298_v25 = vmul.f32 0.0, %v5056_v22 }
 0x165   :  { %v301_v23 = vpop.permute.xlu0 %300 }
 0x166   :  { %v303_v24 = vmul.f32 %v5056_v22, %v301_v23 }
 0x168   :  { %305 = vrot.lane.b32.xlu0 %v303_v24, %s5311_s4 }
 0x1da   :  { %v306_v26 = vpop.permute.xlu0 %305 }
 0x1db   :  { %v308_v27 = vadd.f32 %v306_v26, %v298_v25 }
 0x1dd   :  { %5057 = vtanh.f32 %v308_v27 }
 0x1e7   :  { %v5058_v28 = vpop.eup %5057 }
 0x1e8   :  { %311 = vrot.lane.b32.xlu1 %v5058_v28, %s5310_s22 }
 0x25a   :  { %v312_v29 = vpop.permute.xlu1 %311 }
 0x25b   :  { %v314_v30 = vmul.f32 %v5056_v22, %v312_v29 }
 0x25d   :  { %316 = vrot.lane.b32.xlu1 %v314_v30, %s5311_s4 }
 0x2cf   :  { %v317_v31 = vpop.permute.xlu1 %316 }
 0x2d0   :  { %319 = vst.msk [vmem:[#allocation3] sm:$0xff] %vm216_vm3, %v317_v31  ;;  %4435 = vmatmul.mubr.msk.f32.vlgmr.msra.gmra.mrb[2].mxu1 %vm216_vm3, %v317_v31 }
 0x2d1   :  { %4852 = vmatpush3.bf16.msra.mxu1 %v5407_v4  ;;  %4456 = vmatprep.mubr.msk.f32.mxu1 %vm5308_vm2, %v5309_v8 }
 0x2d2   :  { %4853 = vmatprep.subr.bf16.mxu1 %v5307_v0 }
 0x2d5   :  { %4855 = vmatpush3.bf16.msra.mxu1 %v5428_v10 }
 0x2d6   :  { %4862 = vmatprep.subr.bf16.mxu1 %v5307_v0 }
 0x3a3   :  { %v390_v33 = vpop.f32.mrb[2].mxu1 }
 0x3a4   :  { %v394_v34 = vadd.f32 %v390_v33, %v170_v32  ;;  %v4436_v35 = vpop.f32.mrb[3].mxu1 }
 0x3a6   :  { %5059 = vtanh.f32 %v394_v34  ;;  %v4106_v37 = vmul.f32 -1.442695, %v394_v34 }
 0x3a8   :  { %5061 = vpow2.f32 %v4106_v37 }
 0x3b0   :  { %v5060_v36 = vpop.eup %5059 }
 0x3b1   :  { %404 = vrot.lane.b32.xlu0 %v5060_v36, %s5310_s22 }
 0x3b2   :  { %v5062_v38 = vpop.eup %5061 }
 0x3b3   :  { %v398_v39 = vadd.f32 1.0, %v5062_v38 }
 0x3b5   :  { %5063 = vrcp.f32 %v398_v39  ;;  %v185_v39 = vadd.f32 %v5448_v12, %v5496_v58  ;;  %v190_v58 = vadd.f32 %v5494_v57, %v5448_v12 }
 0x3bf   :  { %v5064_v40 = vpop.eup %5063 }
 0x3c0   :  { %v402_v43 = vmul.f32 %v5064_v40, %v308_v27 }
 0x423   :  { %v405_v41 = vpop.permute.xlu0 %404 }
 0x424   :  { %v407_v42 = vmul.f32 %v5064_v40, %v405_v41 }
 0x426   :  { %409 = vrot.lane.b32.xlu1 %v407_v42, %s5311_s4 }
 0x498   :  { %v410_v44 = vpop.permute.xlu1 %409 }
 0x499   :  { %v412_v45 = vadd.f32 %v410_v44, %v402_v43 }
 0x49b   :  { %5065 = vtanh.f32 %v412_v45 }
 0x4a5   :  { %v5066_v52 = vpop.eup %5065 }
 0x4a6   :  { %415 = vrot.lane.b32.xlu0 %v5066_v52, %s5310_s22 }
 0x518   :  { %v416_v53 = vpop.permute.xlu0 %415 }
 0x519   :  { %v418_v54 = vmul.f32 %v5064_v40, %v416_v53 }
 0x51b   :  { %420 = vrot.lane.b32.xlu1 %v418_v54, %s5311_s4 }
 0x58d   :  { %v421_v61 = vpop.permute.xlu1 %420 }
 0x58e   :  { %424 = vst.msk [vmem:[#allocation3 + $0x8] sm:$0xff] %vm216_vm3, %v421_v61  ;;  %4446 = vmatmul.mubr.msk.f32.vlgmr.msra.gmra.mrb[8].mxu0 %vm216_vm3, %v421_v61 }
 0x58f   :  { %4858 = vmatpush3.bf16.msra.mxu0 %v5407_v4  ;;  %4467 = vmatprep.mubr.msk.f32.mxu0 %vm5308_vm2, %v5309_v8 }
 0x590   :  { %4859 = vmatprep.subr.bf16.mxu0 %v5307_v0 }
 0x593   :  { %4861 = vmatpush3.bf16.msra.mxu0 %v5428_v10 }
 0x594   :  { %4868 = vmatprep.subr.bf16.mxu0 %v5307_v0 }
 0x661   :  { %v495_v63 = vpop.f32.mrb[8].mxu0 }
 0x662   :  { %v499_v1 = vadd.f32 %v495_v63, %v175_v62  ;;  %v4447_v2 = vpop.f32.mrb[9].mxu0 }
 0x664   :  { %5067 = vtanh.f32 %v499_v1  ;;  %v4108_v5 = vmul.f32 -1.442695, %v499_v1 }
 0x666   :  { %5069 = vpow2.f32 %v4108_v5 }
 0x66e   :  { %v5068_v3 = vpop.eup %5067 }
 0x66f   :  { %509 = vrot.lane.b32.xlu0 %v5068_v3, %s5310_s22 }
 0x670   :  { %v5070_v6 = vpop.eup %5069 }
 0x671   :  { %v503_v7 = vadd.f32 1.0, %v5070_v6 }
 0x673   :  { %5071 = vrcp.f32 %v503_v7 }
 0x67d   :  { %v5072_v9 = vpop.eup %5071 }
 0x67e   :  { %v507_v14 = vmul.f32 %v5072_v9, %v412_v45 }
 0x6e1   :  { %v510_v11 = vpop.permute.xlu0 %509 }
 0x6e2   :  { %v512_v13 = vmul.f32 %v5072_v9, %v510_v11  ;;  %v1063_v11 = vld [vmem:[%s6132_s5] sm:$0xff] }
 0x6e4   :  { %514 = vrot.lane.b32.xlu1 %v512_v13, %s5311_s4  ;;  %v1064_v13 = vld [vmem:[%s6132_s5 + $0x8] sm:$0xff] }
 0x756   :  { %v515_v15 = vpop.permute.xlu1 %514 }
 0x757   :  { %v517_v16 = vadd.f32 %v515_v15, %v507_v14  ;;  %v4880_v14 = vpack.c.bf16 %v1064_v13, %v1063_v11 }
 0x759   :  { %5073 = vtanh.f32 %v517_v16 }
 0x763   :  { %v5074_v17 = vpop.eup %5073 }
 0x764   :  { %520 = vrot.lane.b32.xlu0 %v5074_v17, %s5310_s22 }
 0x7d6   :  { %v521_v18 = vpop.permute.xlu0 %520 }
 0x7d7   :  { %v523_v19 = vmul.f32 %v5072_v9, %v521_v18  ;;  %v1065_v18 = vld [vmem:[%s6132_s5 + $0x10] sm:$0xff] }
 0x7d9   :  { %525 = vrot.lane.b32.xlu1 %v523_v19, %s5311_s4  ;;  %v1066_v19 = vld [vmem:[%s6132_s5 + $0x18] sm:$0xff] }
 0x84b   :  { %v526_v20 = vpop.permute.xlu1 %525 }
 0x84c   :  { %529 = vst.msk [vmem:[#allocation3 + $0x10] sm:$0xff] %vm216_vm3, %v526_v20  ;;  %4457 = vmatmul.mubr.msk.f32.vlgmr.msra.gmra.mrb[4].mxu1 %vm216_vm3, %v526_v20  ;;  %v4884_v20 = vpack.c.bf16 %v1066_v19, %v1065_v18 }
 0x84d   :  { %4864 = vmatpush3.bf16.msra.mxu1 %v5407_v4  ;;  %4478 = vmatprep.mubr.msk.f32.mxu1 %vm5308_vm2, %v5309_v8 }
 0x84e   :  { %4865 = vmatprep.subr.bf16.mxu1 %v5307_v0 }
 0x851   :  { %4867 = vmatpush3.bf16.msra.mxu1 %v5428_v10 }
 0x852   :  { %4874 = vmatprep.subr.bf16.mxu1 %v5307_v0 }
 0x91f   :  { %v600_v22 = vpop.f32.mrb[4].mxu1 }
 0x920   :  { %v604_v23 = vadd.f32 %v600_v22, %v180_v21  ;;  %v4458_v24 = vpop.f32.mrb[5].mxu1  ;;  %v1055_v22 = vld [vmem:[#allocation3] sm:$0xff] }
 0x921   :  { %v1057_v24 = vld [vmem:[#allocation3 + $0x10] sm:$0xff] }
 0x922   :  { %5075 = vtanh.f32 %v604_v23  ;;  %v4110_v26 = vmul.f32 -1.442695, %v604_v23  ;;  %v1056_v23 = vld [vmem:[#allocation3 + $0x8] sm:$0xff] }
 0x924   :  { %5077 = vpow2.f32 %v4110_v26 }
 0x92c   :  { %v5076_v25 = vpop.eup %5075 }
 0x92d   :  { %614 = vrot.lane.b32.xlu0 %v5076_v25, %s5310_s22 }
 0x92e   :  { %v5078_v27 = vpop.eup %5077 }
 0x92f   :  { %v608_v28 = vadd.f32 1.0, %v5078_v27 }
 0x931   :  { %5079 = vrcp.f32 %v608_v28  ;;  %v195_v28 = vadd.f32 %v5448_v12, %v5500_v60 }
 0x93b   :  { %v5080_v29 = vpop.eup %5079 }
 0x93c   :  { %v612_v32 = vmul.f32 %v5080_v29, %v517_v16 }
 0x99f   :  { %v615_v30 = vpop.permute.xlu0 %614 }
 0x9a0   :  { %v617_v31 = vmul.f32 %v5080_v29, %v615_v30 }
 0x9a2   :  { %619 = vrot.lane.b32.xlu1 %v617_v31, %s5311_s4 }
 0xa14   :  { %v620_v33 = vpop.permute.xlu1 %619 }
 0xa15   :  { %v622_v34 = vadd.f32 %v620_v33, %v612_v32 }
 0xa17   :  { %5081 = vtanh.f32 %v622_v34 }
 0xa21   :  { %v5082_v35 = vpop.eup %5081 }
 0xa22   :  { %625 = vrot.lane.b32.xlu0 %v5082_v35, %s5310_s22 }
 0xa94   :  { %v626_v36 = vpop.permute.xlu0 %625 }
 0xa95   :  { %v628_v37 = vmul.f32 %v5080_v29, %v626_v36 }
 0xa97   :  { %630 = vrot.lane.b32.xlu1 %v628_v37, %s5311_s4 }
 0xb09   :  { %v631_v38 = vpop.permute.xlu1 %630 }
 0xb0a   :  { %634 = vst.msk [vmem:[#allocation3 + $0x18] sm:$0xff] %vm216_vm3, %v631_v38  ;;  %4468 = vmatmul.mubr.msk.f32.vlgmr.msra.gmra.mrb[10].mxu0 %vm216_vm3, %v631_v38 }
 0xb0b   :  { %4870 = vmatpush3.bf16.msra.mxu0 %v5407_v4  ;;  %4489 = vmatprep.mubr.msk.f32.mxu0 %vm5308_vm2, %v5309_v8 }
 0xb0c   :  { %4871 = vmatprep.subr.bf16.mxu0 %v5307_v0 }
 0xb0f   :  { %4873 = vmatpush3.bf16.msra.mxu0 %v5428_v10 }
 0xb10   :  { %4881 = vmatprep.subr.bf16.mxu0 %v4880_v14 }
 0xb11   :  { %v1058_v25 = vld [vmem:[#allocation3 + $0x18] sm:$0xff] }
 0xbdd   :  { %v705_v40 = vpop.f32.mrb[10].mxu0 }
 0xbde   :  { %v709_v41 = vadd.f32 %v705_v40, %v185_v39  ;;  %v4469_v42 = vpop.f32.mrb[11].mxu0 }
 0xbe0   :  { %5083 = vtanh.f32 %v709_v41  ;;  %v4112_v44 = vmul.f32 -1.442695, %v709_v41 }
 0xbe2   :  { %5085 = vpow2.f32 %v4112_v44 }
 0xbea   :  { %v5084_v43 = vpop.eup %5083 }
 0xbeb   :  { %719 = vrot.lane.b32.xlu0 %v5084_v43, %s5310_s22 }
 0xbec   :  { %v5086_v45 = vpop.eup %5085 }
 0xbed   :  { %v713_v46 = vadd.f32 1.0, %v5086_v45 }
 0xbef   :  { %5087 = vrcp.f32 %v713_v46 }
 0xbf9   :  { %v5088_v47 = vpop.eup %5087 }
 0xbfa   :  { %v717_v50 = vmul.f32 %v5088_v47, %v622_v34 }
 0xc5d   :  { %v720_v48 = vpop.permute.xlu0 %719 }
 0xc5e   :  { %v722_v49 = vmul.f32 %v5088_v47, %v720_v48  ;;  %v1211_v48 = vld [vmem:[%s6133_s6] sm:$0xff] }
 0xc60   :  { %724 = vrot.lane.b32.xlu1 %v722_v49, %s5311_s4  ;;  %v1212_v49 = vld [vmem:[%s6133_s6 + $0x8] sm:$0xff] }
 0xcd2   :  { %v725_v51 = vpop.permute.xlu1 %724 }
 0xcd3   :  { %v727_v52 = vadd.f32 %v725_v51, %v717_v50  ;;  %v5600_v50 = vpack.c.bf16 %v1212_v49, %v1211_v48  ;;  %v1213_v51 = vld [vmem:[%s6133_s6 + $0x10] sm:$0xff] }
 0xcd5   :  { %5089 = vtanh.f32 %v727_v52 }
 0xcdf   :  { %v5090_v53 = vpop.eup %5089 }
 0xce0   :  { %730 = vrot.lane.b32.xlu0 %v5090_v53, %s5310_s22 }
 0xd52   :  { %v731_v54 = vpop.permute.xlu0 %730 }
 0xd53   :  { %v733_v55 = vmul.f32 %v5088_v47, %v731_v54 }
 0xd55   :  { %735 = vrot.lane.b32.xlu1 %v733_v55, %s5311_s4 }
 0xdc7   :  { %v736_v56 = vpop.permute.xlu1 %735 }
 0xdc8   :  { %739 = vst.msk [vmem:[#allocation3 + $0x20] sm:$0xff] %vm216_vm3, %v736_v56  ;;  %4479 = vmatmul.mubr.msk.f32.vlgmr.msra.gmra.mrb[6].mxu1 %vm216_vm3, %v736_v56 }
 0xdc9   :  { %4876 = vmatpush3.bf16.msra.mxu1 %v5407_v4  ;;  %4500 = vmatprep.mubr.msk.f32.mxu1 %vm5308_vm2, %v5309_v8 }
 0xdca   :  { %4877 = vmatprep.subr.bf16.mxu1 %v5307_v0 }
 0xdcd   :  { %4879 = vmatpush3.bf16.msra.mxu1 %v5428_v10 }
 0xdce   :  { %4888 = vmatprep.subr.bf16.mxu1 %v5307_v0 }
 0xdcf   :  { %v1059_v26 = vld [vmem:[#allocation3 + $0x20] sm:$0xff] }
 0xe9b   :  { %v810_v61 = vpop.f32.mrb[6].mxu1 }
 0xe9c   :  { %v814_v62 = vadd.f32 %v810_v61, %v190_v58  ;;  %v4480_v63 = vpop.f32.mrb[7].mxu1  ;;  %v200_v61 = vadd.f32 %v5498_v59, %v5448_v12 }
 0xe9e   :  { %5091 = vtanh.f32 %v814_v62  ;;  %v4114_v4 = vmul.f32 -1.442695, %v814_v62 }
 0xea0   :  { %5093 = vpow2.f32 %v4114_v4  ;;  %v5636_v4 = vld [vmem:[%s6134_s7] ss:$0 sm:$0xff] }
 0xea8   :  { %v5092_v1 = vpop.eup %5091 }
 0xea9   :  { %824 = vrot.lane.b32.xlu0 %v5092_v1, %s5310_s22 }
 0xeaa   :  { %v5094_v2 = vpop.eup %5093 }
 0xeab   :  { %v818_v3 = vadd.f32 1.0, %v5094_v2 }
 0xead   :  { %5095 = vrcp.f32 %v818_v3 }
 0xeb7   :  { %v5096_v5 = vpop.eup %5095 }
 0xeb8   :  { %v822_v7 = vmul.f32 %v5096_v5, %v727_v52  ;;  %v1214_v52 = vld [vmem:[%s6133_s6 + $0x18] sm:$0xff] }
 0xeb9   :  { %v5610_v53 = vpack.c.bf16 %v1214_v52, %v1213_v51 }
 0xf1b   :  { %v825_v6 = vpop.permute.xlu0 %824 }
 0xf1c   :  { %v827_v10 = vmul.f32 %v5096_v5, %v825_v6 }
 0xf1e   :  { %829 = vrot.lane.b32.xlu1 %v827_v10, %s5311_s4 }
 0xf90   :  { %v830_v9 = vpop.permute.xlu1 %829 }
 0xf91   :  { %v832_v57 = vadd.f32 %v830_v9, %v822_v7 }
 0xf93   :  { %5097 = vtanh.f32 %v832_v57 }
 0xf9d   :  { %v5098_v15 = vpop.eup %5097 }
 0xf9e   :  { %835 = vrot.lane.b32.xlu0 %v5098_v15, %s5310_s22 }
0x1010   :  { %v836_v16 = vpop.permute.xlu0 %835 }
0x1011   :  { %v838_v17 = vmul.f32 %v5096_v5, %v836_v16 }
0x1013   :  { %840 = vrot.lane.b32.xlu1 %v838_v17, %s5311_s4 }
0x1085   :  { %v841_v21 = vpop.permute.xlu1 %840 }
0x1086   :  { %844 = vst.msk [vmem:[#allocation3 + $0x28] sm:$0xff] %vm216_vm3, %v841_v21  ;;  %4490 = vmatmul.mubr.msk.f32.vlgmr.msra.gmra.mrb[12].mxu0 %vm216_vm3, %v841_v21 }
0x1087   :  { %4883 = vmatpush3.bf16.msra.mxu0 %v4880_v14  ;;  %4511 = vmatprep.mubr.msk.f32.mxu0 %vm216_vm3, %v1055_v22 }
0x1088   :  { %4885 = vmatprep.subr.bf16.mxu0 %v4884_v20 }
0x108b   :  { %4887 = vmatpush3.bf16.msra.mxu0 %v4884_v20 }
0x108c   :  { %4900 = vmatprep.subr.bf16.mxu0 %v5307_v0 }
0x108d   :  { %v1060_v27 = vld [vmem:[#allocation3 + $0x28] sm:$0xff] }
0x108e   :  { %4512 = vmatmul.mubr.msk.f32.vlgmr.msra.gmra.mrb[14].mxu0 %vm216_vm3, %v1056_v23 }
0x108f   :  { %4514 = vmatprep.mubr.msk.f32.mxu0 %vm216_vm3, %v1057_v24  ;;  %4902 = vmatpush3.bf16.msra.mxu0 %v5600_v50 }
0x1090   :  { %4903 = vmatprep.subr.bf16.mxu0 %v5307_v0 }
0x1092   :  { %4515 = vmatmul.mubr.msk.f32.gmra.mrb[16].mxu0 %vm216_vm3, %v1058_v25 }
0x1093   :  { %4517 = vmatprep.mubr.msk.f32.mxu0 %vm216_vm3, %v1059_v26  ;;  %4905 = vmatpush3.bf16.msra.mxu0 %v5610_v53 }
0x1094   :  { %4912 = vmatprep.subr.bf16.mxu0 %v5307_v0 }
0x1096   :  { %4518 = vmatmul.mubr.msk.f32.gmra.mrb[18].mxu0 %vm216_vm3, %v1060_v27 }
0x1159   :  { %v915_v29 = vpop.f32.mrb[12].mxu0 }
0x115a   :  { %v919_v30 = vadd.f32 %v915_v29, %v195_v28  ;;  %v4491_v31 = vpop.f32.mrb[13].mxu0 }
0x115c   :  { %5099 = vtanh.f32 %v919_v30  ;;  %v4116_v39 = vmul.f32 -1.442695, %v919_v30 }
0x115e   :  { %5101 = vpow2.f32 %v4116_v39 }
0x1161   :  { %v5578_v32 = vpop.f32.mrb[14].mxu0 }
0x1162   :  { %v1164_v33 = vpop.f32.mrb[15].mxu0 }
0x1163   :  { %v1165_v2 = vadd.f32 %v5636_v4, %v1164_v33 }
0x1165   :  { %v5580_v34 = vpop.f32.mrb[16].mxu0 }
0x1166   :  { %v5100_v35 = vpop.eup %5099  ;;  %v5582_v36 = vpop.f32.mrb[17].mxu0 }
0x1167   :  { %929 = vrot.lane.b32.xlu0 %v5100_v35, %s5310_s22  ;;  %v1170_v35 = vadd.f32 %v5578_v32, %v5636_v4 }
0x1168   :  { %v5102_v60 = vpop.eup %5101 }
0x1169   :  { %v5585_v37 = vpop.f32.mrb[18].mxu0  ;;  %v923_v40 = vadd.f32 1.0, %v5102_v60 }
0x116a   :  { %v5587_v38 = vpop.f32.mrb[19].mxu0 }
0x116b   :  { %5103 = vrcp.f32 %v923_v40 }
0x1175   :  { %v5104_v41 = vpop.eup %5103 }
0x1176   :  { %v927_v44 = vmul.f32 %v5104_v41, %v832_v57 }
0x11d9   :  { %v930_v42 = vpop.permute.xlu0 %929 }
0x11da   :  { %v932_v43 = vmul.f32 %v5104_v41, %v930_v42 }
0x11dc   :  { %934 = vrot.lane.b32.xlu1 %v932_v43, %s5311_s4 }
0x124e   :  { %v935_v45 = vpop.permute.xlu1 %934 }
0x124f   :  { %v5590_v46 = vadd.f32 %v935_v45, %v927_v44 }
0x1251   :  { %5105 = vtanh.f32 %v5590_v46 }
0x125b   :  { %v5106_v47 = vpop.eup %5105 }
0x125c   :  { %940 = vrot.lane.b32.xlu0 %v5106_v47, %s5310_s22 }
0x12ce   :  { %v941_v54 = vpop.permute.xlu0 %940 }
0x12cf   :  { %v943_v55 = vmul.f32 %v5104_v41, %v941_v54 }
0x12d1   :  { %945 = vrot.lane.b32.xlu1 %v943_v55, %s5311_s4 }
0x1343   :  { %v946_v56 = vpop.permute.xlu1 %945 }
0x1344   :  { %949 = vst.msk [vmem:[#allocation3 + $0x30] sm:$0xff] %vm216_vm3, %v946_v56  ;;  %4501 = vmatmul.mubr.msk.f32.vlgmr.msra.gmra.mrb[8].mxu1 %vm216_vm3, %v946_v56 }
0x1345   :  { %4890 = vmatpush3.bf16.msra.mxu1 %v5600_v50  ;;  %4531 = vmatprep.mubr.msk.f32.mxu1 %vm5308_vm2, %v5309_v8 }
0x1346   :  { %4891 = vmatprep.subr.bf16.mxu1 %v5307_v0 }
0x1349   :  { %4893 = vmatpush3.bf16.msra.mxu1 %v5610_v53 }
0x134a   :  { %4894 = vmatprep.subr.bf16.mxu1 %v5307_v0 }
0x134b   :  { %v1061_v58 = vld [vmem:[#allocation3 + $0x30] sm:$0xff] }
0x134c   :  { %4532 = vmatmul.mubr.f32.vlgmr.msra.gmra.mrb[10].mxu1 %v5309_v8  ;;  %4520 = vmatprep.mubr.msk.f32.mxu0 %vm216_vm3, %v1061_v58 }
0x134d   :  { %4896 = vmatpush3.bf16.msra.mxu1 %v5600_v50  ;;  %4542 = vmatprep.mubr.msk.f32.mxu1 %vm5308_vm2, %v5309_v8 }
0x134e   :  { %4897 = vmatprep.subr.bf16.mxu1 %v5307_v0 }
0x1351   :  { %4899 = vmatpush3.bf16.msra.mxu1 %v5610_v53 }
0x1352   :  { %4906 = vmatprep.subr.bf16.mxu1 %v5307_v0 }
0x1417   :  { %v1020_v62 = vpop.f32.mrb[8].mxu1 }
0x1418   :  { %v1024_v63 = vadd.f32 %v1020_v62, %v200_v61  ;;  %v4502_v1 = vpop.f32.mrb[9].mxu1 }
0x141a   :  { %v4118_v18 = vmul.f32 -1.442695, %v1024_v63 }
0x141f   :  { %v1282_v3 = vpop.f32.mrb[10].mxu1 }
0x1420   :  { %v1286_v5 = vadd.f32 %v1282_v3, %v1165_v2  ;;  %v4533_v6 = vpop.f32.mrb[11].mxu1 }
0x1422   :  { %5107 = vtanh.f32 %v1286_v5  ;;  %v4128_v7 = vmul.f32 -1.442695, %v1286_v5 }
0x1424   :  { %5109 = vpow2.f32 %v4128_v7 }
0x142c   :  { %v5108_v10 = vpop.eup %5107 }
0x142d   :  { %1296 = vrot.lane.b32.xlu0 %v5108_v10, %s5310_s22 }
0x142e   :  { %v5110_v12 = vpop.eup %5109 }
0x142f   :  { %v1290_v59 = vadd.f32 1.0, %v5110_v12 }
0x1431   :  { %5111 = vrcp.f32 %v1290_v59 }
0x143b   :  { %v5112_v9 = vpop.eup %5111 }
0x143c   :  { %v1294_v13 = vmul.f32 0.0, %v5112_v9 }
0x149f   :  { %v1297_v57 = vpop.permute.xlu0 %1296 }
0x14a0   :  { %v1299_v11 = vmul.f32 %v5112_v9, %v1297_v57 }
0x14a2   :  { %1301 = vrot.lane.b32.xlu1 %v1299_v11, %s5311_s4 }
0x1514   :  { %v1302_v14 = vpop.permute.xlu1 %1301 }
0x1515   :  { %v1304_v15 = vadd.f32 %v1302_v14, %v1294_v13 }
0x1517   :  { %5113 = vtanh.f32 %v1304_v15 }
0x1518   :  { %5115 = vtanh.f32 %v1024_v63  ;;  %v1175_v63 = vadd.f32 %v5636_v4, %v5582_v36 }
0x1519   :  { %5117 = vpow2.f32 %v4118_v18 }
0x1521   :  { %v5114_v16 = vpop.eup %5113 }
0x1522   :  { %1307 = vrot.lane.b32.xlu0 %v5114_v16, %s5310_s22  ;;  %v5116_v17 = vpop.eup %5115 }
0x1523   :  { %v5118_v19 = vpop.eup %5117 }
0x1524   :  { %v1028_v20 = vadd.f32 1.0, %v5118_v19 }
0x1526   :  { %1034 = vrot.lane.b32.xlu0 %v5116_v17, %s5310_s22  ;;  %5119 = vrcp.f32 %v1028_v20  ;;  %v1180_v17 = vadd.f32 %v5580_v34, %v5636_v4 }
0x1530   :  { %v5120_v23 = vpop.eup %5119 }
0x1531   :  { %v1032_v27 = vmul.f32 %v5120_v23, %v5590_v46 }
0x1594   :  { %v1308_v21 = vpop.permute.xlu0 %1307 }
0x1595   :  { %v1310_v22 = vmul.f32 %v5112_v9, %v1308_v21 }
0x1597   :  { %1312 = vrot.lane.b32.xlu1 %v1310_v22, %s5311_s4 }
0x1598   :  { %v1035_v24 = vpop.permute.xlu0 %1034 }
0x1599   :  { %v1037_v25 = vmul.f32 %v5120_v23, %v1035_v24 }
0x159b   :  { %1039 = vrot.lane.b32.xlu0 %v1037_v25, %s5311_s4 }
0x1609   :  { %v1313_v26 = vpop.permute.xlu1 %1312 }
0x160a   :  { %1315 = vst.msk [vmem:[#allocation3] sm:$0xff] %vm216_vm3, %v1313_v26  ;;  %4543 = vmatmul.mubr.msk.f32.vlgmr.msra.gmra.mrb[12].mxu1 %vm216_vm3, %v1313_v26 }
0x160b   :  { %4908 = vmatpush3.bf16.msra.mxu1 %v5600_v50  ;;  %4564 = vmatprep.mubr.msk.f32.mxu1 %vm5308_vm2, %v5309_v8 }
0x160c   :  { %4909 = vmatprep.subr.bf16.mxu1 %v5307_v0 }
0x160d   :  { %v1040_v28 = vpop.permute.xlu0 %1039 }
0x160e   :  { %v1042_v29 = vadd.f32 %v1040_v28, %v1032_v27 }
0x160f   :  { %4911 = vmatpush3.bf16.msra.mxu1 %v5610_v53 }
0x1610   :  { %5121 = vtanh.f32 %v1042_v29  ;;  %4918 = vmatprep.subr.bf16.mxu1 %v5307_v0 }
0x161a   :  { %v5122_v30 = vpop.eup %5121 }
0x161b   :  { %1045 = vrot.lane.b32.xlu0 %v5122_v30, %s5310_s22 }
0x168d   :  { %v1046_v31 = vpop.permute.xlu0 %1045 }
0x168e   :  { %v1048_v33 = vmul.f32 %v5120_v23, %v1046_v31 }
0x1690   :  { %1050 = vrot.lane.b32.xlu0 %v1048_v33, %s5311_s4 }
0x16dd   :  { %v1385_v39 = vpop.f32.mrb[12].mxu1 }
0x16de   :  { %v1389_v60 = vadd.f32 %v1385_v39, %v1170_v35  ;;  %v4544_v40 = vpop.f32.mrb[13].mxu1  ;;  %v1185_v39 = vadd.f32 %v5636_v4, %v5587_v38 }
0x16e0   :  { %5123 = vtanh.f32 %v1389_v60  ;;  %v4130_v44 = vmul.f32 -1.442695, %v1389_v60 }
0x16e2   :  { %5125 = vpow2.f32 %v4130_v44 }
0x16ea   :  { %v5124_v41 = vpop.eup %5123 }
0x16eb   :  { %1399 = vrot.lane.b32.xlu1 %v5124_v41, %s5310_s22 }
0x16ec   :  { %v5126_v45 = vpop.eup %5125 }
0x16ed   :  { %v1393_v32 = vadd.f32 1.0, %v5126_v45 }
0x16ef   :  { %5127 = vrcp.f32 %v1393_v32 }
0x16f9   :  { %v5128_v46 = vpop.eup %5127 }
0x16fa   :  { %v1397_v49 = vmul.f32 %v5128_v46, %v1304_v15 }
0x1702   :  { %v1051_v42 = vpop.permute.xlu0 %1050 }
0x1703   :  { %1054 = vst.msk [vmem:[#allocation3 + $0x38] sm:$0xff] %vm216_vm3, %v1051_v42 }
0x170a   :  { %v1062_v43 = vld [vmem:[#allocation3 + $0x38] sm:$0xff] }
0x170b   :  { %4521 = vmatmul.mubr.msk.f32.gmra.mrb[20].mxu0 %vm216_vm3, %v1062_v43 }
0x170c   :  { %4553 = vmatprep.mubr.msk.f32.mxu0 %vm5308_vm2, %v5309_v8 }
0x175d   :  { %v1400_v47 = vpop.permute.xlu1 %1399 }
0x175e   :  { %v1402_v48 = vmul.f32 %v5128_v46, %v1400_v47 }
0x1760   :  { %1404 = vrot.lane.b32.xlu1 %v1402_v48, %s5311_s4 }
0x17d2   :  { %v1405_v51 = vpop.permute.xlu1 %1404 }
0x17d3   :  { %v1407_v52 = vadd.f32 %v1405_v51, %v1397_v49 }
0x17d5   :  { %5129 = vtanh.f32 %v1407_v52 }
0x17de   :  { %v5664_v54 = vpop.f32.mrb[20].mxu0 }
0x17df   :  { %v5130_v55 = vpop.eup %5129  ;;  %v5666_v56 = vpop.f32.mrb[21].mxu0 }
0x17e0   :  { %1410 = vrot.lane.b32.xlu1 %v5130_v55, %s5310_s22 }
0x1852   :  { %v1411_v58 = vpop.permute.xlu1 %1410 }
0x1853   :  { %v1413_v61 = vmul.f32 %v5128_v46, %v1411_v58 }
0x1855   :  { %1415 = vrot.lane.b32.xlu1 %v1413_v61, %s5311_s4  ;;  %v1190_v61 = vadd.f32 %v5585_v37, %v5636_v4 }
0x18c7   :  { %v1416_v62 = vpop.permute.xlu1 %1415 }
0x18c8   :  { %1418 = vst.msk [vmem:[#allocation3 + $0x8] sm:$0xff] %vm216_vm3, %v1416_v62  ;;  %4554 = vmatmul.mubr.msk.f32.vlgmr.msra.gmra.mrb[22].mxu0 %vm216_vm3, %v1416_v62 }
0x18c9   :  { %4914 = vmatpush3.bf16.msra.mxu0 %v5600_v50  ;;  %4575 = vmatprep.mubr.msk.f32.mxu0 %vm5308_vm2, %v5309_v8 }
0x18ca   :  { %4915 = vmatprep.subr.bf16.mxu0 %v5307_v0 }
0x18cd   :  { %4917 = vmatpush3.bf16.msra.mxu0 %v5610_v53 }
0x18ce   :  { %4924 = vmatprep.subr.bf16.mxu0 %v5307_v0 }
0x199b   :  { %v1488_v1 = vpop.f32.mrb[22].mxu0 }
0x199c   :  { %v1492_v2 = vadd.f32 %v1488_v1, %v1175_v63  ;;  %v4555_v3 = vpop.f32.mrb[23].mxu0 }
0x199e   :  { %5131 = vtanh.f32 %v1492_v2  ;;  %v4132_v6 = vmul.f32 -1.442695, %v1492_v2 }
0x19a0   :  { %5133 = vpow2.f32 %v4132_v6 }
0x19a8   :  { %v5132_v5 = vpop.eup %5131 }
0x19a9   :  { %1502 = vrot.lane.b32.xlu0 %v5132_v5, %s5310_s22 }
0x19aa   :  { %v5134_v10 = vpop.eup %5133 }
0x19ab   :  { %v1496_v7 = vadd.f32 1.0, %v5134_v10 }
0x19ad   :  { %5135 = vrcp.f32 %v1496_v7 }
0x19b7   :  { %v5136_v12 = vpop.eup %5135 }
0x19b8   :  { %v1500_v57 = vmul.f32 %v5136_v12, %v1407_v52 }
0x1a1b   :  { %v1503_v59 = vpop.permute.xlu0 %1502 }
0x1a1c   :  { %v1505_v9 = vmul.f32 %v5136_v12, %v1503_v59 }
0x1a1e   :  { %1507 = vrot.lane.b32.xlu1 %v1505_v9, %s5311_s4 }
0x1a90   :  { %v1508_v11 = vpop.permute.xlu1 %1507 }
0x1a91   :  { %v1510_v36 = vadd.f32 %v1508_v11, %v1500_v57 }
0x1a93   :  { %5137 = vtanh.f32 %v1510_v36 }
0x1a9d   :  { %v5138_v13 = vpop.eup %5137 }
0x1a9e   :  { %1513 = vrot.lane.b32.xlu0 %v5138_v13, %s5310_s22 }
0x1b10   :  { %v1514_v14 = vpop.permute.xlu0 %1513 }
0x1b11   :  { %v1516_v15 = vmul.f32 %v5136_v12, %v1514_v14 }
0x1b13   :  { %1518 = vrot.lane.b32.xlu1 %v1516_v15, %s5311_s4 }
0x1b85   :  { %v1519_v16 = vpop.permute.xlu1 %1518 }
0x1b86   :  { %1521 = vst.msk [vmem:[#allocation3 + $0x10] sm:$0xff] %vm216_vm3, %v1519_v16  ;;  %4565 = vmatmul.mubr.msk.f32.vlgmr.msra.gmra.mrb[14].mxu1 %vm216_vm3, %v1519_v16 }
0x1b87   :  { %4920 = vmatpush3.bf16.msra.mxu1 %v5600_v50  ;;  %4586 = vmatprep.mubr.msk.f32.mxu1 %vm5308_vm2, %v5309_v8 }
0x1b88   :  { %4921 = vmatprep.subr.bf16.mxu1 %v5307_v0 }
0x1b8b   :  { %4923 = vmatpush3.bf16.msra.mxu1 %v5610_v53 }
0x1b8c   :  { %4930 = vmatprep.subr.bf16.mxu1 %v5307_v0 }
0x1c59   :  { %v1591_v18 = vpop.f32.mrb[14].mxu1 }
0x1c5a   :  { %v1595_v19 = vadd.f32 %v1591_v18, %v1180_v17  ;;  %v4566_v20 = vpop.f32.mrb[15].mxu1 }
0x1c5c   :  { %5139 = vtanh.f32 %v1595_v19  ;;  %v4134_v22 = vmul.f32 -1.442695, %v1595_v19 }
0x1c5e   :  { %5141 = vpow2.f32 %v4134_v22 }
0x1c66   :  { %v5140_v21 = vpop.eup %5139 }
0x1c67   :  { %1605 = vrot.lane.b32.xlu0 %v5140_v21, %s5310_s22 }
0x1c68   :  { %v5142_v23 = vpop.eup %5141 }
0x1c69   :  { %v1599_v24 = vadd.f32 1.0, %v5142_v23 }
0x1c6b   :  { %5143 = vrcp.f32 %v1599_v24 }
0x1c75   :  { %v5144_v25 = vpop.eup %5143 }
0x1c76   :  { %v1603_v28 = vmul.f32 %v5144_v25, %v1510_v36  ;;  %v1195_v36 = vadd.f32 %v5636_v4, %v5666_v56 }
0x1cd9   :  { %v1606_v26 = vpop.permute.xlu0 %1605 }
0x1cda   :  { %v1608_v27 = vmul.f32 %v5144_v25, %v1606_v26 }
0x1cdc   :  { %1610 = vrot.lane.b32.xlu1 %v1608_v27, %s5311_s4  ;;  %v2193_v27 = vld [vmem:[%s6136_s9] sm:$0xff] }
0x1d4e   :  { %v1611_v29 = vpop.permute.xlu1 %1610 }
0x1d4f   :  { %v1613_v34 = vadd.f32 %v1611_v29, %v1603_v28  ;;  %v2194_v28 = vld [vmem:[%s6136_s9 + $0x8] sm:$0xff]  ;;  %v2037_v29 = vld [vmem:[%s6137_s1] sm:$0xff] }
0x1d51   :  { %5145 = vtanh.f32 %v1613_v34 }
0x1d5b   :  { %v5146_v30 = vpop.eup %5145 }
0x1d5c   :  { %1616 = vrot.lane.b32.xlu0 %v5146_v30, %s5310_s22  ;;  %v5753_v30 = vpack.c.bf16 %v2194_v28, %v2193_v27 }
0x1dce   :  { %v1617_v31 = vpop.permute.xlu0 %1616 }
0x1dcf   :  { %v1619_v33 = vmul.f32 %v5144_v25, %v1617_v31  ;;  %v2045_v25 = vld [vmem:[%s6135_s8] sm:$0xf]  ;;  %v2195_v31 = vld [vmem:[%s6136_s9 + $0x10] sm:$0xff] }
0x1dd1   :  { %1621 = vrot.lane.b32.xlu1 %v1619_v33, %s5311_s4  ;;  %v2196_v33 = vld [vmem:[%s6136_s9 + $0x18] sm:$0xff] }
0x1e43   :  { %v1622_v35 = vpop.permute.xlu1 %1621 }
0x1e44   :  { %1624 = vst.msk [vmem:[#allocation3 + $0x18] sm:$0xff] %vm216_vm3, %v1622_v35  ;;  %4576 = vmatmul.mubr.msk.f32.vlgmr.msra.gmra.mrb[24].mxu0 %vm216_vm3, %v1622_v35  ;;  %v5765_v35 = vpack.c.bf16 %v2196_v33, %v2195_v31 }
0x1e45   :  { %4926 = vmatpush3.bf16.msra.mxu0 %v5600_v50  ;;  %4597 = vmatprep.mubr.msk.f32.mxu0 %vm5308_vm2, %v5309_v8 }
0x1e46   :  { %4927 = vmatprep.subr.bf16.mxu0 %v5307_v0 }
0x1e49   :  { %4929 = vmatpush3.bf16.msra.mxu0 %v5610_v53 }
0x1e4a   :  { %4611 = vmatprep.subr.msk.mxu0 %vm94_vm0, %v2045_v25 }
0x1f17   :  { %v1694_v60 = vpop.f32.mrb[24].mxu0 }
0x1f18   :  { %v1698_v40 = vadd.f32 %v1694_v60, %v1185_v39  ;;  %v4577_v41 = vpop.f32.mrb[25].mxu0 }
0x1f1a   :  { %5147 = vtanh.f32 %v1698_v40  ;;  %v4136_v43 = vmul.f32 -1.442695, %v1698_v40 }
0x1f1c   :  { %5149 = vpow2.f32 %v4136_v43  ;;  %v1200_v43 = vadd.f32 %v5664_v54, %v5636_v4 }
0x1f24   :  { %v5148_v42 = vpop.eup %5147 }
0x1f25   :  { %1708 = vrot.lane.b32.xlu0 %v5148_v42, %s5310_s22 }
0x1f26   :  { %v5150_v44 = vpop.eup %5149 }
0x1f27   :  { %v1702_v45 = vadd.f32 1.0, %v5150_v44 }
0x1f29   :  { %5151 = vrcp.f32 %v1702_v45 }
0x1f33   :  { %v5152_v32 = vpop.eup %5151 }
0x1f34   :  { %v1706_v48 = vmul.f32 %v5152_v32, %v1613_v34  ;;  %v2038_v34 = vld [vmem:[%s6137_s1 + $0x8] sm:$0xff] }
0x1f97   :  { %v1709_v46 = vpop.permute.xlu0 %1708 }
0x1f98   :  { %v1711_v47 = vmul.f32 %v5152_v32, %v1709_v46  ;;  %v5792_v46 = vld [vmem:[%s6138_s10] ss:$0 sm:$0xff] }
0x1f9a   :  { %1713 = vrot.lane.b32.xlu1 %v1711_v47, %s5311_s4 }
0x200c   :  { %v1714_v49 = vpop.permute.xlu1 %1713 }
0x200d   :  { %v1716_v38 = vadd.f32 %v1714_v49, %v1706_v48 }
0x200f   :  { %5153 = vtanh.f32 %v1716_v38 }
0x2019   :  { %v5154_v51 = vpop.eup %5153 }
0x201a   :  { %1719 = vrot.lane.b32.xlu0 %v5154_v51, %s5310_s22 }
0x208c   :  { %v1720_v52 = vpop.permute.xlu0 %1719 }
0x208d   :  { %v1722_v55 = vmul.f32 %v5152_v32, %v1720_v52 }
0x208f   :  { %1724 = vrot.lane.b32.xlu1 %v1722_v55, %s5311_s4 }
0x2101   :  { %v1725_v58 = vpop.permute.xlu1 %1724 }
0x2102   :  { %1727 = vst.msk [vmem:[#allocation3 + $0x20] sm:$0xff] %vm216_vm3, %v1725_v58  ;;  %4587 = vmatmul.mubr.msk.f32.vlgmr.msra.gmra.mrb[16].mxu1 %vm216_vm3, %v1725_v58 }
0x2103   :  { %4932 = vmatpush3.bf16.msra.mxu1 %v5600_v50  ;;  %4608 = vmatprep.mubr.msk.f32.mxu1 %vm5308_vm2, %v5309_v8 }
0x2104   :  { %4933 = vmatprep.subr.bf16.mxu1 %v5307_v0 }
0x2107   :  { %4935 = vmatpush3.bf16.msra.mxu1 %v5610_v53 }
0x2108   :  { %4936 = vmatprep.subr.bf16.mxu1 %v5307_v0 }
0x21d5   :  { %v1797_v62 = vpop.f32.mrb[16].mxu1 }
0x21d6   :  { %v1801_v63 = vadd.f32 %v1797_v62, %v1190_v61  ;;  %v4588_v1 = vpop.f32.mrb[17].mxu1 }
0x21d8   :  { %5155 = vtanh.f32 %v1801_v63  ;;  %v4138_v50 = vmul.f32 -1.442695, %v1801_v63 }
0x21da   :  { %5157 = vpow2.f32 %v4138_v50  ;;  %v2040_v50 = vld [vmem:[%s6137_s1 + $0x18] sm:$0xff] }
0x21e2   :  { %v5156_v2 = vpop.eup %5155 }
0x21e3   :  { %1811 = vrot.lane.b32.xlu0 %v5156_v2, %s5310_s22  ;;  %v2039_v2 = vld [vmem:[%s6137_s1 + $0x10] sm:$0xff] }
0x21e4   :  { %v5158_v3 = vpop.eup %5157 }
0x21e5   :  { %v1805_v5 = vadd.f32 1.0, %v5158_v3  ;;  %v2041_v3 = vld [vmem:[%s6137_s1 + $0x20] sm:$0xff] }
0x21e7   :  { %5159 = vrcp.f32 %v1805_v5  ;;  %v2042_v5 = vld [vmem:[%s6137_s1 + $0x28] sm:$0xff] }
0x21f1   :  { %v5160_v6 = vpop.eup %5159 }
0x21f2   :  { %v1809_v7 = vmul.f32 %v5160_v6, %v1716_v38 }
0x2255   :  { %v1812_v10 = vpop.permute.xlu0 %1811 }
0x2256   :  { %v1814_v53 = vmul.f32 %v5160_v6, %v1812_v10  ;;  %v2044_v10 = vld [vmem:[%s6137_s1 + $0x38] sm:$0xff] }
0x2258   :  { %1816 = vrot.lane.b32.xlu1 %v1814_v53, %s5311_s4 }
0x22ca   :  { %v1817_v12 = vpop.permute.xlu1 %1816 }
0x22cb   :  { %v1819_v37 = vadd.f32 %v1817_v12, %v1809_v7 }
0x22cd   :  { %5161 = vtanh.f32 %v1819_v37 }
0x22d7   :  { %v5162_v59 = vpop.eup %5161 }
0x22d8   :  { %1822 = vrot.lane.b32.xlu0 %v5162_v59, %s5310_s22 }
0x234a   :  { %v1823_v9 = vpop.permute.xlu0 %1822 }
0x234b   :  { %v1825_v57 = vmul.f32 %v5160_v6, %v1823_v9  ;;  %v2043_v6 = vld [vmem:[%s6137_s1 + $0x30] sm:$0xff] }
0x234d   :  { %1827 = vrot.lane.b32.xlu1 %v1825_v57, %s5311_s4 }
0x23bf   :  { %v1828_v11 = vpop.permute.xlu1 %1827 }
0x23c0   :  { %1830 = vst.msk [vmem:[#allocation3 + $0x28] sm:$0xff] %vm216_vm3, %v1828_v11  ;;  %4598 = vmatmul.mubr.msk.f32.vlgmr.msra.gmra.mrb[26].mxu0 %vm216_vm3, %v1828_v11 }
0x23c1   :  { %4612 = vmatpush3.msk.msra.mxu0 %vm94_vm0, %v2045_v25  ;;  %4613 = vmatprep.mubr.msk.f32.mxu0 %vm69_vm1, %v2037_v29 }
0x23c2   :  { %4942 = vmatprep.subr.bf16.mxu0 %v5307_v0 }
0x23c4   :  { %4614 = vmatmul.mubr.msk.f32.vlgmr.msra.gmra.mrb[28].mxu0 %vm69_vm1, %v2038_v34 }
0x23c5   :  { %4944 = vmatpush3.bf16.msra.mxu0 %v5753_v30  ;;  %4616 = vmatprep.mubr.msk.f32.mxu0 %vm69_vm1, %v2039_v2 }
0x23c6   :  { %4945 = vmatprep.subr.bf16.mxu0 %v5307_v0 }
0x23c8   :  { %4617 = vmatmul.mubr.msk.f32.gmra.mrb[30].mxu0 %vm69_vm1, %v2040_v50 }
0x23c9   :  { %4947 = vmatpush3.bf16.msra.mxu0 %v5765_v35  ;;  %4619 = vmatprep.mubr.msk.f32.mxu0 %vm69_vm1, %v2041_v3 }
0x23ca   :  { %4954 = vmatprep.subr.bf16.mxu0 %v5307_v0 }
0x23cc   :  { %4620 = vmatmul.mubr.msk.f32.gmra.mrb[32].mxu0 %vm69_vm1, %v2042_v5 }
0x23cd   :  { %4622 = vmatprep.mubr.msk.f32.mxu0 %vm69_vm1, %v2043_v6 }
0x23d0   :  { %4623 = vmatmul.mubr.msk.f32.gmra.mrb[34].mxu0 %vm69_vm1, %v2044_v10 }
0x23d1   :  { %4644 = vmatprep.mubr.msk.f32.mxu0 %vm5308_vm2, %v5309_v8 }
0x2493   :  { %v1900_v13 = vpop.f32.mrb[26].mxu0 }
0x2494   :  { %v1904_v14 = vadd.f32 %v1900_v13, %v1195_v36  ;;  %v4599_v15 = vpop.f32.mrb[27].mxu0 }
0x2496   :  { %5163 = vtanh.f32 %v1904_v14  ;;  %v4140_v17 = vmul.f32 -1.442695, %v1904_v14 }
0x2497   :  { %v4615_v41 = vpop.f32.mrb[28].mxu0 }
0x2498   :  { %5165 = vpow2.f32 %v4140_v17  ;;  %v2146_v42 = vpop.f32.mrb[29].mxu0  ;;  %v2152_v14 = vadd.f32 %v4615_v41, %v5792_v46 }
0x2499   :  { %v2147_v47 = vadd.f32 %v5792_v46, %v2146_v42 }
0x24a0   :  { %v5164_v16 = vpop.eup %5163 }
0x24a1   :  { %1914 = vrot.lane.b32.xlu0 %v5164_v16, %s5310_s22 }
0x24a2   :  { %v5166_v18 = vpop.eup %5165 }
0x24a3   :  { %v1908_v19 = vadd.f32 1.0, %v5166_v18 }
0x24a5   :  { %5167 = vrcp.f32 %v1908_v19 }
0x24af   :  { %v5168_v20 = vpop.eup %5167 }
0x24b0   :  { %v1912_v23 = vmul.f32 %v5168_v20, %v1819_v37  ;;  %v5825_v37 = vpop.f32.mrb[30].mxu0 }
0x24b1   :  { %v2156_v59 = vpop.f32.mrb[31].mxu0 }
0x24b2   :  { %v5827_v9 = vpop.f32.mrb[32].mxu0  ;;  %v2157_v33 = vadd.f32 %v5792_v46, %v2156_v59 }
0x24b3   :  { %v5829_v57 = vpop.f32.mrb[33].mxu0 }
0x24b4   :  { %v5831_v11 = vpop.f32.mrb[34].mxu0 }
0x24b5   :  { %v5833_v36 = vpop.f32.mrb[35].mxu0 }
0x2513   :  { %v1915_v21 = vpop.permute.xlu0 %1914 }
0x2514   :  { %v1917_v22 = vmul.f32 %v5168_v20, %v1915_v21 }
0x2516   :  { %1919 = vrot.lane.b32.xlu1 %v1917_v22, %s5311_s4 }
0x2588   :  { %v1920_v24 = vpop.permute.xlu1 %1919 }
0x2589   :  { %v5731_v56 = vadd.f32 %v1920_v24, %v1912_v23 }
0x258b   :  { %5169 = vtanh.f32 %v5731_v56 }
0x2595   :  { %v5170_v26 = vpop.eup %5169 }
0x2596   :  { %1925 = vrot.lane.b32.xlu0 %v5170_v26, %s5310_s22 }
0x2608   :  { %v1926_v39 = vpop.permute.xlu0 %1925 }
0x2609   :  { %v1928_v60 = vmul.f32 %v5168_v20, %v1926_v39 }
0x260b   :  { %1930 = vrot.lane.b32.xlu1 %v1928_v60, %s5311_s4 }
0x267d   :  { %v1931_v40 = vpop.permute.xlu1 %1930 }
0x267e   :  { %1933 = vst.msk [vmem:[#allocation3 + $0x30] sm:$0xff] %vm216_vm3, %v1931_v40  ;;  %4609 = vmatmul.mubr.msk.f32.vlgmr.msra.gmra.mrb[18].mxu1 %vm216_vm3, %v1931_v40 }
0x267f   :  { %4938 = vmatpush3.bf16.msra.mxu1 %v5753_v30  ;;  %4633 = vmatprep.mubr.msk.f32.mxu1 %vm5308_vm2, %v5309_v8 }
0x2680   :  { %4939 = vmatprep.subr.bf16.mxu1 %v5307_v0 }
0x2683   :  { %4941 = vmatpush3.bf16.msra.mxu1 %v5765_v35 }
0x2684   :  { %4948 = vmatprep.subr.bf16.mxu1 %v5307_v0 }
0x2686   :  { %4634 = vmatmul.mubr.f32.vlgmr.msra.gmra.mrb[20].mxu1 %v5309_v8 }
0x2687   :  { %4950 = vmatpush3.bf16.msra.mxu1 %v5753_v30  ;;  %4655 = vmatprep.mubr.msk.f32.mxu1 %vm5308_vm2, %v5309_v8 }
0x2688   :  { %4951 = vmatprep.subr.bf16.mxu1 %v5307_v0 }
0x268b   :  { %4953 = vmatpush3.bf16.msra.mxu1 %v5765_v35 }
0x268c   :  { %4960 = vmatprep.subr.bf16.mxu1 %v5307_v0 }
0x2751   :  { %v2003_v44 = vpop.f32.mrb[18].mxu1 }
0x2752   :  { %v5787_v45 = vadd.f32 %v2003_v44, %v1200_v43  ;;  %v4610_v32 = vpop.f32.mrb[19].mxu1 }
0x2759   :  { %v2264_v48 = vpop.f32.mrb[20].mxu1 }
0x275a   :  { %v2268_v49 = vadd.f32 %v2264_v48, %v2147_v47  ;;  %v4635_v38 = vpop.f32.mrb[21].mxu1 }
0x275c   :  { %5171 = vtanh.f32 %v2268_v49  ;;  %v4153_v52 = vmul.f32 -1.442695, %v2268_v49 }
0x275e   :  { %5173 = vpow2.f32 %v4153_v52 }
0x2766   :  { %v5172_v51 = vpop.eup %5171 }
0x2767   :  { %2278 = vrot.lane.b32.xlu0 %v5172_v51, %s5310_s22 }
0x2768   :  { %v5174_v4 = vpop.eup %5173 }
0x2769   :  { %v2272_v54 = vadd.f32 1.0, %v5174_v4 }
0x276b   :  { %5175 = vrcp.f32 %v2272_v54 }
0x2775   :  { %v5176_v55 = vpop.eup %5175 }
0x2776   :  { %v2276_v62 = vmul.f32 0.0, %v5176_v55 }
0x27d9   :  { %v2279_v58 = vpop.permute.xlu0 %2278 }
0x27da   :  { %v2281_v61 = vmul.f32 %v5176_v55, %v2279_v58  ;;  %v2162_v58 = vadd.f32 %v5825_v37, %v5792_v46 }
0x27dc   :  { %2283 = vrot.lane.b32.xlu1 %v2281_v61, %s5311_s4 }
0x284e   :  { %v2284_v63 = vpop.permute.xlu1 %2283 }
0x284f   :  { %v2286_v1 = vadd.f32 %v2284_v63, %v2276_v62 }
0x2851   :  { %5177 = vtanh.f32 %v2286_v1 }
0x285b   :  { %v5178_v53 = vpop.eup %5177 }
0x285c   :  { %2289 = vrot.lane.b32.xlu0 %v5178_v53, %s5310_s22 }
0x28ce   :  { %v2290_v7 = vpop.permute.xlu0 %2289 }
0x28cf   :  { %v2292_v12 = vmul.f32 %v5176_v55, %v2290_v7 }
0x28d1   :  { %2294 = vrot.lane.b32.xlu1 %v2292_v12, %s5311_s4 }
0x2943   :  { %v2295_v13 = vpop.permute.xlu1 %2294 }
0x2944   :  { %2297 = vst.msk [vmem:[#allocation3] sm:$0xff] %vm216_vm3, %v2295_v13  ;;  %4645 = vmatmul.mubr.msk.f32.vlgmr.msra.gmra.mrb[36].mxu0 %vm216_vm3, %v2295_v13 }
0x2945   :  { %4956 = vmatpush3.bf16.msra.mxu0 %v5753_v30  ;;  %4666 = vmatprep.mubr.msk.f32.mxu0 %vm5308_vm2, %v5309_v8 }
0x2946   :  { %4957 = vmatprep.subr.bf16.mxu0 %v5307_v0 }
0x2949   :  { %4959 = vmatpush3.bf16.msra.mxu0 %v5765_v35 }
0x294a   :  { %4966 = vmatprep.subr.bf16.mxu0 %v5307_v0 }
0x2a17   :  { %v2367_v15 = vpop.f32.mrb[36].mxu0 }
0x2a18   :  { %v2371_v16 = vadd.f32 %v2367_v15, %v2152_v14  ;;  %v4646_v17 = vpop.f32.mrb[37].mxu0  ;;  %v2167_v15 = vadd.f32 %v5792_v46, %v5829_v57 }
0x2a1a   :  { %5179 = vtanh.f32 %v2371_v16  ;;  %v4155_v19 = vmul.f32 -1.442695, %v2371_v16 }
0x2a1c   :  { %5181 = vpow2.f32 %v4155_v19 }
0x2a24   :  { %v5180_v18 = vpop.eup %5179 }
0x2a25   :  { %2381 = vrot.lane.b32.xlu0 %v5180_v18, %s5310_s22 }
0x2a26   :  { %v5182_v20 = vpop.eup %5181 }
0x2a27   :  { %v2375_v21 = vadd.f32 1.0, %v5182_v20 }
0x2a29   :  { %5183 = vrcp.f32 %v2375_v21 }
0x2a33   :  { %v5184_v22 = vpop.eup %5183 }
0x2a34   :  { %v2379_v25 = vmul.f32 %v5184_v22, %v2286_v1 }
0x2a97   :  { %v2382_v23 = vpop.permute.xlu0 %2381 }
0x2a98   :  { %v2384_v24 = vmul.f32 %v5184_v22, %v2382_v23 }
0x2a9a   :  { %2386 = vrot.lane.b32.xlu1 %v2384_v24, %s5311_s4 }
0x2b0c   :  { %v2387_v26 = vpop.permute.xlu1 %2386 }
0x2b0d   :  { %v2389_v27 = vadd.f32 %v2387_v26, %v2379_v25 }
0x2b0f   :  { %5185 = vtanh.f32 %v2389_v27 }
0x2b19   :  { %v5186_v28 = vpop.eup %5185 }
0x2b1a   :  { %2392 = vrot.lane.b32.xlu0 %v5186_v28, %s5310_s22 }
0x2b8c   :  { %v2393_v29 = vpop.permute.xlu0 %2392 }
0x2b8d   :  { %v2395_v34 = vmul.f32 %v5184_v22, %v2393_v29 }
0x2b8f   :  { %2397 = vrot.lane.b32.xlu1 %v2395_v34, %s5311_s4 }
0x2c01   :  { %v2398_v31 = vpop.permute.xlu1 %2397 }
0x2c02   :  { %2400 = vst.msk [vmem:[#allocation3 + $0x8] sm:$0xff] %vm216_vm3, %v2398_v31  ;;  %4656 = vmatmul.mubr.msk.f32.vlgmr.msra.gmra.mrb[22].mxu1 %vm216_vm3, %v2398_v31 }
0x2c03   :  { %4962 = vmatpush3.bf16.msra.mxu1 %v5753_v30  ;;  %4677 = vmatprep.mubr.msk.f32.mxu1 %vm5308_vm2, %v5309_v8 }
0x2c04   :  { %4963 = vmatprep.subr.bf16.mxu1 %v5307_v0 }
0x2c07   :  { %4965 = vmatpush3.bf16.msra.mxu1 %v5765_v35 }
0x2c08   :  { %4972 = vmatprep.subr.bf16.mxu1 %v5307_v0 }
0x2cd5   :  { %v2470_v39 = vpop.f32.mrb[22].mxu1 }
0x2cd6   :  { %v2474_v60 = vadd.f32 %v2470_v39, %v2157_v33  ;;  %v4657_v40 = vpop.f32.mrb[23].mxu1  ;;  %v2172_v33 = vadd.f32 %v5827_v9, %v5792_v46 }
0x2cd8   :  { %5187 = vtanh.f32 %v2474_v60  ;;  %v4157_v42 = vmul.f32 -1.442695, %v2474_v60 }
0x2cda   :  { %5189 = vpow2.f32 %v4157_v42 }
0x2ce2   :  { %v5188_v41 = vpop.eup %5187 }
0x2ce3   :  { %2484 = vrot.lane.b32.xlu0 %v5188_v41, %s5310_s22 }
0x2ce4   :  { %v5190_v43 = vpop.eup %5189 }
0x2ce5   :  { %v2478_v44 = vadd.f32 1.0, %v5190_v43 }
0x2ce7   :  { %5191 = vrcp.f32 %v2478_v44 }
0x2cf1   :  { %v5192_v32 = vpop.eup %5191 }
0x2cf2   :  { %v2482_v49 = vmul.f32 %v5192_v32, %v2389_v27 }
0x2d55   :  { %v2485_v47 = vpop.permute.xlu0 %2484 }
0x2d56   :  { %v2487_v48 = vmul.f32 %v5192_v32, %v2485_v47 }
0x2d58   :  { %2489 = vrot.lane.b32.xlu1 %v2487_v48, %s5311_s4 }
0x2dca   :  { %v2490_v38 = vpop.permute.xlu1 %2489 }
0x2dcb   :  { %v2492_v51 = vadd.f32 %v2490_v38, %v2482_v49  ;;  %v3027_v49 = vld [vmem:[%s6139_s11] sm:$0xff]  ;;  %v3028_v38 = vld [vmem:[%s6139_s11 + $0x8] sm:$0xff] }
0x2dcd   :  { %5193 = vtanh.f32 %v2492_v51 }
0x2dd7   :  { %v5194_v52 = vpop.eup %5193 }
0x2dd8   :  { %2495 = vrot.lane.b32.xlu0 %v5194_v52, %s5310_s22 }
0x2e4a   :  { %v2496_v4 = vpop.permute.xlu0 %2495 }
0x2e4b   :  { %v2498_v54 = vmul.f32 %v5192_v32, %v2496_v4 }
0x2e4d   :  { %2500 = vrot.lane.b32.xlu1 %v2498_v54, %s5311_s4 }
0x2ebf   :  { %v2501_v55 = vpop.permute.xlu1 %2500 }
0x2ec0   :  { %2503 = vst.msk [vmem:[#allocation3 + $0x10] sm:$0xff] %vm216_vm3, %v2501_v55  ;;  %4667 = vmatmul.mubr.msk.f32.vlgmr.msra.gmra.mrb[38].mxu0 %vm216_vm3, %v2501_v55  ;;  %v3029_v55 = vld [vmem:[%s6139_s11 + $0x10] sm:$0xff] }
0x2ec1   :  { %4968 = vmatpush3.bf16.msra.mxu0 %v5753_v30  ;;  %4688 = vmatprep.mubr.msk.f32.mxu0 %vm5308_vm2, %v5309_v8 }
0x2ec2   :  { %4969 = vmatprep.subr.bf16.mxu0 %v5307_v0 }
0x2ec5   :  { %4971 = vmatpush3.bf16.msra.mxu0 %v5765_v35 }
0x2ec6   :  { %4978 = vmatprep.subr.bf16.mxu0 %v5307_v0 }
0x2f93   :  { %v2573_v61 = vpop.f32.mrb[38].mxu0 }
0x2f94   :  { %v2577_v62 = vadd.f32 %v2573_v61, %v2162_v58  ;;  %v4668_v63 = vpop.f32.mrb[39].mxu0  ;;  %v3030_v58 = vld [vmem:[%s6139_s11 + $0x18] sm:$0xff] }
0x2f95   :  { %v4988_v61 = vpack.c.bf16 %v3030_v58, %v3029_v55  ;;  %v3019_v63 = vld [vmem:[#allocation3] sm:$0xff] }
0x2f96   :  { %5195 = vtanh.f32 %v2577_v62  ;;  %v4159_v2 = vmul.f32 -1.442695, %v2577_v62 }
0x2f98   :  { %5197 = vpow2.f32 %v4159_v2  ;;  %v3021_v2 = vld [vmem:[#allocation3 + $0x10] sm:$0xff] }
0x2fa0   :  { %v5196_v1 = vpop.eup %5195 }
0x2fa1   :  { %2587 = vrot.lane.b32.xlu0 %v5196_v1, %s5310_s22  ;;  %v3020_v1 = vld [vmem:[#allocation3 + $0x8] sm:$0xff] }
0x2fa2   :  { %v5198_v50 = vpop.eup %5197 }
0x2fa3   :  { %v2581_v3 = vadd.f32 1.0, %v5198_v50 }
0x2fa5   :  { %5199 = vrcp.f32 %v2581_v3 }
0x2faf   :  { %v5200_v5 = vpop.eup %5199 }
0x2fb0   :  { %v2585_v53 = vmul.f32 %v5200_v5, %v2492_v51  ;;  %v4984_v51 = vpack.c.bf16 %v3028_v38, %v3027_v49 }
0x3013   :  { %v2588_v6 = vpop.permute.xlu0 %2587 }
0x3014   :  { %v2590_v10 = vmul.f32 %v5200_v5, %v2588_v6  ;;  %v2177_v6 = vadd.f32 %v5792_v46, %v5833_v36 }
0x3016   :  { %2592 = vrot.lane.b32.xlu1 %v2590_v10, %s5311_s4 }
0x3088   :  { %v2593_v7 = vpop.permute.xlu1 %2592 }
0x3089   :  { %v2595_v12 = vadd.f32 %v2593_v7, %v2585_v53 }
0x308b   :  { %5201 = vtanh.f32 %v2595_v12 }
0x3095   :  { %v5202_v37 = vpop.eup %5201 }
0x3096   :  { %2598 = vrot.lane.b32.xlu0 %v5202_v37, %s5310_s22 }
0x3108   :  { %v2599_v59 = vpop.permute.xlu0 %2598 }
0x3109   :  { %v2601_v13 = vmul.f32 %v5200_v5, %v2599_v59 }
0x310b   :  { %2603 = vrot.lane.b32.xlu1 %v2601_v13, %s5311_s4 }
0x317d   :  { %v2604_v14 = vpop.permute.xlu1 %2603 }
0x317e   :  { %2606 = vst.msk [vmem:[#allocation3 + $0x18] sm:$0xff] %vm216_vm3, %v2604_v14  ;;  %4678 = vmatmul.mubr.msk.f32.vlgmr.msra.gmra.mrb[24].mxu1 %vm216_vm3, %v2604_v14 }
0x317f   :  { %4974 = vmatpush3.bf16.msra.mxu1 %v5753_v30  ;;  %4699 = vmatprep.mubr.msk.f32.mxu1 %vm5308_vm2, %v5309_v8 }
0x3180   :  { %4975 = vmatprep.subr.bf16.mxu1 %v5307_v0 }
0x3183   :  { %4977 = vmatpush3.bf16.msra.mxu1 %v5765_v35 }
0x3184   :  { %4985 = vmatprep.subr.bf16.mxu1 %v4984_v51 }
0x3185   :  { %v3022_v50 = vld [vmem:[#allocation3 + $0x18] sm:$0xff] }
0x3251   :  { %v2676_v16 = vpop.f32.mrb[24].mxu1 }
0x3252   :  { %v2680_v17 = vadd.f32 %v2676_v16, %v2167_v15  ;;  %v4679_v18 = vpop.f32.mrb[25].mxu1 }
0x3254   :  { %5203 = vtanh.f32 %v2680_v17  ;;  %v4161_v20 = vmul.f32 -1.442695, %v2680_v17 }
0x3256   :  { %5205 = vpow2.f32 %v4161_v20 }
0x325e   :  { %v5204_v19 = vpop.eup %5203 }
0x325f   :  { %2690 = vrot.lane.b32.xlu0 %v5204_v19, %s5310_s22 }
0x3260   :  { %v5206_v21 = vpop.eup %5205 }
0x3261   :  { %v2684_v22 = vadd.f32 1.0, %v5206_v21 }
0x3263   :  { %5207 = vrcp.f32 %v2684_v22 }
0x326d   :  { %v5208_v23 = vpop.eup %5207 }
0x326e   :  { %v2688_v26 = vmul.f32 %v5208_v23, %v2595_v12 }
0x32d1   :  { %v2691_v24 = vpop.permute.xlu0 %2690 }
0x32d2   :  { %v2693_v25 = vmul.f32 %v5208_v23, %v2691_v24 }
0x32d4   :  { %2695 = vrot.lane.b32.xlu1 %v2693_v25, %s5311_s4 }
0x3346   :  { %v2696_v27 = vpop.permute.xlu1 %2695 }
0x3347   :  { %v2698_v57 = vadd.f32 %v2696_v27, %v2688_v26  ;;  %v3175_v26 = vld [vmem:[%s6140_s12] sm:$0xff]  ;;  %v3176_v27 = vld [vmem:[%s6140_s12 + $0x8] sm:$0xff] }
0x3349   :  { %5209 = vtanh.f32 %v2698_v57 }
0x3353   :  { %v5210_v28 = vpop.eup %5209 }
0x3354   :  { %2701 = vrot.lane.b32.xlu0 %v5210_v28, %s5310_s22  ;;  %v3177_v28 = vld [vmem:[%s6140_s12 + $0x10] sm:$0xff] }
0x33c6   :  { %v2702_v29 = vpop.permute.xlu0 %2701 }
0x33c7   :  { %v2704_v34 = vmul.f32 %v5208_v23, %v2702_v29  ;;  %v3178_v29 = vld [vmem:[%s6140_s12 + $0x18] sm:$0xff] }
0x33c9   :  { %2706 = vrot.lane.b32.xlu1 %v2704_v34, %s5311_s4  ;;  %v5957_v34 = vpack.c.bf16 %v3178_v29, %v3177_v28 }
0x343b   :  { %v2707_v31 = vpop.permute.xlu1 %2706 }
0x343c   :  { %2709 = vst.msk [vmem:[#allocation3 + $0x20] sm:$0xff] %vm216_vm3, %v2707_v31  ;;  %4689 = vmatmul.mubr.msk.f32.vlgmr.msra.gmra.mrb[40].mxu0 %vm216_vm3, %v2707_v31 }
0x343d   :  { %4980 = vmatpush3.bf16.msra.mxu0 %v5753_v30  ;;  %4710 = vmatprep.mubr.msk.f32.mxu0 %vm5308_vm2, %v5309_v8 }
0x343e   :  { %4981 = vmatprep.subr.bf16.mxu0 %v5307_v0 }
0x3441   :  { %4983 = vmatpush3.bf16.msra.mxu0 %v5765_v35 }
0x3442   :  { %4992 = vmatprep.subr.bf16.mxu0 %v5307_v0 }
0x3443   :  { %v3023_v3 = vld [vmem:[#allocation3 + $0x20] sm:$0xff] }
0x350f   :  { %v2779_v39 = vpop.f32.mrb[40].mxu0 }
0x3510   :  { %v2783_v60 = vadd.f32 %v2779_v39, %v2172_v33  ;;  %v4690_v40 = vpop.f32.mrb[41].mxu0 }
0x3511   :  { %v2182_v40 = vadd.f32 %v5831_v11, %v5792_v46 }
0x3512   :  { %5211 = vtanh.f32 %v2783_v60  ;;  %v4163_v30 = vmul.f32 -1.442695, %v2783_v60 }
0x3514   :  { %5213 = vpow2.f32 %v4163_v30 }
0x351c   :  { %v5212_v41 = vpop.eup %5211 }
0x351d   :  { %2793 = vrot.lane.b32.xlu0 %v5212_v41, %s5310_s22 }
0x351e   :  { %v5214_v42 = vpop.eup %5213 }
0x351f   :  { %v2787_v43 = vadd.f32 1.0, %v5214_v42 }
0x3521   :  { %5215 = vrcp.f32 %v2787_v43  ;;  %v5983_v43 = vld [vmem:[%s6141_s13] ss:$0 sm:$0xff] }
0x352b   :  { %v5216_v44 = vpop.eup %5215 }
0x352c   :  { %v2791_v47 = vmul.f32 %v5216_v44, %v2698_v57  ;;  %v5947_v57 = vpack.c.bf16 %v3176_v27, %v3175_v26 }
0x358f   :  { %v2794_v32 = vpop.permute.xlu0 %2793 }
0x3590   :  { %v2796_v35 = vmul.f32 %v5216_v44, %v2794_v32 }
0x3592   :  { %2798 = vrot.lane.b32.xlu1 %v2796_v35, %s5311_s4 }
0x3604   :  { %v2799_v48 = vpop.permute.xlu1 %2798 }
0x3605   :  { %v2801_v9 = vadd.f32 %v2799_v48, %v2791_v47 }
0x3607   :  { %5217 = vtanh.f32 %v2801_v9 }
0x3611   :  { %v5218_v52 = vpop.eup %5217 }
0x3612   :  { %2804 = vrot.lane.b32.xlu0 %v5218_v52, %s5310_s22 }
0x3684   :  { %v2805_v4 = vpop.permute.xlu0 %2804 }
0x3685   :  { %v2807_v54 = vmul.f32 %v5216_v44, %v2805_v4 }
0x3687   :  { %2809 = vrot.lane.b32.xlu1 %v2807_v54, %s5311_s4 }
0x36f9   :  { %v2810_v62 = vpop.permute.xlu1 %2809 }
0x36fa   :  { %2812 = vst.msk [vmem:[#allocation3 + $0x28] sm:$0xff] %vm216_vm3, %v2810_v62  ;;  %4700 = vmatmul.mubr.msk.f32.vlgmr.msra.gmra.mrb[26].mxu1 %vm216_vm3, %v2810_v62 }
0x36fb   :  { %4987 = vmatpush3.bf16.msra.mxu1 %v4984_v51  ;;  %4721 = vmatprep.mubr.msk.f32.mxu1 %vm216_vm3, %v3019_v63 }
0x36fc   :  { %4989 = vmatprep.subr.bf16.mxu1 %v4988_v61 }
0x36ff   :  { %4991 = vmatpush3.bf16.msra.mxu1 %v4988_v61  ;;  %v4142_v61 = vmul.f32 -1.442695, %v5787_v45 }
0x3700   :  { %5004 = vmatprep.subr.bf16.mxu1 %v5307_v0 }
0x3701   :  { %v3024_v5 = vld [vmem:[#allocation3 + $0x28] sm:$0xff] }
0x3702   :  { %4722 = vmatmul.mubr.msk.f32.vlgmr.msra.gmra.mrb[28].mxu1 %vm216_vm3, %v3020_v1 }
0x3703   :  { %4724 = vmatprep.mubr.msk.f32.mxu1 %vm216_vm3, %v3021_v2  ;;  %5006 = vmatpush3.bf16.msra.mxu1 %v5947_v57 }
0x3704   :  { %5007 = vmatprep.subr.bf16.mxu1 %v5307_v0 }
0x3706   :  { %4725 = vmatmul.mubr.msk.f32.gmra.mrb[30].mxu1 %vm216_vm3, %v3022_v50 }
0x3707   :  { %4727 = vmatprep.mubr.msk.f32.mxu1 %vm216_vm3, %v3023_v3  ;;  %5009 = vmatpush3.bf16.msra.mxu1 %v5957_v34 }
0x3708   :  { %5016 = vmatprep.subr.bf16.mxu1 %v5307_v0 }
0x370a   :  { %4728 = vmatmul.mubr.msk.f32.gmra.mrb[32].mxu1 %vm216_vm3, %v3024_v5 }
0x37cd   :  { %v2882_v10 = vpop.f32.mrb[26].mxu1 }
0x37ce   :  { %v2886_v53 = vadd.f32 %v2882_v10, %v2177_v6  ;;  %v4701_v7 = vpop.f32.mrb[27].mxu1 }
0x37d0   :  { %5219 = vtanh.f32 %v2886_v53  ;;  %v4165_v17 = vmul.f32 -1.442695, %v2886_v53 }
0x37d2   :  { %5221 = vpow2.f32 %v4165_v17 }
0x37d5   :  { %v5925_v12 = vpop.f32.mrb[28].mxu1 }
0x37d6   :  { %v3128_v37 = vpop.f32.mrb[29].mxu1 }
0x37d7   :  { %v3129_v44 = vadd.f32 %v5983_v43, %v3128_v37  ;;  %v3134_v37 = vadd.f32 %v5925_v12, %v5983_v43 }
0x37d9   :  { %v5927_v59 = vpop.f32.mrb[30].mxu1 }
0x37da   :  { %v5220_v13 = vpop.eup %5219  ;;  %v5929_v14 = vpop.f32.mrb[31].mxu1 }
0x37db   :  { %2896 = vrot.lane.b32.xlu0 %v5220_v13, %s5310_s22 }
0x37dc   :  { %v5222_v36 = vpop.eup %5221 }
0x37dd   :  { %v5932_v15 = vpop.f32.mrb[32].mxu1  ;;  %v2890_v18 = vadd.f32 1.0, %v5222_v36 }
0x37de   :  { %v5934_v16 = vpop.f32.mrb[33].mxu1 }
0x37df   :  { %5223 = vrcp.f32 %v2890_v18 }
0x37e9   :  { %v5224_v19 = vpop.eup %5223 }
0x37ea   :  { %v2894_v22 = vmul.f32 %v5224_v19, %v2801_v9 }
0x384d   :  { %v2897_v20 = vpop.permute.xlu0 %2896 }
0x384e   :  { %v2899_v21 = vmul.f32 %v5224_v19, %v2897_v20 }
0x3850   :  { %2901 = vrot.lane.b32.xlu1 %v2899_v21, %s5311_s4 }
0x38c2   :  { %v2902_v23 = vpop.permute.xlu1 %2901 }
0x38c3   :  { %v5937_v24 = vadd.f32 %v2902_v23, %v2894_v22 }
0x38c5   :  { %5225 = vtanh.f32 %v5937_v24 }
0x38cf   :  { %v5226_v25 = vpop.eup %5225 }
0x38d0   :  { %2907 = vrot.lane.b32.xlu0 %v5226_v25, %s5310_s22 }
0x3942   :  { %v2908_v31 = vpop.permute.xlu0 %2907 }
0x3943   :  { %v2910_v33 = vmul.f32 %v5224_v19, %v2908_v31 }
0x3945   :  { %2912 = vrot.lane.b32.xlu1 %v2910_v33, %s5311_s4 }
0x39b7   :  { %v2913_v39 = vpop.permute.xlu1 %2912 }
0x39b8   :  { %2915 = vst.msk [vmem:[#allocation3 + $0x30] sm:$0xff] %vm216_vm3, %v2913_v39  ;;  %4711 = vmatmul.mubr.msk.f32.vlgmr.msra.gmra.mrb[42].mxu0 %vm216_vm3, %v2913_v39 }
0x39b9   :  { %4994 = vmatpush3.bf16.msra.mxu0 %v5947_v57  ;;  %4741 = vmatprep.mubr.msk.f32.mxu0 %vm5308_vm2, %v5309_v8 }
0x39ba   :  { %4995 = vmatprep.subr.bf16.mxu0 %v5307_v0 }
0x39bd   :  { %4997 = vmatpush3.bf16.msra.mxu0 %v5957_v34 }
0x39be   :  { %4998 = vmatprep.subr.bf16.mxu0 %v5307_v0 }
0x39bf   :  { %v3025_v60 = vld [vmem:[#allocation3 + $0x30] sm:$0xff] }
0x39c0   :  { %4742 = vmatmul.mubr.f32.vlgmr.msra.gmra.mrb[44].mxu0 %v5309_v8  ;;  %4730 = vmatprep.mubr.msk.f32.mxu1 %vm216_vm3, %v3025_v60 }
0x39c1   :  { %5000 = vmatpush3.bf16.msra.mxu0 %v5947_v57  ;;  %4752 = vmatprep.mubr.msk.f32.mxu0 %vm5308_vm2, %v5309_v8 }
0x39c2   :  { %5001 = vmatprep.subr.bf16.mxu0 %v5307_v0 }
0x39c5   :  { %5003 = vmatpush3.bf16.msra.mxu0 %v5957_v34 }
0x39c6   :  { %5010 = vmatprep.subr.bf16.mxu0 %v5307_v0 }
0x3a8b   :  { %v2985_v41 = vpop.f32.mrb[42].mxu0 }
0x3a8c   :  { %v2989_v30 = vadd.f32 %v2985_v41, %v2182_v40  ;;  %v4712_v42 = vpop.f32.mrb[43].mxu0 }
0x3a93   :  { %v3246_v32 = vpop.f32.mrb[44].mxu0 }
0x3a94   :  { %v3250_v35 = vadd.f32 %v3246_v32, %v3129_v44  ;;  %v4743_v47 = vpop.f32.mrb[45].mxu0 }
0x3a96   :  { %5227 = vtanh.f32 %v3250_v35  ;;  %v4177_v9 = vmul.f32 -1.442695, %v3250_v35 }
0x3a98   :  { %5229 = vpow2.f32 %v4177_v9 }
0x3aa0   :  { %v5228_v48 = vpop.eup %5227 }
0x3aa1   :  { %3260 = vrot.lane.b32.xlu0 %v5228_v48, %s5310_s22 }
0x3aa2   :  { %v5230_v46 = vpop.eup %5229 }
0x3aa3   :  { %v3254_v11 = vadd.f32 1.0, %v5230_v46 }
0x3aa5   :  { %5231 = vrcp.f32 %v3254_v11 }
0x3aaf   :  { %v5232_v49 = vpop.eup %5231 }
0x3ab0   :  { %v3258_v52 = vmul.f32 0.0, %v5232_v49 }
0x3b13   :  { %v3261_v38 = vpop.permute.xlu0 %3260 }
0x3b14   :  { %v3263_v51 = vmul.f32 %v5232_v49, %v3261_v38 }
0x3b16   :  { %3265 = vrot.lane.b32.xlu1 %v3263_v51, %s5311_s4 }
0x3b88   :  { %v3266_v4 = vpop.permute.xlu1 %3265 }
0x3b89   :  { %v5988_v54 = vadd.f32 %v3266_v4, %v3258_v52  ;;  %v3139_v4 = vadd.f32 %v5983_v43, %v5929_v14 }
0x3b8b   :  { %5233 = vtanh.f32 %v5988_v54 }
0x3b8c   :  { %5235 = vtanh.f32 %v5787_v45  ;;  %v4167_v45 = vmul.f32 -1.442695, %v2989_v30 }
0x3b8d   :  { %5237 = vpow2.f32 %v4142_v61 }
0x3b8e   :  { %5239 = vtanh.f32 %v2989_v30 }
0x3b95   :  { %v5234_v55 = vpop.eup %5233 }
0x3b96   :  { %3271 = vrot.lane.b32.xlu0 %v5234_v55, %s5310_s22  ;;  %v5236_v58 = vpop.eup %5235 }
0x3b97   :  { %v5238_v62 = vpop.eup %5237 }
0x3b98   :  { %v2011_v63 = vadd.f32 1.0, %v5238_v62  ;;  %v5240_v50 = vpop.eup %5239 }
0x3b9a   :  { %2017 = vrot.lane.b32.xlu0 %v5236_v58, %s5310_s22  ;;  %5241 = vrcp.f32 %v2011_v63 }
0x3b9b   :  { %5243 = vpow2.f32 %v4167_v45 }
0x3ba4   :  { %v5242_v5 = vpop.eup %5241 }
0x3ba5   :  { %v5244_v53 = vpop.eup %5243  ;;  %v2015_v20 = vmul.f32 %v5242_v5, %v5731_v56 }
0x3ba6   :  { %v2993_v17 = vadd.f32 1.0, %v5244_v53 }
0x3c08   :  { %v3272_v1 = vpop.permute.xlu0 %3271 }
0x3c09   :  { %v3274_v2 = vmul.f32 %v5232_v49, %v3272_v1 }
0x3c0b   :  { %3276 = vrot.lane.b32.xlu1 %v3274_v2, %s5311_s4 }
0x3c0c   :  { %v2018_v3 = vpop.permute.xlu0 %2017 }
0x3c0d   :  { %v2020_v6 = vmul.f32 %v5242_v5, %v2018_v3 }
0x3c0f   :  { %2999 = vrot.lane.b32.xlu1 %v5240_v50, %s5310_s22 }
0x3c13   :  { %2022 = vrot.lane.b32.xlu1 %v2020_v6, %s5311_s4 }
0x3c7d   :  { %v3277_v10 = vpop.permute.xlu1 %3276 }
0x3c7e   :  { %3279 = vst.msk [vmem:[#allocation3] sm:$0xff] %vm216_vm3, %v3277_v10  ;;  %4753 = vmatmul.mubr.msk.f32.vlgmr.msra.gmra.mrb[46].mxu0 %vm216_vm3, %v3277_v10 }
0x3c7f   :  { %5012 = vmatpush3.bf16.msra.mxu0 %v5947_v57  ;;  %4774 = vmatprep.mubr.msk.f32.mxu0 %vm5308_vm2, %v5309_v8 }
0x3c80   :  { %5013 = vmatprep.subr.bf16.mxu0 %v5307_v0 }
0x3c81   :  { %v3000_v7 = vpop.permute.xlu1 %2999 }
0x3c83   :  { %5015 = vmatpush3.bf16.msra.mxu0 %v5957_v34 }
0x3c84   :  { %5022 = vmatprep.subr.bf16.mxu0 %v5307_v0 }
0x3c85   :  { %v2023_v19 = vpop.permute.xlu1 %2022 }
0x3c86   :  { %v2025_v21 = vadd.f32 %v2023_v19, %v2015_v20 }
0x3d51   :  { %v3349_v13 = vpop.f32.mrb[46].mxu0 }
0x3d52   :  { %v3353_v36 = vadd.f32 %v3349_v13, %v3134_v37  ;;  %v4754_v18 = vpop.f32.mrb[47].mxu0  ;;  %v3144_v37 = vadd.f32 %v5927_v59, %v5983_v43 }
0x3d54   :  { %5245 = vtanh.f32 %v3353_v36  ;;  %v4179_v12 = vmul.f32 -1.442695, %v3353_v36 }
0x3d55   :  { %5247 = vrcp.f32 %v2993_v17 }
0x3d56   :  { %5249 = vtanh.f32 %v2025_v21 }
0x3d57   :  { %5251 = vpow2.f32 %v4179_v12 }
0x3d5e   :  { %v5246_v22 = vpop.eup %5245 }
0x3d5f   :  { %3363 = vrot.lane.b32.xlu0 %v5246_v22, %s5310_s22  ;;  %v5248_v23 = vpop.eup %5247 }
0x3d60   :  { %v3002_v25 = vmul.f32 %v5248_v23, %v3000_v7  ;;  %v5250_v26 = vpop.eup %5249  ;;  %v2997_v33 = vmul.f32 %v5248_v23, %v5937_v24 }
0x3d61   :  { %v5252_v27 = vpop.eup %5251 }
0x3d62   :  { %v3357_v28 = vadd.f32 1.0, %v5252_v27 }
0x3d63   :  { %3004 = vrot.lane.b32.xlu0 %v3002_v25, %s5311_s4 }
0x3d64   :  { %5253 = vrcp.f32 %v3357_v28 }
0x3d67   :  { %2028 = vrot.lane.b32.xlu0 %v5250_v26, %s5310_s22 }
0x3d6e   :  { %v5254_v29 = vpop.eup %5253 }
0x3d6f   :  { %v3361_v42 = vmul.f32 %v5254_v29, %v5988_v54 }
0x3dd1   :  { %v3364_v31 = vpop.permute.xlu0 %3363 }
0x3dd2   :  { %v3366_v56 = vmul.f32 %v5254_v29, %v3364_v31 }
0x3dd4   :  { %3368 = vrot.lane.b32.xlu1 %v3366_v56, %s5311_s4  ;;  %v3149_v56 = vadd.f32 %v5983_v43, %v5934_v16 }
0x3dd5   :  { %v3005_v39 = vpop.permute.xlu0 %3004 }
0x3dd6   :  { %v3007_v60 = vadd.f32 %v3005_v39, %v2997_v33 }
0x3dd8   :  { %5255 = vtanh.f32 %v3007_v60 }
0x3dd9   :  { %v2029_v41 = vpop.permute.xlu0 %2028 }
0x3dda   :  { %v6015_v30 = vmul.f32 %v5242_v5, %v2029_v41 }
0x3de2   :  { %v5256_v40 = vpop.eup %5255 }
0x3de3   :  { %3010 = vrot.lane.b32.xlu1 %v5256_v40, %s5310_s22 }
0x3de7   :  { %2033 = vrot.lane.b32.xlu1 %v6015_v30, %s5311_s4 }
0x3e46   :  { %v3369_v44 = vpop.permute.xlu1 %3368 }
0x3e47   :  { %v3371_v32 = vadd.f32 %v3369_v44, %v3361_v42 }
0x3e49   :  { %5257 = vtanh.f32 %v3371_v32 }
0x3e53   :  { %v5258_v35 = vpop.eup %5257 }
0x3e54   :  { %3374 = vrot.lane.b32.xlu0 %v5258_v35, %s5310_s22 }
0x3e55   :  { %v3011_v24 = vpop.permute.xlu1 %3010 }
0x3e56   :  { %v3013_v47 = vmul.f32 %v5248_v23, %v3011_v24 }
0x3e58   :  { %3015 = vrot.lane.b32.xlu0 %v3013_v47, %s5311_s4 }
0x3e59   :  { %v2034_v48 = vpop.permute.xlu1 %2033 }
0x3e5a   :  { %2036 = vst.msk [vmem:[#allocation3 + $0x38] sm:$0xff] %vm216_vm3, %v2034_v48 }
0x3ec6   :  { %v3375_v9 = vpop.permute.xlu0 %3374 }
0x3ec7   :  { %v3377_v46 = vmul.f32 %v5254_v29, %v3375_v9 }
0x3ec9   :  { %3379 = vrot.lane.b32.xlu1 %v3377_v46, %s5311_s4 }
0x3eca   :  { %v3016_v11 = vpop.permute.xlu0 %3015 }
0x3ecb   :  { %3018 = vst.msk [vmem:[#allocation3 + $0x38] sm:$0xff] %vm216_vm3, %v3016_v11 }
0x3ed2   :  { %v3026_v49 = vld [vmem:[#allocation3 + $0x38] sm:$0xff] }
0x3ed3   :  { %4731 = vmatmul.mubr.msk.f32.gmra.mrb[34].mxu1 %vm216_vm3, %v3026_v49 }
0x3ed4   :  { %4763 = vmatprep.mubr.msk.f32.mxu1 %vm5308_vm2, %v5309_v8 }
0x3f3b   :  { %v3380_v38 = vpop.permute.xlu1 %3379 }
0x3f3c   :  { %3382 = vst.msk [vmem:[#allocation3 + $0x8] sm:$0xff] %vm216_vm3, %v3380_v38  ;;  %4764 = vmatmul.mubr.msk.f32.vlgmr.msra.gmra.mrb[36].mxu1 %vm216_vm3, %v3380_v38  ;;  %v3154_v38 = vadd.f32 %v5932_v15, %v5983_v43 }
0x3f3d   :  { %5018 = vmatpush3.bf16.msra.mxu1 %v5947_v57  ;;  %4785 = vmatprep.mubr.msk.f32.mxu1 %vm5308_vm2, %v5309_v8 }
0x3f3e   :  { %5019 = vmatprep.subr.bf16.mxu1 %v5307_v0 }
0x3f41   :  { %5021 = vmatpush3.bf16.msra.mxu1 %v5957_v34 }
0x3f42   :  { %5028 = vmatprep.subr.bf16.mxu1 %v5307_v0 }
0x3fa6   :  { %v6036_v51 = vpop.f32.mrb[34].mxu1 }
0x3fa7   :  { %v6038_v52 = vpop.f32.mrb[35].mxu1 }
0x400f   :  { %v3452_v54 = vpop.f32.mrb[36].mxu1 }
0x4010   :  { %v3456_v55 = vadd.f32 %v3452_v54, %v3139_v4  ;;  %v4765_v58 = vpop.f32.mrb[37].mxu1 }
0x4012   :  { %5259 = vtanh.f32 %v3456_v55  ;;  %v4181_v62 = vmul.f32 -1.442695, %v3456_v55 }
0x4014   :  { %5261 = vpow2.f32 %v4181_v62 }
0x401c   :  { %v5260_v61 = vpop.eup %5259 }
0x401d   :  { %3466 = vrot.lane.b32.xlu0 %v5260_v61, %s5310_s22 }
0x401e   :  { %v5262_v63 = vpop.eup %5261 }
0x401f   :  { %v3460_v1 = vadd.f32 1.0, %v5262_v63 }
0x4021   :  { %5263 = vrcp.f32 %v3460_v1 }
0x402b   :  { %v5264_v2 = vpop.eup %5263 }
0x402c   :  { %v3464_v5 = vmul.f32 %v5264_v2, %v3371_v32 }
0x408f   :  { %v3467_v50 = vpop.permute.xlu0 %3466 }
0x4090   :  { %v3469_v3 = vmul.f32 %v5264_v2, %v3467_v50 }
0x4092   :  { %3471 = vrot.lane.b32.xlu1 %v3469_v3, %s5311_s4 }
0x4104   :  { %v3472_v6 = vpop.permute.xlu1 %3471 }
0x4105   :  { %v3474_v14 = vadd.f32 %v3472_v6, %v3464_v5 }
0x4107   :  { %5265 = vtanh.f32 %v3474_v14 }
0x4111   :  { %v5266_v10 = vpop.eup %5265 }
0x4112   :  { %3477 = vrot.lane.b32.xlu0 %v5266_v10, %s5310_s22  ;;  %v3159_v10 = vadd.f32 %v5983_v43, %v6038_v52 }
0x4184   :  { %v3478_v45 = vpop.permute.xlu0 %3477 }
0x4185   :  { %v3480_v53 = vmul.f32 %v5264_v2, %v3478_v45 }
0x4187   :  { %3482 = vrot.lane.b32.xlu1 %v3480_v53, %s5311_s4 }
0x41f9   :  { %v3483_v7 = vpop.permute.xlu1 %3482 }
0x41fa   :  { %3485 = vst.msk [vmem:[#allocation3 + $0x10] sm:$0xff] %vm216_vm3, %v3483_v7  ;;  %4775 = vmatmul.mubr.msk.f32.vlgmr.msra.gmra.mrb[48].mxu0 %vm216_vm3, %v3483_v7 }
0x41fb   :  { %5024 = vmatpush3.bf16.msra.mxu0 %v5947_v57  ;;  %4796 = vmatprep.mubr.msk.f32.mxu0 %vm5308_vm2, %v5309_v8 }
0x41fc   :  { %5025 = vmatprep.subr.bf16.mxu0 %v5307_v0 }
0x41ff   :  { %5027 = vmatpush3.bf16.msra.mxu0 %v5957_v34 }
0x4200   :  { %5034 = vmatprep.subr.bf16.mxu0 %v5307_v0 }
0x42cd   :  { %v3555_v13 = vpop.f32.mrb[48].mxu0 }
0x42ce   :  { %v3559_v17 = vadd.f32 %v3555_v13, %v3144_v37  ;;  %v4776_v36 = vpop.f32.mrb[49].mxu0 }
0x42d0   :  { %5267 = vtanh.f32 %v3559_v17  ;;  %v4183_v19 = vmul.f32 -1.442695, %v3559_v17 }
0x42d2   :  { %5269 = vpow2.f32 %v4183_v19 }
0x42da   :  { %v5268_v18 = vpop.eup %5267 }
0x42db   :  { %3569 = vrot.lane.b32.xlu0 %v5268_v18, %s5310_s22 }
0x42dc   :  { %v5270_v20 = vpop.eup %5269 }
0x42dd   :  { %v3563_v21 = vadd.f32 1.0, %v5270_v20 }
0x42df   :  { %5271 = vrcp.f32 %v3563_v21 }
0x42e9   :  { %v5272_v22 = vpop.eup %5271 }
0x42ea   :  { %v3567_v26 = vmul.f32 %v5272_v22, %v3474_v14 }
0x434d   :  { %v3570_v23 = vpop.permute.xlu0 %3569 }
0x434e   :  { %v3572_v25 = vmul.f32 %v5272_v22, %v3570_v23 }
0x4350   :  { %3574 = vrot.lane.b32.xlu1 %v3572_v25, %s5311_s4 }
0x43c2   :  { %v3575_v12 = vpop.permute.xlu1 %3574 }
0x43c3   :  { %v3577_v59 = vadd.f32 %v3575_v12, %v3567_v26  ;;  %v3164_v12 = vadd.f32 %v6036_v51, %v5983_v43  ;;  %v4002_v51 = vld [vmem:[%s6142_s14] sm:$0xff] }
0x43c5   :  { %5273 = vtanh.f32 %v3577_v59 }
0x43cf   :  { %v5274_v27 = vpop.eup %5273 }
0x43d0   :  { %3580 = vrot.lane.b32.xlu0 %v5274_v27, %s5310_s22 }
0x4442   :  { %v3581_v28 = vpop.permute.xlu0 %3580 }
0x4443   :  { %v3583_v29 = vmul.f32 %v5272_v22, %v3581_v28 }
0x4445   :  { %3585 = vrot.lane.b32.xlu1 %v3583_v29, %s5311_s4 }
0x44b7   :  { %v3586_v31 = vpop.permute.xlu1 %3585 }
0x44b8   :  { %3588 = vst.msk [vmem:[#allocation3 + $0x18] sm:$0xff] %vm216_vm3, %v3586_v31  ;;  %4786 = vmatmul.mubr.msk.f32.vlgmr.msra.gmra.mrb[38].mxu1 %vm216_vm3, %v3586_v31 }
0x44b9   :  { %5030 = vmatpush3.bf16.msra.mxu1 %v5947_v57  ;;  %4807 = vmatprep.mubr.msk.f32.mxu1 %vm5308_vm2, %v5309_v8 }
0x44ba   :  { %5031 = vmatprep.subr.bf16.mxu1 %v5307_v0 }
0x44bd   :  { %5033 = vmatpush3.bf16.msra.mxu1 %v5957_v34 }
0x44be   :  { %5040 = vmatprep.subr.bf16.mxu1 %v5307_v0 }
0x458b   :  { %v3658_v33 = vpop.f32.mrb[38].mxu1 }
0x458c   :  { %v3662_v39 = vadd.f32 %v3658_v33, %v3149_v56  ;;  %v4787_v60 = vpop.f32.mrb[39].mxu1 }
0x458e   :  { %5275 = vtanh.f32 %v3662_v39  ;;  %v4185_v41 = vmul.f32 -1.442695, %v3662_v39 }
0x4590   :  { %5277 = vpow2.f32 %v4185_v41 }
0x4598   :  { %v5276_v40 = vpop.eup %5275 }
0x4599   :  { %3672 = vrot.lane.b32.xlu0 %v5276_v40, %s5310_s22 }
0x459a   :  { %v5278_v42 = vpop.eup %5277 }
0x459b   :  { %v3666_v44 = vadd.f32 1.0, %v5278_v42 }
0x459d   :  { %5279 = vrcp.f32 %v3666_v44  ;;  %v4003_v44 = vld [vmem:[%s6142_s14 + $0x8] sm:$0xff] }
0x45a7   :  { %v5280_v32 = vpop.eup %5279 }
0x45a8   :  { %v3670_v47 = vmul.f32 %v5280_v32, %v3577_v59 }
0x460b   :  { %v3673_v35 = vpop.permute.xlu0 %3672 }
0x460c   :  { %v3675_v24 = vmul.f32 %v5280_v32, %v3673_v35  ;;  %v5041_v35 = vpack.c.bf16 %v4003_v44, %v4002_v51 }
0x460e   :  { %3677 = vrot.lane.b32.xlu1 %v3675_v24, %s5311_s4  ;;  %v4005_v24 = vld [vmem:[%s6142_s14 + $0x18] sm:$0xff] }
0x4680   :  { %v3678_v48 = vpop.permute.xlu1 %3677 }
0x4681   :  { %v3680_v16 = vadd.f32 %v3678_v48, %v3670_v47 }
0x4683   :  { %5281 = vtanh.f32 %v3680_v16 }
0x468d   :  { %v5282_v9 = vpop.eup %5281 }
0x468e   :  { %3683 = vrot.lane.b32.xlu0 %v5282_v9, %s5310_s22 }
0x4700   :  { %v3684_v46 = vpop.permute.xlu0 %3683 }
0x4701   :  { %v3686_v11 = vmul.f32 %v5280_v32, %v3684_v46  ;;  %v4004_v32 = vld [vmem:[%s6142_s14 + $0x10] sm:$0xff] }
0x4702   :  { %v5044_v47 = vpack.c.bf16 %v4005_v24, %v4004_v32 }
0x4703   :  { %3688 = vrot.lane.b32.xlu1 %v3686_v11, %s5311_s4 }
0x4775   :  { %v3689_v49 = vpop.permute.xlu1 %3688 }
0x4776   :  { %3691 = vst.msk [vmem:[#allocation3 + $0x20] sm:$0xff] %vm216_vm3, %v3689_v49  ;;  %4797 = vmatmul.mubr.msk.f32.vlgmr.msra.gmra.mrb[50].mxu0 %vm216_vm3, %v3689_v49 }
0x4777   :  { %5036 = vmatpush3.bf16.msra.mxu0 %v5947_v57  ;;  %4818 = vmatprep.mubr.msk.f32.mxu0 %vm5308_vm2, %v5309_v8 }
0x4778   :  { %5037 = vmatprep.subr.bf16.mxu0 %v5307_v0 }
0x477b   :  { %5039 = vmatpush3.bf16.msra.mxu0 %v5957_v34 }
0x4849   :  { %v3761_v4 = vpop.f32.mrb[50].mxu0 }
0x484a   :  { %v3765_v54 = vadd.f32 %v3761_v4, %v3154_v38  ;;  %v4798_v55 = vpop.f32.mrb[51].mxu0 }
0x484c   :  { %5283 = vtanh.f32 %v3765_v54  ;;  %v4187_v61 = vmul.f32 -1.442695, %v3765_v54 }
0x484e   :  { %5285 = vpow2.f32 %v4187_v61 }
0x4856   :  { %v5284_v58 = vpop.eup %5283 }
0x4857   :  { %3775 = vrot.lane.b32.xlu0 %v5284_v58, %s5310_s22 }
0x4858   :  { %v5286_v57 = vpop.eup %5285 }
0x4859   :  { %v3769_v62 = vadd.f32 1.0, %v5286_v57 }
0x485b   :  { %5287 = vrcp.f32 %v3769_v62 }
0x4865   :  { %v5288_v63 = vpop.eup %5287 }
0x4866   :  { %v3773_v34 = vmul.f32 %v5288_v63, %v3680_v16 }
0x48c9   :  { %v3776_v1 = vpop.permute.xlu0 %3775 }
0x48ca   :  { %v3778_v2 = vmul.f32 %v5288_v63, %v3776_v1 }
0x48cc   :  { %3780 = vrot.lane.b32.xlu1 %v3778_v2, %s5311_s4 }
0x493e   :  { %v3781_v50 = vpop.permute.xlu1 %3780 }
0x493f   :  { %v3783_v15 = vadd.f32 %v3781_v50, %v3773_v34 }
0x4941   :  { %5289 = vtanh.f32 %v3783_v15 }
0x494b   :  { %v5290_v3 = vpop.eup %5289 }
0x494c   :  { %3786 = vrot.lane.b32.xlu0 %v5290_v3, %s5310_s22 }
0x49be   :  { %v3787_v5 = vpop.permute.xlu0 %3786 }
0x49bf   :  { %v3789_v6 = vmul.f32 %v5288_v63, %v3787_v5 }
0x49c1   :  { %3791 = vrot.lane.b32.xlu1 %v3789_v6, %s5311_s4 }
0x4a33   :  { %v3792_v14 = vpop.permute.xlu1 %3791 }
0x4a34   :  { %3794 = vst.msk [vmem:[#allocation3 + $0x28] sm:$0xff] %vm216_vm3, %v3792_v14  ;;  %4808 = vmatmul.mubr.msk.f32.vlgmr.msra.gmra.mrb[40].mxu1 %vm216_vm3, %v3792_v14 }
0x4a35   :  { %4829 = vmatprep.mubr.msk.f32.mxu1 %vm5308_vm2, %v5309_v8  ;;  %5042 = vmatpush3.bf16.msra.mxu1 %v5041_v35 }
0x4a36   :  { %5043 = vmatprep.subr.bf16.mxu1 %v5307_v0  ;;  %v4192_v0 = vld [vmem:[%s6143_s15] ss:$0 sm:$0xff] }
0x4a39   :  { %5045 = vmatpush3.bf16.msra.mxu1 %v5044_v47 }
0x4b07   :  { %v3864_v45 = vpop.f32.mrb[40].mxu1 }
0x4b08   :  { %v3868_v53 = vadd.f32 %v3864_v45, %v3159_v10  ;;  %v4809_v7 = vpop.f32.mrb[41].mxu1 }
0x4b0a   :  { %5291 = vtanh.f32 %v3868_v53  ;;  %v4189_v13 = vmul.f32 -1.442695, %v3868_v53 }
0x4b0c   :  { %5293 = vpow2.f32 %v4189_v13 }
0x4b14   :  { %v5292_v37 = vpop.eup %5291 }
0x4b15   :  { %3878 = vrot.lane.b32.xlu0 %v5292_v37, %s5310_s22 }
0x4b16   :  { %v5294_v17 = vpop.eup %5293 }
0x4b17   :  { %v3872_v36 = vadd.f32 1.0, %v5294_v17 }
0x4b19   :  { %5295 = vrcp.f32 %v3872_v36 }
0x4b23   :  { %v5296_v18 = vpop.eup %5295 }
0x4b24   :  { %v3876_v8 = vmul.f32 %v5296_v18, %v3783_v15 }
0x4b87   :  { %v3879_v19 = vpop.permute.xlu0 %3878 }
0x4b88   :  { %v3881_v20 = vmul.f32 %v5296_v18, %v3879_v19 }
0x4b8a   :  { %3883 = vrot.lane.b32.xlu1 %v3881_v20, %s5311_s4 }
0x4bfc   :  { %v3884_v21 = vpop.permute.xlu1 %3883 }
0x4bfd   :  { %v3886_v52 = vadd.f32 %v3884_v21, %v3876_v8 }
0x4bff   :  { %5297 = vtanh.f32 %v3886_v52 }
0x4c09   :  { %v5298_v22 = vpop.eup %5297 }
0x4c0a   :  { %3889 = vrot.lane.b32.xlu0 %v5298_v22, %s5310_s22 }
0x4c7c   :  { %v3890_v23 = vpop.permute.xlu0 %3889 }
0x4c7d   :  { %v3892_v25 = vmul.f32 %v5296_v18, %v3890_v23 }
0x4c7f   :  { %3894 = vrot.lane.b32.xlu1 %v3892_v25, %s5311_s4 }
0x4cf1   :  { %v3895_v26 = vpop.permute.xlu1 %3894 }
0x4cf2   :  { %3897 = vst.msk [vmem:[#allocation3 + $0x30] sm:$0xff] %vm216_vm3, %v3895_v26  ;;  %4819 = vmatmul.mubr.msk.f32.vlgmr.msra.gmra.mrb[52].mxu0 %vm216_vm3, %v3895_v26 }
0x4dc5   :  { %v3967_v59 = vpop.f32.mrb[52].mxu0 }
0x4dc6   :  { %v3971_v27 = vadd.f32 %v3967_v59, %v3164_v12  ;;  %v4820_v28 = vpop.f32.mrb[53].mxu0 }
0x4dc8   :  { %5299 = vtanh.f32 %v3971_v27  ;;  %v4191_v31 = vmul.f32 -1.442695, %v3971_v27 }
0x4dca   :  { %5301 = vpow2.f32 %v4191_v31 }
0x4dd2   :  { %v5300_v29 = vpop.eup %5299 }
0x4dd3   :  { %3981 = vrot.lane.b32.xlu0 %v5300_v29, %s5310_s22 }
0x4dd4   :  { %v5302_v56 = vpop.eup %5301 }
0x4dd5   :  { %v3975_v33 = vadd.f32 1.0, %v5302_v56 }
0x4dd7   :  { %5303 = vrcp.f32 %v3975_v33 }
0x4de1   :  { %v5304_v39 = vpop.eup %5303 }
0x4de2   :  { %v3979_v41 = vmul.f32 %v5304_v39, %v3886_v52 }
0x4e45   :  { %v3982_v60 = vpop.permute.xlu0 %3981 }
0x4e46   :  { %v3984_v40 = vmul.f32 %v5304_v39, %v3982_v60 }
0x4e48   :  { %3986 = vrot.lane.b32.xlu1 %v3984_v40, %s5311_s4 }
0x4eba   :  { %v3987_v42 = vpop.permute.xlu1 %3986 }
0x4ebb   :  { %v3989_v43 = vadd.f32 %v3987_v42, %v3979_v41 }
0x4ebd   :  { %5305 = vtanh.f32 %v3989_v43 }
0x4ec7   :  { %v5306_v48 = vpop.eup %5305 }
0x4ec8   :  { %3992 = vrot.lane.b32.xlu0 %v5306_v48, %s5310_s22 }
0x4f3a   :  { %v3993_v16 = vpop.permute.xlu0 %3992 }
0x4f3b   :  { %v3995_v9 = vmul.f32 %v5304_v39, %v3993_v16 }
0x4f3d   :  { %v4001_v46 = vadd.f32 %v3995_v9, %v6015_v30  ;;  %3997 = vrot.lane.b32.xlu0 %v3995_v9, %s5311_s4 }
0x4f3f   :  { %4014 = vrot.lane.b32.xlu1 %v4001_v46, %s5311_s4 }
0x4faf   :  { %v3998_v11 = vpop.permute.xlu0 %3997 }
0x4fb0   :  { %4000 = vst.msk [vmem:[#allocation3 + $0x38] sm:$0xff] %vm216_vm3, %v3998_v11 }
0x4fb1   :  { %v4015_v49 = vpop.permute.xlu1 %4014 }
0x4fb2   :  { %4830 = vmatmul.mubr.msk.f32.vlgmr.msra.gmra.mrb[42].mxu1 %vm216_vm3, %v4015_v49 }
0x5085   :  { %v4084_v38 = vpop.f32.mrb[42].mxu1 }
0x5086   :  { %v4085_v4 = vadd.f32 %v4192_v0, %v4084_v38  ;;  %v4831_v54 = vpop.f32.mrb[43].mxu1 }
0x5088   :  { %4089 = vst.msk [vmem:[%s6144_s16] sm:$0xff] %vm4088_vm4, %v4085_v4 }

</bundles_post_ra>
